<compile_context>
chip_gen: v7x
topology: tpu7x:2x2x1
jax: 0.10.0
libtpu: 0.0.40
codegen_flags: <defaults>
</compile_context>

<pallas_src>
import jax
import jax.numpy as jnp
from jax import lax
from jax.experimental import pallas as pl
from jax.experimental.pallas import tpu as pltpu

# ---- small synthetic sizes ----
B, S = 2, 8        # batch, sequence length
D = 32             # "bert_dim" (reduced from 768)
H = D              # GRU hidden size (lstm_dim == -1 -> hidden = bert_dim)
O = 4              # len(punctuation_dict)
F = 4 * D          # FFN intermediate
V = 50             # vocab size
HP = 128           # 128-lane slot per GRU gate / direction (tile-aligned slices)
OPAD = 128         # lane-dense padded logits width (sliced back to O outside)

_VMEM = pl.BlockSpec(memory_space=pltpu.MemorySpace.VMEM)


def _layernorm(x, gamma, beta, eps=1e-5):
    mu = jnp.mean(x, axis=-1, keepdims=True)
    xc = x - mu
    var = jnp.mean(xc * xc, axis=-1, keepdims=True)
    return xc * lax.rsqrt(var + eps) * gamma + beta


# --------------------------------------------------------------------------
# Single fused kernel: synthetic encoder -> bidirectional GRU -> Linear
# --------------------------------------------------------------------------
def deep_punct_kernel(emb_ref, mask_ref,
                      wq_ref, bq_ref, wk_ref, bk_ref, wv_ref, bv_ref,
                      wo_ref, bo_ref,
                      w1_ref, b1_ref, w2_ref, b2_ref,
                      g1_ref, be1_ref, g2_ref, be2_ref,
                      wi_ref, bi_ref, wh_ref, bhf_ref, bhb_ref,
                      wl_ref, bl_ref,
                      out_ref):
    f32 = jnp.float32
    Bk, Sk, Dk = emb_ref.shape
    HPk = wh_ref.shape[1] // 3          # 128-lane slot per gate

    # ---------------- synthetic BERT encoder layer -------------------------
    # TODO(synk): pretrained 12-layer phobert-base replaced by one synthetic
    # self-attention + FFN layer with deterministic random weights.
    x = emb_ref[...]                                    # (B, S, D)
    mask = mask_ref[...]                                # (B, 1, S), 1 = keep
    # separate q/k/v projections: no intra-tile lane slicing of a fused QKV
    q = jnp.einsum('bsd,de->bse', x, wq_ref[...], preferred_element_type=f32) + bq_ref[...]
    k = jnp.einsum('bsd,de->bse', x, wk_ref[...], preferred_element_type=f32) + bk_ref[...]
    v = jnp.einsum('bsd,de->bse', x, wv_ref[...], preferred_element_type=f32) + bv_ref[...]
    scores = jnp.einsum('bqd,bkd->bqk', q, k,
                        preferred_element_type=f32) * (1.0 / float(Dk) ** 0.5)
    scores = scores + (1.0 - mask) * (-1e9)             # (B,S,S) + (B,1,S)
    scores = scores - jnp.max(scores, axis=-1, keepdims=True)
    p = jnp.exp(scores)
    attn = p * pl.reciprocal(jnp.sum(p, axis=-1, keepdims=True), approx=True)
    ctx = jnp.einsum('bqk,bkd->bqd', attn, v, preferred_element_type=f32)
    ctx = jnp.einsum('bsd,de->bse', ctx, wo_ref[...],
                     preferred_element_type=f32) + bo_ref[...]
    h1 = _layernorm(x + ctx, g1_ref[...], be1_ref[...])
    ff = jnp.einsum('bsd,df->bsf', h1, w1_ref[...],
                    preferred_element_type=f32) + b1_ref[...]
    # TODO(synk): HF BERT uses exact (erf) GELU; tanh approximation kept.
    ff = jax.nn.gelu(ff, approximate=True)
    ff = jnp.einsum('bsf,fd->bsd', ff, w2_ref[...],
                    preferred_element_type=f32) + b2_ref[...]
    feats = _layernorm(h1 + ff, g2_ref[...], be2_ref[...])      # (B, S, D)

    # -------- GRU input projections: both directions in ONE matmul ---------
    # lanes: [fwd r | fwd z | fwd n | bwd r | bwd z | bwd n], 128-lane slot each
    gi_all = jnp.einsum('bsd,de->bse', feats, wi_ref[...],
                        preferred_element_type=f32) + bi_ref[...]   # (B,S,6*HP)
    gi_fwd = gi_all[..., :3 * HPk]                                  # tile-aligned split
    gi_bwd = gi_all[..., 3 * HPk:]

    # per-step stacked gate inputs (rows = [fwd batch | bwd batch]); these do not
    # depend on the recurrent state, so the scheduler can hoist them off the
    # serial path of the fully unrolled recurrence below.
    gi_steps = [jnp.concatenate([gi_fwd[:, t, :], gi_bwd[:, Sk - 1 - t, :]], axis=0)
                for t in range(Sk)]                                 # each (2B, 3*HP)

    wh = wh_ref[...]                                                # (2*HP, 3*HP)
    bh_rows = jnp.concatenate(
        [jnp.broadcast_to(bhf_ref[...], (Bk, 3 * HPk)),
         jnp.broadcast_to(bhb_ref[...], (Bk, 3 * HPk))], axis=0)    # (2B, 3*HP)
    rows = lax.broadcasted_iota(jnp.int32, (2 * Bk, 1), 0)
    fwd_mask = (rows < Bk).astype(f32)                              # (2B, 1)
    bwd_mask = 1.0 - fwd_mask

    # ------ stacked bidirectional recurrence: all 2*B chains in one slab ----
    # h     : (2B, HP)   hidden slab, valid lanes [:H]; padding lanes stay 0
    # state : (2B, 2*HP) block-diag: fwd rows [h|0], bwd rows [0|h], so a single
    #         matmul against vstack(wh_f, wh_b) applies each direction's weights
    h = jnp.zeros((2 * Bk, HPk), f32)
    state = jnp.zeros((2 * Bk, 2 * HPk), f32)
    yf = [None] * Sk
    yb = [None] * Sk
    for t in range(Sk):                 # fully unrolled; ONE MXU push per step
        gh = jnp.dot(state, wh, preferred_element_type=f32) + bh_rows   # (2B, 3*HP)
        gi = gi_steps[t]
        r = jax.nn.sigmoid(gi[:, :HPk] + gh[:, :HPk])
        z = jax.nn.sigmoid(gi[:, HPk:2 * HPk] + gh[:, HPk:2 * HPk])
        # PyTorch nn.GRU: b_hn stays inside the r * (...) term (it lives in gh).
        n = jnp.tanh(gi[:, 2 * HPk:] + r * gh[:, 2 * HPk:])
        h = (1.0 - z) * n + z * h       # padding lanes remain exactly 0
        state = jnp.concatenate([h * fwd_mask, h * bwd_mask], axis=-1)
        yf[t] = h[:Bk]                  # forward hidden for position t
        yb[Sk - 1 - t] = h[Bk:]         # backward hidden for position S-1-t

    # -------- final Linear epilogue: one matmul + lane-dense store ----------
    # rows ordered (t, b); concat([yf, yb]) @ vstack(wl_f, wl_b) == Linear(cat).
    y_cat = jnp.concatenate([jnp.concatenate(yf, axis=0),
                             jnp.concatenate(yb, axis=0)], axis=-1)  # (S*B, 2*HP)
    out_ref[...] = jnp.dot(y_cat, wl_ref[...],
                           preferred_element_type=f32) + bl_ref[...]  # (S*B, OPAD)


# --------------------------------------------------------------------------
# Parameter init (deterministic, synthetic)
# --------------------------------------------------------------------------
def _pad_gates(w, hp):
    """Scatter contiguous [r|z|n] gates (last dim 3*H) onto a 128-lane stride per
    gate (last dim 3*hp).  Padding lanes are exactly zero (required so the GRU
    hidden-slab padding lanes stay zero)."""
    h = w.shape[-1] // 3
    out = jnp.zeros(w.shape[:-1] + (3 * hp,), w.dtype)
    for g in range(3):
        out = out.at[..., g * hp: g * hp + h].set(w[..., g * h:(g + 1) * h])
    return out


def init_params(key):
    ks = jax.random.split(key, 18)
    s = 0.02
    f32 = jnp.float32
    p = {}
    # embeddings (gather stays in plain JAX)
    p['emb'] = jax.random.normal(ks[0], (V, D), f32) * s
    p['pos'] = jax.random.normal(ks[1], (S, D), f32) * s
    # encoder (separate q/k/v projections)
    p['wq'] = jax.random.normal(ks[2], (D, D), f32) * s; p['bq'] = jnp.zeros((1, D), f32)
    p['wk'] = jax.random.normal(ks[3], (D, D), f32) * s; p['bk'] = jnp.zeros((1, D), f32)
    p['wv'] = jax.random.normal(ks[4], (D, D), f32) * s; p['bv'] = jnp.zeros((1, D), f32)
    p['wo'] = jax.random.normal(ks[5], (D, D), f32) * s; p['bo'] = jnp.zeros((1, D), f32)
    p['w1'] = jax.random.normal(ks[6], (D, F), f32) * s; p['b1'] = jnp.zeros((1, F), f32)
    p['w2'] = jax.random.normal(ks[7], (F, D), f32) * s; p['b2'] = jnp.zeros((1, D), f32)
    p['g1'] = jnp.ones((1, D), f32);  p['be1'] = jnp.zeros((1, D), f32)
    p['g2'] = jnp.ones((1, D), f32);  p['be2'] = jnp.zeros((1, D), f32)

    # GRU (PyTorch init: uniform(-1/sqrt(H), 1/sqrt(H))); gate order [r|z|n]
    kg = 1.0 / (H ** 0.5)
    u = lambda kk, shape: jax.random.uniform(kk, shape, f32, -kg, kg)
    wi_f, wh_f = u(ks[8], (D, 3 * H)), u(ks[9], (H, 3 * H))
    bi_f, bh_f = u(ks[10], (1, 3 * H)), u(ks[11], (1, 3 * H))
    wi_b, wh_b = u(ks[12], (D, 3 * H)), u(ks[13], (H, 3 * H))
    bi_b, bh_b = u(ks[14], (1, 3 * H)), u(ks[15], (1, 3 * H))
    # fused both-direction input projection, 128-lane slot per gate
    p['wi'] = jnp.concatenate([_pad_gates(wi_f, HP), _pad_gates(wi_b, HP)], axis=-1)
    p['bi'] = jnp.concatenate([_pad_gates(bi_f, HP), _pad_gates(bi_b, HP)], axis=-1)
    # block-diagonal recurrent weight: rows [0:H] = wh_f, rows [HP:HP+H] = wh_b
    wh = jnp.zeros((2 * HP, 3 * HP), f32)
    wh = wh.at[:H].set(_pad_gates(wh_f, HP)).at[HP:HP + H].set(_pad_gates(wh_b, HP))
    p['wh'] = wh
    p['bhf'] = _pad_gates(bh_f, HP)
    p['bhb'] = _pad_gates(bh_b, HP)

    # Linear (in = 2H, out = O): vstacked forward/backward halves, padded to
    # OPAD lanes for an unmasked lane-dense store (padding lanes MUST stay zero)
    kl = 1.0 / ((2 * H) ** 0.5)
    wl = jax.random.uniform(ks[16], (2 * H, O), f32, -kl, kl)
    bl = jax.random.uniform(ks[17], (1, O), f32, -kl, kl)
    wlp = jnp.zeros((2 * HP, OPAD), f32)
    wlp = wlp.at[:H, :O].set(wl[:H]).at[HP:HP + H, :O].set(wl[H:])
    p['wl'] = wlp
    p['bl'] = jnp.zeros((1, OPAD), f32).at[:, :O].set(bl)
    return p


# --------------------------------------------------------------------------
# Forward pass wrapper (mirrors DeepPunctuation.forward)
# --------------------------------------------------------------------------
@jax.jit
def deep_punctuation_forward(params, x_ids, attn_masks):
    if x_ids.ndim == 1:                       # x = x.view(1, x.shape[0])
        x_ids = x_ids.reshape(1, x_ids.shape[0])
        attn_masks = attn_masks.reshape(1, attn_masks.shape[0])
    b, s = x_ids.shape
    opad = params['bl'].shape[-1]

    # --- bert embeddings (gather stays in plain JAX) ---
    emb = params['emb'][x_ids] + params['pos'][None, :s, :]
    mask3 = attn_masks.astype(jnp.float32)[:, None, :]       # (B, 1, S)

    args = (emb, mask3,
            params['wq'], params['bq'], params['wk'], params['bk'],
            params['wv'], params['bv'], params['wo'], params['bo'],
            params['w1'], params['b1'], params['w2'], params['b2'],
            params['g1'], params['be1'], params['g2'], params['be2'],
            params['wi'], params['bi'], params['wh'], params['bhf'], params['bhb'],
            params['wl'], params['bl'])

    # TODO(synk): at real phobert-base sizes (12 layers, D=768, S=256) this
    # gridless whole-VMEM design must become a grid over (batch, seq) tiles with
    # dimension_semantics=("parallel", ...) to use both v7x TensorCores, an
    # explicit vmem_limit_bytes (v7x has 64 MiB VMEM), and bf16 MXU operands on
    # v5e/v6e (keeping elementwise / EUP math in f32).
    out_flat = pl.pallas_call(
        deep_punct_kernel,
        out_shape=jax.ShapeDtypeStruct((s * b, opad), jnp.float32),
        in_specs=[_VMEM] * len(args),
        out_specs=_VMEM,
    )(*args)

    # kernel rows are (t, b)-ordered, lane-dense padded; slice the 4 real logits
    return out_flat.reshape(s, b, opad).transpose(1, 0, 2)[..., :O]


if __name__ == "__main__":
    key = jax.random.PRNGKey(0)
    pkey, xkey = jax.random.split(key)
    params = init_params(pkey)

    x_ids = jax.random.randint(xkey, (B, S), 0, V, dtype=jnp.int32)
    attn_masks = jnp.ones((B, S), jnp.int32).at[1, 6:].set(0)

    logits = deep_punctuation_forward(params, x_ids, attn_masks)
    jax.block_until_ready(logits)
    assert logits.shape == (B, S, O) and logits.dtype == jnp.float32
    assert bool(jnp.all(jnp.isfinite(logits)))
    print("KERNEL_OK")
</pallas_src>

<mosaic_0001>
module attributes {stable_mosaic.version = 11 : i64} {
  func.func @deep_punct_kernel(%arg0: memref<2x8x32xf32, #tpu.memory_space<vmem>>, %arg1: memref<2x1x8xf32, #tpu.memory_space<vmem>>, %arg2: memref<32x32xf32, #tpu.memory_space<vmem>>, %arg3: memref<1x32xf32, #tpu.memory_space<vmem>>, %arg4: memref<32x32xf32, #tpu.memory_space<vmem>>, %arg5: memref<1x32xf32, #tpu.memory_space<vmem>>, %arg6: memref<32x32xf32, #tpu.memory_space<vmem>>, %arg7: memref<1x32xf32, #tpu.memory_space<vmem>>, %arg8: memref<32x32xf32, #tpu.memory_space<vmem>>, %arg9: memref<1x32xf32, #tpu.memory_space<vmem>>, %arg10: memref<32x128xf32, #tpu.memory_space<vmem>>, %arg11: memref<1x128xf32, #tpu.memory_space<vmem>>, %arg12: memref<128x32xf32, #tpu.memory_space<vmem>>, %arg13: memref<1x32xf32, #tpu.memory_space<vmem>>, %arg14: memref<1x32xf32, #tpu.memory_space<vmem>>, %arg15: memref<1x32xf32, #tpu.memory_space<vmem>>, %arg16: memref<1x32xf32, #tpu.memory_space<vmem>>, %arg17: memref<1x32xf32, #tpu.memory_space<vmem>>, %arg18: memref<32x768xf32, #tpu.memory_space<vmem>>, %arg19: memref<1x768xf32, #tpu.memory_space<vmem>>, %arg20: memref<256x384xf32, #tpu.memory_space<vmem>>, %arg21: memref<1x384xf32, #tpu.memory_space<vmem>>, %arg22: memref<1x384xf32, #tpu.memory_space<vmem>>, %arg23: memref<256x128xf32, #tpu.memory_space<vmem>>, %arg24: memref<1x128xf32, #tpu.memory_space<vmem>>, %arg25: memref<16x128xf32, #tpu.memory_space<vmem>>) attributes {dimension_semantics = [], scalar_prefetch = 0 : i64, scratch_operands = 0 : i64, tpu.core_type = #tpu.core_type<tc>} {
    %c0 = arith.constant 0 : index
    %c0_0 = arith.constant 0 : index
    %c0_1 = arith.constant 0 : index
    %0 = vector.load %arg0[%c0, %c0_0, %c0_1] : memref<2x8x32xf32, #tpu.memory_space<vmem>>, vector<2x8x32xf32>
    %c0_2 = arith.constant 0 : index
    %c0_3 = arith.constant 0 : index
    %c0_4 = arith.constant 0 : index
    %1 = vector.load %arg1[%c0_2, %c0_3, %c0_4] : memref<2x1x8xf32, #tpu.memory_space<vmem>>, vector<2x1x8xf32>
    %c0_5 = arith.constant 0 : index
    %c0_6 = arith.constant 0 : index
    %2 = vector.load %arg2[%c0_5, %c0_6] : memref<32x32xf32, #tpu.memory_space<vmem>>, vector<32x32xf32>
    "tpu.trace_start"() <{level = 10 : i32, message = "bsd,de->bse"}> : () -> ()
    %cst = arith.constant dense<0.000000e+00> : vector<2x8x32xf32>
    %3 = tpu.matmul %0, %2, %cst {dimension_numbers = #tpu.dot_dimension_numbers<[2], [0], [0, 1], [1], [0, 0, 0, 1, 1, 1], [], []>} : vector<2x8x32xf32>, vector<32x32xf32>, vector<2x8x32xf32> -> vector<2x8x32xf32>
    "tpu.trace_stop"() : () -> ()
    %c0_7 = arith.constant 0 : index
    %c0_8 = arith.constant 0 : index
    %4 = vector.load %arg3[%c0_7, %c0_8] : memref<1x32xf32, #tpu.memory_space<vmem>>, vector<1x32xf32>
    %5 = vector.shape_cast %4 : vector<1x32xf32> to vector<1x1x32xf32>
    %6 = vector.broadcast %5 : vector<1x1x32xf32> to vector<2x8x32xf32>
    %7 = arith.addf %3, %6 : vector<2x8x32xf32>
    %c0_9 = arith.constant 0 : index
    %c0_10 = arith.constant 0 : index
    %8 = vector.load %arg4[%c0_9, %c0_10] : memref<32x32xf32, #tpu.memory_space<vmem>>, vector<32x32xf32>
    "tpu.trace_start"() <{level = 10 : i32, message = "bsd,de->bse"}> : () -> ()
    %cst_11 = arith.constant dense<0.000000e+00> : vector<2x8x32xf32>
    %9 = tpu.matmul %0, %8, %cst_11 {dimension_numbers = #tpu.dot_dimension_numbers<[2], [0], [0, 1], [1], [0, 0, 0, 1, 1, 1], [], []>} : vector<2x8x32xf32>, vector<32x32xf32>, vector<2x8x32xf32> -> vector<2x8x32xf32>
    "tpu.trace_stop"() : () -> ()
    %c0_12 = arith.constant 0 : index
    %c0_13 = arith.constant 0 : index
    %10 = vector.load %arg5[%c0_12, %c0_13] : memref<1x32xf32, #tpu.memory_space<vmem>>, vector<1x32xf32>
    %11 = vector.shape_cast %10 : vector<1x32xf32> to vector<1x1x32xf32>
    %12 = vector.broadcast %11 : vector<1x1x32xf32> to vector<2x8x32xf32>
    %13 = arith.addf %9, %12 : vector<2x8x32xf32>
    %c0_14 = arith.constant 0 : index
    %c0_15 = arith.constant 0 : index
    %14 = vector.load %arg6[%c0_14, %c0_15] : memref<32x32xf32, #tpu.memory_space<vmem>>, vector<32x32xf32>
    "tpu.trace_start"() <{level = 10 : i32, message = "bsd,de->bse"}> : () -> ()
    %cst_16 = arith.constant dense<0.000000e+00> : vector<2x8x32xf32>
    %15 = tpu.matmul %0, %14, %cst_16 {dimension_numbers = #tpu.dot_dimension_numbers<[2], [0], [0, 1], [1], [0, 0, 0, 1, 1, 1], [], []>} : vector<2x8x32xf32>, vector<32x32xf32>, vector<2x8x32xf32> -> vector<2x8x32xf32>
    "tpu.trace_stop"() : () -> ()
    %c0_17 = arith.constant 0 : index
    %c0_18 = arith.constant 0 : index
    %16 = vector.load %arg7[%c0_17, %c0_18] : memref<1x32xf32, #tpu.memory_space<vmem>>, vector<1x32xf32>
    %17 = vector.shape_cast %16 : vector<1x32xf32> to vector<1x1x32xf32>
    %18 = vector.broadcast %17 : vector<1x1x32xf32> to vector<2x8x32xf32>
    %19 = arith.addf %15, %18 : vector<2x8x32xf32>
    "tpu.trace_start"() <{level = 10 : i32, message = "bqd,bkd->bqk"}> : () -> ()
    %cst_19 = arith.constant dense<0.000000e+00> : vector<2x8x8xf32>
    %20 = tpu.matmul %7, %13, %cst_19 {dimension_numbers = #tpu.dot_dimension_numbers<[2], [2], [1], [1], [0, 0, 0, 1, 1, 1], [0], [0]>} : vector<2x8x32xf32>, vector<2x8x32xf32>, vector<2x8x8xf32> -> vector<2x8x8xf32>
    "tpu.trace_stop"() : () -> ()
    %cst_20 = arith.constant 0.176776692 : f32
    %21 = vector.broadcast %cst_20 : f32 to vector<2x8x8xf32>
    %22 = arith.mulf %20, %21 : vector<2x8x8xf32>
    %cst_21 = arith.constant 1.000000e+00 : f32
    %23 = vector.broadcast %cst_21 : f32 to vector<2x1x8xf32>
    %24 = arith.subf %23, %1 : vector<2x1x8xf32>
    %cst_22 = arith.constant -1.000000e+09 : f32
    %25 = vector.broadcast %cst_22 : f32 to vector<2x1x8xf32>
    %26 = arith.mulf %24, %25 : vector<2x1x8xf32>
    %27 = vector.broadcast %26 : vector<2x1x8xf32> to vector<2x8x8xf32>
    %28 = arith.addf %22, %27 : vector<2x8x8xf32>
    %cst_23 = arith.constant dense<0xFF800000> : vector<2x8xf32>
    %29 = vector.multi_reduction <maximumf>, %28, %cst_23 [2] : vector<2x8x8xf32> to vector<2x8xf32>
    %30 = vector.shape_cast %29 : vector<2x8xf32> to vector<2x8x1xf32>
    %31 = vector.broadcast %30 : vector<2x8x1xf32> to vector<2x8x8xf32>
    %32 = arith.subf %28, %31 : vector<2x8x8xf32>
    %33 = math.exp %32 : vector<2x8x8xf32>
    %cst_24 = arith.constant dense<0.000000e+00> : vector<2x8xf32>
    %34 = vector.multi_reduction <add>, %33, %cst_24 [2] : vector<2x8x8xf32> to vector<2x8xf32>
    %35 = vector.shape_cast %34 : vector<2x8xf32> to vector<2x8x1xf32>
    %36 = tpu.reciprocal %35 {approx = true} : vector<2x8x1xf32> -> vector<2x8x1xf32>
    %37 = vector.broadcast %36 : vector<2x8x1xf32> to vector<2x8x8xf32>
    %38 = arith.mulf %33, %37 : vector<2x8x8xf32>
    "tpu.trace_start"() <{level = 10 : i32, message = "bqk,bkd->bqd"}> : () -> ()
    %cst_25 = arith.constant dense<0.000000e+00> : vector<2x8x32xf32>
    %39 = tpu.matmul %38, %19, %cst_25 {dimension_numbers = #tpu.dot_dimension_numbers<[2], [1], [1], [2], [0, 0, 0, 1, 1, 2], [0], [0]>} : vector<2x8x8xf32>, vector<2x8x32xf32>, vector<2x8x32xf32> -> vector<2x8x32xf32>
    "tpu.trace_stop"() : () -> ()
    %c0_26 = arith.constant 0 : index
    %c0_27 = arith.constant 0 : index
    %40 = vector.load %arg8[%c0_26, %c0_27] : memref<32x32xf32, #tpu.memory_space<vmem>>, vector<32x32xf32>
    "tpu.trace_start"() <{level = 10 : i32, message = "bsd,de->bse"}> : () -> ()
    %cst_28 = arith.constant dense<0.000000e+00> : vector<2x8x32xf32>
    %41 = tpu.matmul %39, %40, %cst_28 {dimension_numbers = #tpu.dot_dimension_numbers<[2], [0], [0, 1], [1], [0, 0, 0, 1, 1, 1], [], []>} : vector<2x8x32xf32>, vector<32x32xf32>, vector<2x8x32xf32> -> vector<2x8x32xf32>
    "tpu.trace_stop"() : () -> ()
    %c0_29 = arith.constant 0 : index
    %c0_30 = arith.constant 0 : index
    %42 = vector.load %arg9[%c0_29, %c0_30] : memref<1x32xf32, #tpu.memory_space<vmem>>, vector<1x32xf32>
    %43 = vector.shape_cast %42 : vector<1x32xf32> to vector<1x1x32xf32>
    %44 = vector.broadcast %43 : vector<1x1x32xf32> to vector<2x8x32xf32>
    %45 = arith.addf %41, %44 : vector<2x8x32xf32>
    %46 = arith.addf %0, %45 : vector<2x8x32xf32>
    %c0_31 = arith.constant 0 : index
    %c0_32 = arith.constant 0 : index
    %47 = vector.load %arg14[%c0_31, %c0_32] : memref<1x32xf32, #tpu.memory_space<vmem>>, vector<1x32xf32>
    %c0_33 = arith.constant 0 : index
    %c0_34 = arith.constant 0 : index
    %48 = vector.load %arg15[%c0_33, %c0_34] : memref<1x32xf32, #tpu.memory_space<vmem>>, vector<1x32xf32>
    %cst_35 = arith.constant dense<0.000000e+00> : vector<2x8xf32>
    %49 = vector.multi_reduction <add>, %46, %cst_35 [2] : vector<2x8x32xf32> to vector<2x8xf32>
    %50 = vector.shape_cast %49 : vector<2x8xf32> to vector<2x8x1xf32>
    %cst_36 = arith.constant 3.200000e+01 : f32
    %51 = vector.broadcast %cst_36 : f32 to vector<2x8x1xf32>
    %52 = arith.divf %50, %51 : vector<2x8x1xf32>
    %53 = vector.broadcast %52 : vector<2x8x1xf32> to vector<2x8x32xf32>
    %54 = arith.subf %46, %53 : vector<2x8x32xf32>
    %55 = arith.mulf %54, %54 : vector<2x8x32xf32>
    %cst_37 = arith.constant dense<0.000000e+00> : vector<2x8xf32>
    %56 = vector.multi_reduction <add>, %55, %cst_37 [2] : vector<2x8x32xf32> to vector<2x8xf32>
    %57 = vector.shape_cast %56 : vector<2x8xf32> to vector<2x8x1xf32>
    %cst_38 = arith.constant 3.200000e+01 : f32
    %58 = vector.broadcast %cst_38 : f32 to vector<2x8x1xf32>
    %59 = arith.divf %57, %58 : vector<2x8x1xf32>
    %cst_39 = arith.constant 9.99999974E-6 : f32
    %60 = vector.broadcast %cst_39 : f32 to vector<2x8x1xf32>
    %61 = arith.addf %59, %60 : vector<2x8x1xf32>
    %62 = math.rsqrt %61 : vector<2x8x1xf32>
    %63 = vector.broadcast %62 : vector<2x8x1xf32> to vector<2x8x32xf32>
    %64 = arith.mulf %54, %63 : vector<2x8x32xf32>
    %65 = vector.shape_cast %47 : vector<1x32xf32> to vector<1x1x32xf32>
    %66 = vector.broadcast %65 : vector<1x1x32xf32> to vector<2x8x32xf32>
    %67 = arith.mulf %64, %66 : vector<2x8x32xf32>
    %68 = vector.shape_cast %48 : vector<1x32xf32> to vector<1x1x32xf32>
    %69 = vector.broadcast %68 : vector<1x1x32xf32> to vector<2x8x32xf32>
    %70 = arith.addf %67, %69 : vector<2x8x32xf32>
    %c0_40 = arith.constant 0 : index
    %c0_41 = arith.constant 0 : index
    %71 = vector.load %arg10[%c0_40, %c0_41] : memref<32x128xf32, #tpu.memory_space<vmem>>, vector<32x128xf32>
    "tpu.trace_start"() <{level = 10 : i32, message = "bsd,df->bsf"}> : () -> ()
    %cst_42 = arith.constant dense<0.000000e+00> : vector<2x8x128xf32>
    %72 = tpu.matmul %70, %71, %cst_42 {dimension_numbers = #tpu.dot_dimension_numbers<[2], [0], [0, 1], [1], [0, 0, 0, 1, 1, 1], [], []>} : vector<2x8x32xf32>, vector<32x128xf32>, vector<2x8x128xf32> -> vector<2x8x128xf32>
    "tpu.trace_stop"() : () -> ()
    %c0_43 = arith.constant 0 : index
    %c0_44 = arith.constant 0 : index
    %73 = vector.load %arg11[%c0_43, %c0_44] : memref<1x128xf32, #tpu.memory_space<vmem>>, vector<1x128xf32>
    %74 = vector.shape_cast %73 : vector<1x128xf32> to vector<1x1x128xf32>
    %75 = vector.broadcast %74 : vector<1x1x128xf32> to vector<2x8x128xf32>
    %76 = arith.addf %72, %75 : vector<2x8x128xf32>
    %77 = arith.mulf %76, %76 : vector<2x8x128xf32>
    %78 = arith.mulf %76, %77 : vector<2x8x128xf32>
    %cst_45 = arith.constant 4.471500e-02 : f32
    %79 = vector.broadcast %cst_45 : f32 to vector<2x8x128xf32>
    %80 = arith.mulf %79, %78 : vector<2x8x128xf32>
    %81 = arith.addf %76, %80 : vector<2x8x128xf32>
    %cst_46 = arith.constant 0.797884583 : f32
    %82 = vector.broadcast %cst_46 : f32 to vector<2x8x128xf32>
    %83 = arith.mulf %82, %81 : vector<2x8x128xf32>
    %84 = math.tanh %83 : vector<2x8x128xf32>
    %cst_47 = arith.constant 1.000000e+00 : f32
    %85 = vector.broadcast %cst_47 : f32 to vector<2x8x128xf32>
    %86 = arith.addf %85, %84 : vector<2x8x128xf32>
    %cst_48 = arith.constant 5.000000e-01 : f32
    %87 = vector.broadcast %cst_48 : f32 to vector<2x8x128xf32>
    %88 = arith.mulf %87, %86 : vector<2x8x128xf32>
    %89 = arith.mulf %76, %88 : vector<2x8x128xf32>
    %c0_49 = arith.constant 0 : index
    %c0_50 = arith.constant 0 : index
    %90 = vector.load %arg12[%c0_49, %c0_50] : memref<128x32xf32, #tpu.memory_space<vmem>>, vector<128x32xf32>
    "tpu.trace_start"() <{level = 10 : i32, message = "bsf,fd->bsd"}> : () -> ()
    %cst_51 = arith.constant dense<0.000000e+00> : vector<2x8x32xf32>
    %91 = tpu.matmul %89, %90, %cst_51 {dimension_numbers = #tpu.dot_dimension_numbers<[2], [0], [0, 1], [1], [0, 0, 0, 1, 1, 1], [], []>} : vector<2x8x128xf32>, vector<128x32xf32>, vector<2x8x32xf32> -> vector<2x8x32xf32>
    "tpu.trace_stop"() : () -> ()
    %c0_52 = arith.constant 0 : index
    %c0_53 = arith.constant 0 : index
    %92 = vector.load %arg13[%c0_52, %c0_53] : memref<1x32xf32, #tpu.memory_space<vmem>>, vector<1x32xf32>
    %93 = vector.shape_cast %92 : vector<1x32xf32> to vector<1x1x32xf32>
    %94 = vector.broadcast %93 : vector<1x1x32xf32> to vector<2x8x32xf32>
    %95 = arith.addf %91, %94 : vector<2x8x32xf32>
    %96 = arith.addf %70, %95 : vector<2x8x32xf32>
    %c0_54 = arith.constant 0 : index
    %c0_55 = arith.constant 0 : index
    %97 = vector.load %arg16[%c0_54, %c0_55] : memref<1x32xf32, #tpu.memory_space<vmem>>, vector<1x32xf32>
    %c0_56 = arith.constant 0 : index
    %c0_57 = arith.constant 0 : index
    %98 = vector.load %arg17[%c0_56, %c0_57] : memref<1x32xf32, #tpu.memory_space<vmem>>, vector<1x32xf32>
    %cst_58 = arith.constant dense<0.000000e+00> : vector<2x8xf32>
    %99 = vector.multi_reduction <add>, %96, %cst_58 [2] : vector<2x8x32xf32> to vector<2x8xf32>
    %100 = vector.shape_cast %99 : vector<2x8xf32> to vector<2x8x1xf32>
    %cst_59 = arith.constant 3.200000e+01 : f32
    %101 = vector.broadcast %cst_59 : f32 to vector<2x8x1xf32>
    %102 = arith.divf %100, %101 : vector<2x8x1xf32>
    %103 = vector.broadcast %102 : vector<2x8x1xf32> to vector<2x8x32xf32>
    %104 = arith.subf %96, %103 : vector<2x8x32xf32>
    %105 = arith.mulf %104, %104 : vector<2x8x32xf32>
    %cst_60 = arith.constant dense<0.000000e+00> : vector<2x8xf32>
    %106 = vector.multi_reduction <add>, %105, %cst_60 [2] : vector<2x8x32xf32> to vector<2x8xf32>
    %107 = vector.shape_cast %106 : vector<2x8xf32> to vector<2x8x1xf32>
    %cst_61 = arith.constant 3.200000e+01 : f32
    %108 = vector.broadcast %cst_61 : f32 to vector<2x8x1xf32>
    %109 = arith.divf %107, %108 : vector<2x8x1xf32>
    %cst_62 = arith.constant 9.99999974E-6 : f32
    %110 = vector.broadcast %cst_62 : f32 to vector<2x8x1xf32>
    %111 = arith.addf %109, %110 : vector<2x8x1xf32>
    %112 = math.rsqrt %111 : vector<2x8x1xf32>
    %113 = vector.broadcast %112 : vector<2x8x1xf32> to vector<2x8x32xf32>
    %114 = arith.mulf %104, %113 : vector<2x8x32xf32>
    %115 = vector.shape_cast %97 : vector<1x32xf32> to vector<1x1x32xf32>
    %116 = vector.broadcast %115 : vector<1x1x32xf32> to vector<2x8x32xf32>
    %117 = arith.mulf %114, %116 : vector<2x8x32xf32>
    %118 = vector.shape_cast %98 : vector<1x32xf32> to vector<1x1x32xf32>
    %119 = vector.broadcast %118 : vector<1x1x32xf32> to vector<2x8x32xf32>
    %120 = arith.addf %117, %119 : vector<2x8x32xf32>
    %c0_63 = arith.constant 0 : index
    %c0_64 = arith.constant 0 : index
    %121 = vector.load %arg18[%c0_63, %c0_64] : memref<32x768xf32, #tpu.memory_space<vmem>>, vector<32x768xf32>
    "tpu.trace_start"() <{level = 10 : i32, message = "bsd,de->bse"}> : () -> ()
    %cst_65 = arith.constant dense<0.000000e+00> : vector<2x8x768xf32>
    %122 = tpu.matmul %120, %121, %cst_65 {dimension_numbers = #tpu.dot_dimension_numbers<[2], [0], [0, 1], [1], [0, 0, 0, 1, 1, 1], [], []>} : vector<2x8x32xf32>, vector<32x768xf32>, vector<2x8x768xf32> -> vector<2x8x768xf32>
    "tpu.trace_stop"() : () -> ()
    %c0_66 = arith.constant 0 : index
    %c0_67 = arith.constant 0 : index
    %123 = vector.load %arg19[%c0_66, %c0_67] : memref<1x768xf32, #tpu.memory_space<vmem>>, vector<1x768xf32>
    %124 = vector.shape_cast %123 : vector<1x768xf32> to vector<1x1x768xf32>
    %125 = vector.broadcast %124 : vector<1x1x768xf32> to vector<2x8x768xf32>
    %126 = arith.addf %122, %125 : vector<2x8x768xf32>
    %127 = vector.extract_strided_slice %126 {offsets = [0, 0, 0], sizes = [2, 8, 384], strides = [1, 1, 1]} : vector<2x8x768xf32> to vector<2x8x384xf32>
    %128 = vector.extract_strided_slice %126 {offsets = [0, 0, 384], sizes = [2, 8, 384], strides = [1, 1, 1]} : vector<2x8x768xf32> to vector<2x8x384xf32>
    %129 = vector.extract_strided_slice %127 {offsets = [0, 0, 0], sizes = [2, 1, 384], strides = [1, 1, 1]} : vector<2x8x384xf32> to vector<2x1x384xf32>
    %130 = vector.shape_cast %129 : vector<2x1x384xf32> to vector<2x384xf32>
    %131 = vector.extract_strided_slice %128 {offsets = [0, 7, 0], sizes = [2, 1, 384], strides = [1, 1, 1]} : vector<2x8x384xf32> to vector<2x1x384xf32>
    %132 = vector.shape_cast %131 : vector<2x1x384xf32> to vector<2x384xf32>
    %133 = tpu.concatenate %130, %132 in 0 : vector<2x384xf32>, vector<2x384xf32> -> vector<4x384xf32>
    %134 = vector.extract_strided_slice %127 {offsets = [0, 1, 0], sizes = [2, 1, 384], strides = [1, 1, 1]} : vector<2x8x384xf32> to vector<2x1x384xf32>
    %135 = vector.shape_cast %134 : vector<2x1x384xf32> to vector<2x384xf32>
    %136 = vector.extract_strided_slice %128 {offsets = [0, 6, 0], sizes = [2, 1, 384], strides = [1, 1, 1]} : vector<2x8x384xf32> to vector<2x1x384xf32>
    %137 = vector.shape_cast %136 : vector<2x1x384xf32> to vector<2x384xf32>
    %138 = tpu.concatenate %135, %137 in 0 : vector<2x384xf32>, vector<2x384xf32> -> vector<4x384xf32>
    %139 = vector.extract_strided_slice %127 {offsets = [0, 2, 0], sizes = [2, 1, 384], strides = [1, 1, 1]} : vector<2x8x384xf32> to vector<2x1x384xf32>
    %140 = vector.shape_cast %139 : vector<2x1x384xf32> to vector<2x384xf32>
    %141 = vector.extract_strided_slice %128 {offsets = [0, 5, 0], sizes = [2, 1, 384], strides = [1, 1, 1]} : vector<2x8x384xf32> to vector<2x1x384xf32>
    %142 = vector.shape_cast %141 : vector<2x1x384xf32> to vector<2x384xf32>
    %143 = tpu.concatenate %140, %142 in 0 : vector<2x384xf32>, vector<2x384xf32> -> vector<4x384xf32>
    %144 = vector.extract_strided_slice %127 {offsets = [0, 3, 0], sizes = [2, 1, 384], strides = [1, 1, 1]} : vector<2x8x384xf32> to vector<2x1x384xf32>
    %145 = vector.shape_cast %144 : vector<2x1x384xf32> to vector<2x384xf32>
    %146 = vector.extract_strided_slice %128 {offsets = [0, 4, 0], sizes = [2, 1, 384], strides = [1, 1, 1]} : vector<2x8x384xf32> to vector<2x1x384xf32>
    %147 = vector.shape_cast %146 : vector<2x1x384xf32> to vector<2x384xf32>
    %148 = tpu.concatenate %145, %147 in 0 : vector<2x384xf32>, vector<2x384xf32> -> vector<4x384xf32>
    %149 = vector.extract_strided_slice %127 {offsets = [0, 4, 0], sizes = [2, 1, 384], strides = [1, 1, 1]} : vector<2x8x384xf32> to vector<2x1x384xf32>
    %150 = vector.shape_cast %149 : vector<2x1x384xf32> to vector<2x384xf32>
    %151 = vector.extract_strided_slice %128 {offsets = [0, 3, 0], sizes = [2, 1, 384], strides = [1, 1, 1]} : vector<2x8x384xf32> to vector<2x1x384xf32>
    %152 = vector.shape_cast %151 : vector<2x1x384xf32> to vector<2x384xf32>
    %153 = tpu.concatenate %150, %152 in 0 : vector<2x384xf32>, vector<2x384xf32> -> vector<4x384xf32>
    %154 = vector.extract_strided_slice %127 {offsets = [0, 5, 0], sizes = [2, 1, 384], strides = [1, 1, 1]} : vector<2x8x384xf32> to vector<2x1x384xf32>
    %155 = vector.shape_cast %154 : vector<2x1x384xf32> to vector<2x384xf32>
    %156 = vector.extract_strided_slice %128 {offsets = [0, 2, 0], sizes = [2, 1, 384], strides = [1, 1, 1]} : vector<2x8x384xf32> to vector<2x1x384xf32>
    %157 = vector.shape_cast %156 : vector<2x1x384xf32> to vector<2x384xf32>
    %158 = tpu.concatenate %155, %157 in 0 : vector<2x384xf32>, vector<2x384xf32> -> vector<4x384xf32>
    %159 = vector.extract_strided_slice %127 {offsets = [0, 6, 0], sizes = [2, 1, 384], strides = [1, 1, 1]} : vector<2x8x384xf32> to vector<2x1x384xf32>
    %160 = vector.shape_cast %159 : vector<2x1x384xf32> to vector<2x384xf32>
    %161 = vector.extract_strided_slice %128 {offsets = [0, 1, 0], sizes = [2, 1, 384], strides = [1, 1, 1]} : vector<2x8x384xf32> to vector<2x1x384xf32>
    %162 = vector.shape_cast %161 : vector<2x1x384xf32> to vector<2x384xf32>
    %163 = tpu.concatenate %160, %162 in 0 : vector<2x384xf32>, vector<2x384xf32> -> vector<4x384xf32>
    %164 = vector.extract_strided_slice %127 {offsets = [0, 7, 0], sizes = [2, 1, 384], strides = [1, 1, 1]} : vector<2x8x384xf32> to vector<2x1x384xf32>
    %165 = vector.shape_cast %164 : vector<2x1x384xf32> to vector<2x384xf32>
    %166 = vector.extract_strided_slice %128 {offsets = [0, 0, 0], sizes = [2, 1, 384], strides = [1, 1, 1]} : vector<2x8x384xf32> to vector<2x1x384xf32>
    %167 = vector.shape_cast %166 : vector<2x1x384xf32> to vector<2x384xf32>
    %168 = tpu.concatenate %165, %167 in 0 : vector<2x384xf32>, vector<2x384xf32> -> vector<4x384xf32>
    %c0_68 = arith.constant 0 : index
    %c0_69 = arith.constant 0 : index
    %169 = vector.load %arg20[%c0_68, %c0_69] : memref<256x384xf32, #tpu.memory_space<vmem>>, vector<256x384xf32>
    %c0_70 = arith.constant 0 : index
    %c0_71 = arith.constant 0 : index
    %170 = vector.load %arg21[%c0_70, %c0_71] : memref<1x384xf32, #tpu.memory_space<vmem>>, vector<1x384xf32>
    %171 = vector.shape_cast %170 : vector<1x384xf32> to vector<1x384xf32>
    %172 = vector.broadcast %171 : vector<1x384xf32> to vector<2x384xf32>
    %c0_72 = arith.constant 0 : index
    %c0_73 = arith.constant 0 : index
    %173 = vector.load %arg22[%c0_72, %c0_73] : memref<1x384xf32, #tpu.memory_space<vmem>>, vector<1x384xf32>
    %174 = vector.shape_cast %173 : vector<1x384xf32> to vector<1x384xf32>
    %175 = vector.broadcast %174 : vector<1x384xf32> to vector<2x384xf32>
    %176 = tpu.concatenate %172, %175 in 0 : vector<2x384xf32>, vector<2x384xf32> -> vector<4x384xf32>
    %177 = tpu.iota {dimensions = array<i32: 0>} : vector<4x1xi32>
    %c2_i32 = arith.constant 2 : i32
    %178 = vector.broadcast %c2_i32 : i32 to vector<4x1xi32>
    %179 = arith.cmpi slt, %177, %178 : vector<4x1xi32>
    %180 = arith.extui %179 : vector<4x1xi1> to vector<4x1xi32>
    %181 = arith.sitofp %180 : vector<4x1xi32> to vector<4x1xf32>
    %cst_74 = arith.constant 1.000000e+00 : f32
    %182 = vector.broadcast %cst_74 : f32 to vector<4x1xf32>
    %183 = arith.subf %182, %181 : vector<4x1xf32>
    %cst_75 = arith.constant 0.000000e+00 : f32
    %184 = vector.broadcast %cst_75 : f32 to vector<4x128xf32>
    %cst_76 = arith.constant 0.000000e+00 : f32
    %185 = vector.broadcast %cst_76 : f32 to vector<4x256xf32>
    %cst_77 = arith.constant dense<0.000000e+00> : vector<4x384xf32>
    %186 = tpu.matmul %185, %169, %cst_77 {dimension_numbers = #tpu.dot_dimension_numbers<[1], [0], [0], [1], [0, 0, 1, 1], [], []>} : vector<4x256xf32>, vector<256x384xf32>, vector<4x384xf32> -> vector<4x384xf32>
    %187 = arith.addf %186, %176 : vector<4x384xf32>
    %188 = vector.extract_strided_slice %133 {offsets = [0, 0], sizes = [4, 128], strides = [1, 1]} : vector<4x384xf32> to vector<4x128xf32>
    %189 = vector.extract_strided_slice %187 {offsets = [0, 0], sizes = [4, 128], strides = [1, 1]} : vector<4x384xf32> to vector<4x128xf32>
    %190 = arith.addf %188, %189 : vector<4x128xf32>
    %191 = arith.negf %190 : vector<4x128xf32>
    %192 = math.exp %191 : vector<4x128xf32>
    %cst_78 = arith.constant 1.000000e+00 : f32
    %193 = vector.broadcast %cst_78 : f32 to vector<4x128xf32>
    %194 = arith.addf %193, %192 : vector<4x128xf32>
    %195 = arith.divf %193, %194 : vector<4x128xf32>
    %196 = vector.extract_strided_slice %133 {offsets = [0, 128], sizes = [4, 128], strides = [1, 1]} : vector<4x384xf32> to vector<4x128xf32>
    %197 = vector.extract_strided_slice %187 {offsets = [0, 128], sizes = [4, 128], strides = [1, 1]} : vector<4x384xf32> to vector<4x128xf32>
    %198 = arith.addf %196, %197 : vector<4x128xf32>
    %199 = arith.negf %198 : vector<4x128xf32>
    %200 = math.exp %199 : vector<4x128xf32>
    %cst_79 = arith.constant 1.000000e+00 : f32
    %201 = vector.broadcast %cst_79 : f32 to vector<4x128xf32>
    %202 = arith.addf %201, %200 : vector<4x128xf32>
    %203 = arith.divf %201, %202 : vector<4x128xf32>
    %204 = vector.extract_strided_slice %133 {offsets = [0, 256], sizes = [4, 128], strides = [1, 1]} : vector<4x384xf32> to vector<4x128xf32>
    %205 = vector.extract_strided_slice %187 {offsets = [0, 256], sizes = [4, 128], strides = [1, 1]} : vector<4x384xf32> to vector<4x128xf32>
    %206 = arith.mulf %195, %205 : vector<4x128xf32>
    %207 = arith.addf %204, %206 : vector<4x128xf32>
    %208 = math.tanh %207 : vector<4x128xf32>
    %cst_80 = arith.constant 1.000000e+00 : f32
    %209 = vector.broadcast %cst_80 : f32 to vector<4x128xf32>
    %210 = arith.subf %209, %203 : vector<4x128xf32>
    %211 = arith.mulf %210, %208 : vector<4x128xf32>
    %212 = arith.mulf %203, %184 : vector<4x128xf32>
    %213 = arith.addf %211, %212 : vector<4x128xf32>
    %214 = vector.broadcast %181 : vector<4x1xf32> to vector<4x128xf32>
    %215 = arith.mulf %213, %214 : vector<4x128xf32>
    %216 = vector.broadcast %183 : vector<4x1xf32> to vector<4x128xf32>
    %217 = arith.mulf %213, %216 : vector<4x128xf32>
    %218 = tpu.concatenate %215, %217 in 1 : vector<4x128xf32>, vector<4x128xf32> -> vector<4x256xf32>
    %219 = vector.extract_strided_slice %213 {offsets = [0, 0], sizes = [2, 128], strides = [1, 1]} : vector<4x128xf32> to vector<2x128xf32>
    %220 = vector.extract_strided_slice %213 {offsets = [2, 0], sizes = [2, 128], strides = [1, 1]} : vector<4x128xf32> to vector<2x128xf32>
    %cst_81 = arith.constant dense<0.000000e+00> : vector<4x384xf32>
    %221 = tpu.matmul %218, %169, %cst_81 {dimension_numbers = #tpu.dot_dimension_numbers<[1], [0], [0], [1], [0, 0, 1, 1], [], []>} : vector<4x256xf32>, vector<256x384xf32>, vector<4x384xf32> -> vector<4x384xf32>
    %222 = arith.addf %221, %176 : vector<4x384xf32>
    %223 = vector.extract_strided_slice %138 {offsets = [0, 0], sizes = [4, 128], strides = [1, 1]} : vector<4x384xf32> to vector<4x128xf32>
    %224 = vector.extract_strided_slice %222 {offsets = [0, 0], sizes = [4, 128], strides = [1, 1]} : vector<4x384xf32> to vector<4x128xf32>
    %225 = arith.addf %223, %224 : vector<4x128xf32>
    %226 = arith.negf %225 : vector<4x128xf32>
    %227 = math.exp %226 : vector<4x128xf32>
    %cst_82 = arith.constant 1.000000e+00 : f32
    %228 = vector.broadcast %cst_82 : f32 to vector<4x128xf32>
    %229 = arith.addf %228, %227 : vector<4x128xf32>
    %230 = arith.divf %228, %229 : vector<4x128xf32>
    %231 = vector.extract_strided_slice %138 {offsets = [0, 128], sizes = [4, 128], strides = [1, 1]} : vector<4x384xf32> to vector<4x128xf32>
    %232 = vector.extract_strided_slice %222 {offsets = [0, 128], sizes = [4, 128], strides = [1, 1]} : vector<4x384xf32> to vector<4x128xf32>
    %233 = arith.addf %231, %232 : vector<4x128xf32>
    %234 = arith.negf %233 : vector<4x128xf32>
    %235 = math.exp %234 : vector<4x128xf32>
    %cst_83 = arith.constant 1.000000e+00 : f32
    %236 = vector.broadcast %cst_83 : f32 to vector<4x128xf32>
    %237 = arith.addf %236, %235 : vector<4x128xf32>
    %238 = arith.divf %236, %237 : vector<4x128xf32>
    %239 = vector.extract_strided_slice %138 {offsets = [0, 256], sizes = [4, 128], strides = [1, 1]} : vector<4x384xf32> to vector<4x128xf32>
    %240 = vector.extract_strided_slice %222 {offsets = [0, 256], sizes = [4, 128], strides = [1, 1]} : vector<4x384xf32> to vector<4x128xf32>
    %241 = arith.mulf %230, %240 : vector<4x128xf32>
    %242 = arith.addf %239, %241 : vector<4x128xf32>
    %243 = math.tanh %242 : vector<4x128xf32>
    %cst_84 = arith.constant 1.000000e+00 : f32
    %244 = vector.broadcast %cst_84 : f32 to vector<4x128xf32>
    %245 = arith.subf %244, %238 : vector<4x128xf32>
    %246 = arith.mulf %245, %243 : vector<4x128xf32>
    %247 = arith.mulf %238, %213 : vector<4x128xf32>
    %248 = arith.addf %246, %247 : vector<4x128xf32>
    %249 = vector.broadcast %181 : vector<4x1xf32> to vector<4x128xf32>
    %250 = arith.mulf %248, %249 : vector<4x128xf32>
    %251 = vector.broadcast %183 : vector<4x1xf32> to vector<4x128xf32>
    %252 = arith.mulf %248, %251 : vector<4x128xf32>
    %253 = tpu.concatenate %250, %252 in 1 : vector<4x128xf32>, vector<4x128xf32> -> vector<4x256xf32>
    %254 = vector.extract_strided_slice %248 {offsets = [0, 0], sizes = [2, 128], strides = [1, 1]} : vector<4x128xf32> to vector<2x128xf32>
    %255 = vector.extract_strided_slice %248 {offsets = [2, 0], sizes = [2, 128], strides = [1, 1]} : vector<4x128xf32> to vector<2x128xf32>
    %cst_85 = arith.constant dense<0.000000e+00> : vector<4x384xf32>
    %256 = tpu.matmul %253, %169, %cst_85 {dimension_numbers = #tpu.dot_dimension_numbers<[1], [0], [0], [1], [0, 0, 1, 1], [], []>} : vector<4x256xf32>, vector<256x384xf32>, vector<4x384xf32> -> vector<4x384xf32>
    %257 = arith.addf %256, %176 : vector<4x384xf32>
    %258 = vector.extract_strided_slice %143 {offsets = [0, 0], sizes = [4, 128], strides = [1, 1]} : vector<4x384xf32> to vector<4x128xf32>
    %259 = vector.extract_strided_slice %257 {offsets = [0, 0], sizes = [4, 128], strides = [1, 1]} : vector<4x384xf32> to vector<4x128xf32>
    %260 = arith.addf %258, %259 : vector<4x128xf32>
    %261 = arith.negf %260 : vector<4x128xf32>
    %262 = math.exp %261 : vector<4x128xf32>
    %cst_86 = arith.constant 1.000000e+00 : f32
    %263 = vector.broadcast %cst_86 : f32 to vector<4x128xf32>
    %264 = arith.addf %263, %262 : vector<4x128xf32>
    %265 = arith.divf %263, %264 : vector<4x128xf32>
    %266 = vector.extract_strided_slice %143 {offsets = [0, 128], sizes = [4, 128], strides = [1, 1]} : vector<4x384xf32> to vector<4x128xf32>
    %267 = vector.extract_strided_slice %257 {offsets = [0, 128], sizes = [4, 128], strides = [1, 1]} : vector<4x384xf32> to vector<4x128xf32>
    %268 = arith.addf %266, %267 : vector<4x128xf32>
    %269 = arith.negf %268 : vector<4x128xf32>
    %270 = math.exp %269 : vector<4x128xf32>
    %cst_87 = arith.constant 1.000000e+00 : f32
    %271 = vector.broadcast %cst_87 : f32 to vector<4x128xf32>
    %272 = arith.addf %271, %270 : vector<4x128xf32>
    %273 = arith.divf %271, %272 : vector<4x128xf32>
    %274 = vector.extract_strided_slice %143 {offsets = [0, 256], sizes = [4, 128], strides = [1, 1]} : vector<4x384xf32> to vector<4x128xf32>
    %275 = vector.extract_strided_slice %257 {offsets = [0, 256], sizes = [4, 128], strides = [1, 1]} : vector<4x384xf32> to vector<4x128xf32>
    %276 = arith.mulf %265, %275 : vector<4x128xf32>
    %277 = arith.addf %274, %276 : vector<4x128xf32>
    %278 = math.tanh %277 : vector<4x128xf32>
    %cst_88 = arith.constant 1.000000e+00 : f32
    %279 = vector.broadcast %cst_88 : f32 to vector<4x128xf32>
    %280 = arith.subf %279, %273 : vector<4x128xf32>
    %281 = arith.mulf %280, %278 : vector<4x128xf32>
    %282 = arith.mulf %273, %248 : vector<4x128xf32>
    %283 = arith.addf %281, %282 : vector<4x128xf32>
    %284 = vector.broadcast %181 : vector<4x1xf32> to vector<4x128xf32>
    %285 = arith.mulf %283, %284 : vector<4x128xf32>
    %286 = vector.broadcast %183 : vector<4x1xf32> to vector<4x128xf32>
    %287 = arith.mulf %283, %286 : vector<4x128xf32>
    %288 = tpu.concatenate %285, %287 in 1 : vector<4x128xf32>, vector<4x128xf32> -> vector<4x256xf32>
    %289 = vector.extract_strided_slice %283 {offsets = [0, 0], sizes = [2, 128], strides = [1, 1]} : vector<4x128xf32> to vector<2x128xf32>
    %290 = vector.extract_strided_slice %283 {offsets = [2, 0], sizes = [2, 128], strides = [1, 1]} : vector<4x128xf32> to vector<2x128xf32>
    %cst_89 = arith.constant dense<0.000000e+00> : vector<4x384xf32>
    %291 = tpu.matmul %288, %169, %cst_89 {dimension_numbers = #tpu.dot_dimension_numbers<[1], [0], [0], [1], [0, 0, 1, 1], [], []>} : vector<4x256xf32>, vector<256x384xf32>, vector<4x384xf32> -> vector<4x384xf32>
    %292 = arith.addf %291, %176 : vector<4x384xf32>
    %293 = vector.extract_strided_slice %148 {offsets = [0, 0], sizes = [4, 128], strides = [1, 1]} : vector<4x384xf32> to vector<4x128xf32>
    %294 = vector.extract_strided_slice %292 {offsets = [0, 0], sizes = [4, 128], strides = [1, 1]} : vector<4x384xf32> to vector<4x128xf32>
    %295 = arith.addf %293, %294 : vector<4x128xf32>
    %296 = arith.negf %295 : vector<4x128xf32>
    %297 = math.exp %296 : vector<4x128xf32>
    %cst_90 = arith.constant 1.000000e+00 : f32
    %298 = vector.broadcast %cst_90 : f32 to vector<4x128xf32>
    %299 = arith.addf %298, %297 : vector<4x128xf32>
    %300 = arith.divf %298, %299 : vector<4x128xf32>
    %301 = vector.extract_strided_slice %148 {offsets = [0, 128], sizes = [4, 128], strides = [1, 1]} : vector<4x384xf32> to vector<4x128xf32>
    %302 = vector.extract_strided_slice %292 {offsets = [0, 128], sizes = [4, 128], strides = [1, 1]} : vector<4x384xf32> to vector<4x128xf32>
    %303 = arith.addf %301, %302 : vector<4x128xf32>
    %304 = arith.negf %303 : vector<4x128xf32>
    %305 = math.exp %304 : vector<4x128xf32>
    %cst_91 = arith.constant 1.000000e+00 : f32
    %306 = vector.broadcast %cst_91 : f32 to vector<4x128xf32>
    %307 = arith.addf %306, %305 : vector<4x128xf32>
    %308 = arith.divf %306, %307 : vector<4x128xf32>
    %309 = vector.extract_strided_slice %148 {offsets = [0, 256], sizes = [4, 128], strides = [1, 1]} : vector<4x384xf32> to vector<4x128xf32>
    %310 = vector.extract_strided_slice %292 {offsets = [0, 256], sizes = [4, 128], strides = [1, 1]} : vector<4x384xf32> to vector<4x128xf32>
    %311 = arith.mulf %300, %310 : vector<4x128xf32>
    %312 = arith.addf %309, %311 : vector<4x128xf32>
    %313 = math.tanh %312 : vector<4x128xf32>
    %cst_92 = arith.constant 1.000000e+00 : f32
    %314 = vector.broadcast %cst_92 : f32 to vector<4x128xf32>
    %315 = arith.subf %314, %308 : vector<4x128xf32>
    %316 = arith.mulf %315, %313 : vector<4x128xf32>
    %317 = arith.mulf %308, %283 : vector<4x128xf32>
    %318 = arith.addf %316, %317 : vector<4x128xf32>
    %319 = vector.broadcast %181 : vector<4x1xf32> to vector<4x128xf32>
    %320 = arith.mulf %318, %319 : vector<4x128xf32>
    %321 = vector.broadcast %183 : vector<4x1xf32> to vector<4x128xf32>
    %322 = arith.mulf %318, %321 : vector<4x128xf32>
    %323 = tpu.concatenate %320, %322 in 1 : vector<4x128xf32>, vector<4x128xf32> -> vector<4x256xf32>
    %324 = vector.extract_strided_slice %318 {offsets = [0, 0], sizes = [2, 128], strides = [1, 1]} : vector<4x128xf32> to vector<2x128xf32>
    %325 = vector.extract_strided_slice %318 {offsets = [2, 0], sizes = [2, 128], strides = [1, 1]} : vector<4x128xf32> to vector<2x128xf32>
    %cst_93 = arith.constant dense<0.000000e+00> : vector<4x384xf32>
    %326 = tpu.matmul %323, %169, %cst_93 {dimension_numbers = #tpu.dot_dimension_numbers<[1], [0], [0], [1], [0, 0, 1, 1], [], []>} : vector<4x256xf32>, vector<256x384xf32>, vector<4x384xf32> -> vector<4x384xf32>
    %327 = arith.addf %326, %176 : vector<4x384xf32>
    %328 = vector.extract_strided_slice %153 {offsets = [0, 0], sizes = [4, 128], strides = [1, 1]} : vector<4x384xf32> to vector<4x128xf32>
    %329 = vector.extract_strided_slice %327 {offsets = [0, 0], sizes = [4, 128], strides = [1, 1]} : vector<4x384xf32> to vector<4x128xf32>
    %330 = arith.addf %328, %329 : vector<4x128xf32>
    %331 = arith.negf %330 : vector<4x128xf32>
    %332 = math.exp %331 : vector<4x128xf32>
    %cst_94 = arith.constant 1.000000e+00 : f32
    %333 = vector.broadcast %cst_94 : f32 to vector<4x128xf32>
    %334 = arith.addf %333, %332 : vector<4x128xf32>
    %335 = arith.divf %333, %334 : vector<4x128xf32>
    %336 = vector.extract_strided_slice %153 {offsets = [0, 128], sizes = [4, 128], strides = [1, 1]} : vector<4x384xf32> to vector<4x128xf32>
    %337 = vector.extract_strided_slice %327 {offsets = [0, 128], sizes = [4, 128], strides = [1, 1]} : vector<4x384xf32> to vector<4x128xf32>
    %338 = arith.addf %336, %337 : vector<4x128xf32>
    %339 = arith.negf %338 : vector<4x128xf32>
    %340 = math.exp %339 : vector<4x128xf32>
    %cst_95 = arith.constant 1.000000e+00 : f32
    %341 = vector.broadcast %cst_95 : f32 to vector<4x128xf32>
    %342 = arith.addf %341, %340 : vector<4x128xf32>
    %343 = arith.divf %341, %342 : vector<4x128xf32>
    %344 = vector.extract_strided_slice %153 {offsets = [0, 256], sizes = [4, 128], strides = [1, 1]} : vector<4x384xf32> to vector<4x128xf32>
    %345 = vector.extract_strided_slice %327 {offsets = [0, 256], sizes = [4, 128], strides = [1, 1]} : vector<4x384xf32> to vector<4x128xf32>
    %346 = arith.mulf %335, %345 : vector<4x128xf32>
    %347 = arith.addf %344, %346 : vector<4x128xf32>
    %348 = math.tanh %347 : vector<4x128xf32>
    %cst_96 = arith.constant 1.000000e+00 : f32
    %349 = vector.broadcast %cst_96 : f32 to vector<4x128xf32>
    %350 = arith.subf %349, %343 : vector<4x128xf32>
    %351 = arith.mulf %350, %348 : vector<4x128xf32>
    %352 = arith.mulf %343, %318 : vector<4x128xf32>
    %353 = arith.addf %351, %352 : vector<4x128xf32>
    %354 = vector.broadcast %181 : vector<4x1xf32> to vector<4x128xf32>
    %355 = arith.mulf %353, %354 : vector<4x128xf32>
    %356 = vector.broadcast %183 : vector<4x1xf32> to vector<4x128xf32>
    %357 = arith.mulf %353, %356 : vector<4x128xf32>
    %358 = tpu.concatenate %355, %357 in 1 : vector<4x128xf32>, vector<4x128xf32> -> vector<4x256xf32>
    %359 = vector.extract_strided_slice %353 {offsets = [0, 0], sizes = [2, 128], strides = [1, 1]} : vector<4x128xf32> to vector<2x128xf32>
    %360 = vector.extract_strided_slice %353 {offsets = [2, 0], sizes = [2, 128], strides = [1, 1]} : vector<4x128xf32> to vector<2x128xf32>
    %cst_97 = arith.constant dense<0.000000e+00> : vector<4x384xf32>
    %361 = tpu.matmul %358, %169, %cst_97 {dimension_numbers = #tpu.dot_dimension_numbers<[1], [0], [0], [1], [0, 0, 1, 1], [], []>} : vector<4x256xf32>, vector<256x384xf32>, vector<4x384xf32> -> vector<4x384xf32>
    %362 = arith.addf %361, %176 : vector<4x384xf32>
    %363 = vector.extract_strided_slice %158 {offsets = [0, 0], sizes = [4, 128], strides = [1, 1]} : vector<4x384xf32> to vector<4x128xf32>
    %364 = vector.extract_strided_slice %362 {offsets = [0, 0], sizes = [4, 128], strides = [1, 1]} : vector<4x384xf32> to vector<4x128xf32>
    %365 = arith.addf %363, %364 : vector<4x128xf32>
    %366 = arith.negf %365 : vector<4x128xf32>
    %367 = math.exp %366 : vector<4x128xf32>
    %cst_98 = arith.constant 1.000000e+00 : f32
    %368 = vector.broadcast %cst_98 : f32 to vector<4x128xf32>
    %369 = arith.addf %368, %367 : vector<4x128xf32>
    %370 = arith.divf %368, %369 : vector<4x128xf32>
    %371 = vector.extract_strided_slice %158 {offsets = [0, 128], sizes = [4, 128], strides = [1, 1]} : vector<4x384xf32> to vector<4x128xf32>
    %372 = vector.extract_strided_slice %362 {offsets = [0, 128], sizes = [4, 128], strides = [1, 1]} : vector<4x384xf32> to vector<4x128xf32>
    %373 = arith.addf %371, %372 : vector<4x128xf32>
    %374 = arith.negf %373 : vector<4x128xf32>
    %375 = math.exp %374 : vector<4x128xf32>
    %cst_99 = arith.constant 1.000000e+00 : f32
    %376 = vector.broadcast %cst_99 : f32 to vector<4x128xf32>
    %377 = arith.addf %376, %375 : vector<4x128xf32>
    %378 = arith.divf %376, %377 : vector<4x128xf32>
    %379 = vector.extract_strided_slice %158 {offsets = [0, 256], sizes = [4, 128], strides = [1, 1]} : vector<4x384xf32> to vector<4x128xf32>
    %380 = vector.extract_strided_slice %362 {offsets = [0, 256], sizes = [4, 128], strides = [1, 1]} : vector<4x384xf32> to vector<4x128xf32>
    %381 = arith.mulf %370, %380 : vector<4x128xf32>
    %382 = arith.addf %379, %381 : vector<4x128xf32>
    %383 = math.tanh %382 : vector<4x128xf32>
    %cst_100 = arith.constant 1.000000e+00 : f32
    %384 = vector.broadcast %cst_100 : f32 to vector<4x128xf32>
    %385 = arith.subf %384, %378 : vector<4x128xf32>
    %386 = arith.mulf %385, %383 : vector<4x128xf32>
    %387 = arith.mulf %378, %353 : vector<4x128xf32>
    %388 = arith.addf %386, %387 : vector<4x128xf32>
    %389 = vector.broadcast %181 : vector<4x1xf32> to vector<4x128xf32>
    %390 = arith.mulf %388, %389 : vector<4x128xf32>
    %391 = vector.broadcast %183 : vector<4x1xf32> to vector<4x128xf32>
    %392 = arith.mulf %388, %391 : vector<4x128xf32>
    %393 = tpu.concatenate %390, %392 in 1 : vector<4x128xf32>, vector<4x128xf32> -> vector<4x256xf32>
    %394 = vector.extract_strided_slice %388 {offsets = [0, 0], sizes = [2, 128], strides = [1, 1]} : vector<4x128xf32> to vector<2x128xf32>
    %395 = vector.extract_strided_slice %388 {offsets = [2, 0], sizes = [2, 128], strides = [1, 1]} : vector<4x128xf32> to vector<2x128xf32>
    %cst_101 = arith.constant dense<0.000000e+00> : vector<4x384xf32>
    %396 = tpu.matmul %393, %169, %cst_101 {dimension_numbers = #tpu.dot_dimension_numbers<[1], [0], [0], [1], [0, 0, 1, 1], [], []>} : vector<4x256xf32>, vector<256x384xf32>, vector<4x384xf32> -> vector<4x384xf32>
    %397 = arith.addf %396, %176 : vector<4x384xf32>
    %398 = vector.extract_strided_slice %163 {offsets = [0, 0], sizes = [4, 128], strides = [1, 1]} : vector<4x384xf32> to vector<4x128xf32>
    %399 = vector.extract_strided_slice %397 {offsets = [0, 0], sizes = [4, 128], strides = [1, 1]} : vector<4x384xf32> to vector<4x128xf32>
    %400 = arith.addf %398, %399 : vector<4x128xf32>
    %401 = arith.negf %400 : vector<4x128xf32>
    %402 = math.exp %401 : vector<4x128xf32>
    %cst_102 = arith.constant 1.000000e+00 : f32
    %403 = vector.broadcast %cst_102 : f32 to vector<4x128xf32>
    %404 = arith.addf %403, %402 : vector<4x128xf32>
    %405 = arith.divf %403, %404 : vector<4x128xf32>
    %406 = vector.extract_strided_slice %163 {offsets = [0, 128], sizes = [4, 128], strides = [1, 1]} : vector<4x384xf32> to vector<4x128xf32>
    %407 = vector.extract_strided_slice %397 {offsets = [0, 128], sizes = [4, 128], strides = [1, 1]} : vector<4x384xf32> to vector<4x128xf32>
    %408 = arith.addf %406, %407 : vector<4x128xf32>
    %409 = arith.negf %408 : vector<4x128xf32>
    %410 = math.exp %409 : vector<4x128xf32>
    %cst_103 = arith.constant 1.000000e+00 : f32
    %411 = vector.broadcast %cst_103 : f32 to vector<4x128xf32>
    %412 = arith.addf %411, %410 : vector<4x128xf32>
    %413 = arith.divf %411, %412 : vector<4x128xf32>
    %414 = vector.extract_strided_slice %163 {offsets = [0, 256], sizes = [4, 128], strides = [1, 1]} : vector<4x384xf32> to vector<4x128xf32>
    %415 = vector.extract_strided_slice %397 {offsets = [0, 256], sizes = [4, 128], strides = [1, 1]} : vector<4x384xf32> to vector<4x128xf32>
    %416 = arith.mulf %405, %415 : vector<4x128xf32>
    %417 = arith.addf %414, %416 : vector<4x128xf32>
    %418 = math.tanh %417 : vector<4x128xf32>
    %cst_104 = arith.constant 1.000000e+00 : f32
    %419 = vector.broadcast %cst_104 : f32 to vector<4x128xf32>
    %420 = arith.subf %419, %413 : vector<4x128xf32>
    %421 = arith.mulf %420, %418 : vector<4x128xf32>
    %422 = arith.mulf %413, %388 : vector<4x128xf32>
    %423 = arith.addf %421, %422 : vector<4x128xf32>
    %424 = vector.broadcast %181 : vector<4x1xf32> to vector<4x128xf32>
    %425 = arith.mulf %423, %424 : vector<4x128xf32>
    %426 = vector.broadcast %183 : vector<4x1xf32> to vector<4x128xf32>
    %427 = arith.mulf %423, %426 : vector<4x128xf32>
    %428 = tpu.concatenate %425, %427 in 1 : vector<4x128xf32>, vector<4x128xf32> -> vector<4x256xf32>
    %429 = vector.extract_strided_slice %423 {offsets = [0, 0], sizes = [2, 128], strides = [1, 1]} : vector<4x128xf32> to vector<2x128xf32>
    %430 = vector.extract_strided_slice %423 {offsets = [2, 0], sizes = [2, 128], strides = [1, 1]} : vector<4x128xf32> to vector<2x128xf32>
    %cst_105 = arith.constant dense<0.000000e+00> : vector<4x384xf32>
    %431 = tpu.matmul %428, %169, %cst_105 {dimension_numbers = #tpu.dot_dimension_numbers<[1], [0], [0], [1], [0, 0, 1, 1], [], []>} : vector<4x256xf32>, vector<256x384xf32>, vector<4x384xf32> -> vector<4x384xf32>
    %432 = arith.addf %431, %176 : vector<4x384xf32>
    %433 = vector.extract_strided_slice %168 {offsets = [0, 0], sizes = [4, 128], strides = [1, 1]} : vector<4x384xf32> to vector<4x128xf32>
    %434 = vector.extract_strided_slice %432 {offsets = [0, 0], sizes = [4, 128], strides = [1, 1]} : vector<4x384xf32> to vector<4x128xf32>
    %435 = arith.addf %433, %434 : vector<4x128xf32>
    %436 = arith.negf %435 : vector<4x128xf32>
    %437 = math.exp %436 : vector<4x128xf32>
    %cst_106 = arith.constant 1.000000e+00 : f32
    %438 = vector.broadcast %cst_106 : f32 to vector<4x128xf32>
    %439 = arith.addf %438, %437 : vector<4x128xf32>
    %440 = arith.divf %438, %439 : vector<4x128xf32>
    %441 = vector.extract_strided_slice %168 {offsets = [0, 128], sizes = [4, 128], strides = [1, 1]} : vector<4x384xf32> to vector<4x128xf32>
    %442 = vector.extract_strided_slice %432 {offsets = [0, 128], sizes = [4, 128], strides = [1, 1]} : vector<4x384xf32> to vector<4x128xf32>
    %443 = arith.addf %441, %442 : vector<4x128xf32>
    %444 = arith.negf %443 : vector<4x128xf32>
    %445 = math.exp %444 : vector<4x128xf32>
    %cst_107 = arith.constant 1.000000e+00 : f32
    %446 = vector.broadcast %cst_107 : f32 to vector<4x128xf32>
    %447 = arith.addf %446, %445 : vector<4x128xf32>
    %448 = arith.divf %446, %447 : vector<4x128xf32>
    %449 = vector.extract_strided_slice %168 {offsets = [0, 256], sizes = [4, 128], strides = [1, 1]} : vector<4x384xf32> to vector<4x128xf32>
    %450 = vector.extract_strided_slice %432 {offsets = [0, 256], sizes = [4, 128], strides = [1, 1]} : vector<4x384xf32> to vector<4x128xf32>
    %451 = arith.mulf %440, %450 : vector<4x128xf32>
    %452 = arith.addf %449, %451 : vector<4x128xf32>
    %453 = math.tanh %452 : vector<4x128xf32>
    %cst_108 = arith.constant 1.000000e+00 : f32
    %454 = vector.broadcast %cst_108 : f32 to vector<4x128xf32>
    %455 = arith.subf %454, %448 : vector<4x128xf32>
    %456 = arith.mulf %455, %453 : vector<4x128xf32>
    %457 = arith.mulf %448, %423 : vector<4x128xf32>
    %458 = arith.addf %456, %457 : vector<4x128xf32>
    %459 = vector.extract_strided_slice %458 {offsets = [0, 0], sizes = [2, 128], strides = [1, 1]} : vector<4x128xf32> to vector<2x128xf32>
    %460 = vector.extract_strided_slice %458 {offsets = [2, 0], sizes = [2, 128], strides = [1, 1]} : vector<4x128xf32> to vector<2x128xf32>
    %461 = tpu.concatenate %219, %254, %289, %324, %359, %394, %429, %459 in 0 : vector<2x128xf32>, vector<2x128xf32>, vector<2x128xf32>, vector<2x128xf32>, vector<2x128xf32>, vector<2x128xf32>, vector<2x128xf32>, vector<2x128xf32> -> vector<16x128xf32>
    %462 = tpu.concatenate %460, %430, %395, %360, %325, %290, %255, %220 in 0 : vector<2x128xf32>, vector<2x128xf32>, vector<2x128xf32>, vector<2x128xf32>, vector<2x128xf32>, vector<2x128xf32>, vector<2x128xf32>, vector<2x128xf32> -> vector<16x128xf32>
    %463 = tpu.concatenate %461, %462 in 1 : vector<16x128xf32>, vector<16x128xf32> -> vector<16x256xf32>
    %c0_109 = arith.constant 0 : index
    %c0_110 = arith.constant 0 : index
    %464 = vector.load %arg23[%c0_109, %c0_110] : memref<256x128xf32, #tpu.memory_space<vmem>>, vector<256x128xf32>
    %cst_111 = arith.constant dense<0.000000e+00> : vector<16x128xf32>
    %465 = tpu.matmul %463, %464, %cst_111 {dimension_numbers = #tpu.dot_dimension_numbers<[1], [0], [0], [1], [0, 0, 1, 1], [], []>} : vector<16x256xf32>, vector<256x128xf32>, vector<16x128xf32> -> vector<16x128xf32>
    %c0_112 = arith.constant 0 : index
    %c0_113 = arith.constant 0 : index
    %466 = vector.load %arg24[%c0_112, %c0_113] : memref<1x128xf32, #tpu.memory_space<vmem>>, vector<1x128xf32>
    %467 = vector.broadcast %466 : vector<1x128xf32> to vector<16x128xf32>
    %468 = arith.addf %465, %467 : vector<16x128xf32>
    %c0_114 = arith.constant 0 : index
    %c0_115 = arith.constant 0 : index
    %469 = vector.load %arg25[%c0_114, %c0_115] : memref<16x128xf32, #tpu.memory_space<vmem>>, vector<16x128xf32>
    tpu.vector_store %arg25[%c0_114, %c0_115], %468 {strides = array<i32>} : memref<16x128xf32, #tpu.memory_space<vmem>>, vector<16x128xf32>,
    return
  }
}

</mosaic_0001>

<bundles_post_ra>
// kernel: deep_punctuation_forward.1
= control target key start
LH: loop header
LB: loop body
LE: loop exit
PB: predicated region body
PF: predicated region fallthrough
CT: control target
= control target key end

     0   :  { %s7005_s0 = inlined_call_operand.vmem [shape: f32[2,8,32], index: 0, kind: input, shape index: {}]   ;;  %s7006_s1 = inlined_call_operand.vmem [shape: f32[2,1,8], index: 1, kind: input, shape index: {}]   ;;  %s7007_s2 = inlined_call_operand.vmem [shape: f32[32,32], index: 2, kind: input, shape index: {}]   ;;  %s7008_s3 = inlined_call_operand.hbm [shape: f32[1,32], index: 3, kind: input, shape index: {}]   ;;  %s7009_s4 = inlined_call_operand.hbm [shape: f32[32,32], index: 4, kind: input, shape index: {}]   ;;  %s7010_s5 = inlined_call_operand.hbm [shape: f32[1,32], index: 5, kind: input, shape index: {}]   ;;  %s7011_s6 = inlined_call_operand.vmem [shape: f32[32,32], index: 6, kind: input, shape index: {}]   ;;  %s7012_s7 = inlined_call_operand.hbm [shape: f32[1,32], index: 7, kind: input, shape index: {}]   ;;  %s7013_s8 = inlined_call_operand.hbm [shape: f32[32,32], index: 8, kind: input, shape index: {}]   ;;  %s7014_s9 = inlined_call_operand.hbm [shape: f32[1,32], index: 9, kind: input, shape index: {}]   ;;  %s7015_s10 = inlined_call_operand.hbm [shape: f32[32,128], index: 10, kind: input, shape index: {}]   ;;  %s7016_s11 = inlined_call_operand.hbm [shape: f32[1,128], index: 11, kind: input, shape index: {}]   ;;  %s7017_s12 = inlined_call_operand.vmem [shape: f32[128,32], index: 12, kind: input, shape index: {}]   ;;  %s7018_s13 = inlined_call_operand.hbm [shape: f32[1,32], index: 13, kind: input, shape index: {}]   ;;  %s7019_s14 = inlined_call_operand.hbm [shape: f32[1,32], index: 14, kind: input, shape index: {}]   ;;  %s7020_s15 = inlined_call_operand.hbm [shape: f32[1,32], index: 15, kind: input, shape index: {}]   ;;  %s7021_s16 = inlined_call_operand.hbm [shape: f32[1,32], index: 16, kind: input, shape index: {}]   ;;  %s7022_s17 = inlined_call_operand.hbm [shape: f32[1,32], index: 17, kind: input, shape index: {}]   ;;  %s7023_s18 = inlined_call_operand.vmem [shape: f32[32,768], index: 18, kind: input, shape index: {}]   ;;  %s7024_s19 = inlined_call_operand.hbm [shape: f32[1,768], index: 19, kind: input, shape index: {}]   ;;  %s7025_s20 = inlined_call_operand.hbm [shape: f32[256,384], index: 20, kind: input, shape index: {}]   ;;  %s7026_s21 = inlined_call_operand.vmem [shape: f32[1,384], index: 21, kind: input, shape index: {}]   ;;  %s7027_s22 = inlined_call_operand.hbm [shape: f32[1,384], index: 22, kind: input, shape index: {}]   ;;  %s7028_s23 = inlined_call_operand.vmem [shape: f32[256,128], index: 23, kind: input, shape index: {}]   ;;  %s7029_s24 = inlined_call_operand.hbm [shape: f32[1,128], index: 24, kind: input, shape index: {}]   ;;  %s7030_s25 = inlined_call_operand.vmem [shape: f32[16,128], index: 25, kind: output, shape index: {}]  }
   0x1   :  { %7124 = sst [smem:[#allocation94_spill]] %s7005_s0 }
   0x2   :  { %7125 = sst [smem:[#allocation95_spill]] %s7006_s1 }
   0x3   :  { %7126 = sst [smem:[#allocation96_spill]] %s7007_s2 }
   0x4   :  { %7127 = sst [smem:[#allocation97_spill]] %s7008_s3 }
   0x5   :  { %7128 = sst [smem:[#allocation98_spill]] %s7009_s4 }
   0x6   :  { %7129 = sst [smem:[#allocation99_spill]] %s7010_s5 }
   0x7   :  { %7130 = sst [smem:[#allocation100_spill]] %s7011_s6 }
   0x8   :  { %7131 = sst [smem:[#allocation101_spill]] %s7012_s7 }
   0x9   :  { %7132 = sst [smem:[#allocation102_spill]] %s7013_s8 }
   0xa   :  { %7133 = sst [smem:[#allocation103_spill]] %s7014_s9 }
   0xb   :  { %7134 = sst [smem:[#allocation104_spill]] %s7026_s21 }
   0xc   :  { %7135 = sst [smem:[#allocation105_spill]] %s7028_s23 }
   0xd   :  { %7136 = sst [smem:[#allocation106_spill]] %s7030_s25 }
   0xe   :  { %30 = vsyncpa [#allocation3], 0 }
   0xf   :  { %31 = vsyncpa [#allocation5], 0 }
  0x10   :  { %32 = vsyncpa [#allocation8], 0 }
  0x11   :  { %33 = vsyncpa [#allocation11], 0 }
  0x12   :  { %34 = vsyncpa [#allocation14], 0 }
  0x13   :  { %35 = vsyncpa [#allocation17], 0 }
  0x14   :  { %36 = vsyncpa [#allocation20], 0 }
  0x15   :  { %37 = vsyncpa [#allocation23], 0 }
  0x16   :  { %38 = vsyncpa [#allocation26], 0  ;;  %s5360_s29 = smov [#allocation4]   ;;  %s7137_s7 = sld [smem:[#allocation98_spill]] }
  0x17   :  { %s60_s2 = sshll.u32 %s5360_s29, 4  ;;  %s61_s2 = int_to_ptr.vmem [resolvable:$true] %s60_s2 }
  0x1c   :  { %s4968_s3 = scalar_lea.hbm %s7137_s7, 512 }
  0x1d   :  { %p4969_p0 = scmp.ne.s32.totalorder %s7137_s7, %s4968_s3  ;;  %p4972_p1 = scmp.lt.u32.totalorder %s4968_s3, %s7137_s7 }
  0x1f   :  { %p4974_p2 = pnand %p4972_p1, %p4969_p0 }
  0x21   :  { %4977 = shalt.err (!%p4974_p2)
}
  0x22   :  { %s4978_s4 = scalar_lea.vmem %s61_s2, 512  ;;  %p4983_p4 = scmp.lt.s32.totalorder %s61_s2, %s61_s2 }
  0x23   :  { %p4979_p3 = scmp.ne.s32.totalorder %s61_s2, %s4978_s4  ;;  %p4984_p5 = scmp.lt.s32.totalorder %s4978_s4, %s4978_s4 }
  0x25   :  { %p4985_p6 = por %p4984_p5, %p4983_p4 }
  0x27   :  { %p4986_p7 = pnand %p4985_p6, %p4979_p3 }
  0x29   :  { %4989 = shalt.err (!%p4986_p7)
}
  0x2a   :  { %s5361_s28 = smov 128   ;;  %s5362_s9 = smov 8  }
  0x2b   :  { %66 = dma.hbm_to_vmem [thread:$0]  %s7137_s7, 512, %s61_s2, [#allocation5], %s5361_s28, %s5361_s28, %s5362_s9  }
  0x2c   :  { %s5363_s29 = smov [#allocation7]   ;;  %s5364_s30 = smov [#allocation10]  }
  0x2d   :  { %s85_s6 = sshll.u32 %s5363_s29, 4  ;;  %s107_s3 = sshll.u32 %s5364_s30, 4  ;;  %s86_s6 = int_to_ptr.vmem [resolvable:$true] %s85_s6  ;;  %s108_s3 = int_to_ptr.vmem [resolvable:$true] %s107_s3 }
  0x2e   :  { %s7138_s8 = sld [smem:[#allocation101_spill]] }
  0x34   :  { %s4990_s27 = scalar_lea.hbm %s7138_s8, 16 }
  0x35   :  { %p4991_p8 = scmp.ne.s32.totalorder %s7138_s8, %s4990_s27  ;;  %p4994_p9 = scmp.lt.u32.totalorder %s4990_s27, %s7138_s8 }
  0x37   :  { %p4996_p10 = pnand %p4994_p9, %p4991_p8 }
  0x39   :  { %4999 = shalt.err (!%p4996_p10)
}
  0x3a   :  { %s5000_s2 = scalar_lea.vmem %s86_s6, 16  ;;  %s5004_s7 = scalar_lea.vmem %s86_s6, 32 }
  0x3b   :  { %p5001_p11 = scmp.ne.s32.totalorder %s86_s6, %s5000_s2  ;;  %p5005_p12 = scmp.lt.s32.totalorder %s86_s6, %s86_s6 }
  0x3c   :  { %p5006_p13 = scmp.lt.s32.totalorder %s5004_s7, %s5000_s2 }
  0x3e   :  { %p5007_p0 = por %p5006_p13, %p5005_p12 }
  0x40   :  { %p5008_p1 = pnand %p5007_p0, %p5001_p11 }
  0x42   :  { %5011 = shalt.err (!%p5008_p1)
}
  0x43   :  { %88 = dma.hbm_to_vmem [thread:$0]  %s7138_s8, 16, %s86_s6, [#allocation8]  }
  0x44   :  { %s7139_s30 = sld [smem:[#allocation103_spill]] }
  0x4a   :  { %s5012_s21 = scalar_lea.hbm %s7139_s30, 16 }
  0x4b   :  { %p5013_p2 = scmp.ne.s32.totalorder %s7139_s30, %s5012_s21  ;;  %p5016_p3 = scmp.lt.u32.totalorder %s5012_s21, %s7139_s30 }
  0x4d   :  { %p5018_p4 = pnand %p5016_p3, %p5013_p2 }
  0x4f   :  { %5021 = shalt.err (!%p5018_p4)
}
  0x50   :  { %s5022_s4 = scalar_lea.vmem %s108_s3, 16  ;;  %s5026_s2 = scalar_lea.vmem %s108_s3, 32 }
  0x51   :  { %p5023_p5 = scmp.ne.s32.totalorder %s108_s3, %s5022_s4  ;;  %p5027_p6 = scmp.lt.s32.totalorder %s108_s3, %s108_s3 }
  0x52   :  { %p5028_p7 = scmp.lt.s32.totalorder %s5026_s2, %s5022_s4 }
  0x54   :  { %p5029_p8 = por %p5028_p7, %p5027_p6 }
  0x56   :  { %p5030_p9 = pnand %p5029_p8, %p5023_p5 }
  0x58   :  { %5033 = shalt.err (!%p5030_p9)
}
  0x59   :  { %110 = dma.hbm_to_vmem [thread:$0]  %s7139_s30, 16, %s108_s3, [#allocation11]  }
  0x5a   :  { %s5365_s7 = smov [#allocation13]   ;;  %s5366_s0 = smov [#allocation16]  }
  0x5b   :  { %s129_s5 = sshll.u32 %s5365_s7, 4  ;;  %s151_s25 = sshll.u32 %s5366_s0, 4  ;;  %s130_s5 = int_to_ptr.vmem [resolvable:$true] %s129_s5  ;;  %s152_s25 = int_to_ptr.vmem [resolvable:$true] %s151_s25 }
  0x5c   :  { %s5034_s23 = scalar_lea.hbm %s7016_s11, 16 }
  0x5d   :  { %p5035_p10 = scmp.ne.s32.totalorder %s7016_s11, %s5034_s23  ;;  %p5038_p11 = scmp.lt.u32.totalorder %s5034_s23, %s7016_s11 }
  0x5f   :  { %p5040_p12 = pnand %p5038_p11, %p5035_p10 }
  0x61   :  { %5043 = shalt.err (!%p5040_p12)
}
  0x62   :  { %s5044_s3 = scalar_lea.vmem %s130_s5, 16  ;;  %s5048_s30 = scalar_lea.vmem %s130_s5, 32 }
  0x63   :  { %p5045_p13 = scmp.ne.s32.totalorder %s130_s5, %s5044_s3  ;;  %p5049_p0 = scmp.lt.s32.totalorder %s130_s5, %s130_s5 }
  0x64   :  { %p5050_p1 = scmp.lt.s32.totalorder %s5048_s30, %s5044_s3 }
  0x66   :  { %p5051_p2 = por %p5050_p1, %p5049_p0 }
  0x68   :  { %p5052_p3 = pnand %p5051_p2, %p5045_p13 }
  0x6a   :  { %5055 = shalt.err (!%p5052_p3)
}
  0x6b   :  { %132 = dma.hbm_to_vmem [thread:$0]  %s7016_s11, 16, %s130_s5, [#allocation14]  }
  0x6c   :  { %s5056_s0 = scalar_lea.hbm %s7019_s14, 16 }
  0x6d   :  { %p5057_p4 = scmp.ne.s32.totalorder %s7019_s14, %s5056_s0  ;;  %p5060_p5 = scmp.lt.u32.totalorder %s5056_s0, %s7019_s14 }
  0x6f   :  { %p5062_p6 = pnand %p5060_p5, %p5057_p4 }
  0x71   :  { %5065 = shalt.err (!%p5062_p6)
}
  0x72   :  { %s5066_s1 = scalar_lea.vmem %s152_s25, 16  ;;  %s5070_s27 = scalar_lea.vmem %s152_s25, 32 }
  0x73   :  { %p5067_p7 = scmp.ne.s32.totalorder %s152_s25, %s5066_s1  ;;  %p5071_p8 = scmp.lt.s32.totalorder %s152_s25, %s152_s25 }
  0x74   :  { %p5072_p9 = scmp.lt.s32.totalorder %s5070_s27, %s5066_s1 }
  0x76   :  { %p5073_p10 = por %p5072_p9, %p5071_p8 }
  0x78   :  { %p5074_p11 = pnand %p5073_p10, %p5067_p7 }
  0x7a   :  { %5077 = shalt.err (!%p5074_p11)
}
  0x7b   :  { %154 = dma.hbm_to_vmem [thread:$0]  %s7019_s14, 16, %s152_s25, [#allocation17]  }
  0x7c   :  { %s5367_s4 = smov [#allocation19]   ;;  %s5368_s30 = smov [#allocation22]  }
  0x7d   :  { %s171_s3 = sshll.u32 %s5367_s4, 4  ;;  %s193_s2 = sshll.u32 %s5368_s30, 4  ;;  %s172_s3 = int_to_ptr.vmem [resolvable:$true] %s171_s3  ;;  %s194_s2 = int_to_ptr.vmem [resolvable:$true] %s193_s2 }
  0x7e   :  { %s5078_s7 = scalar_lea.hbm %s7021_s16, 16 }
  0x7f   :  { %p5079_p12 = scmp.ne.s32.totalorder %s7021_s16, %s5078_s7  ;;  %p5082_p13 = scmp.lt.u32.totalorder %s5078_s7, %s7021_s16 }
  0x81   :  { %p5084_p0 = pnand %p5082_p13, %p5079_p12 }
  0x83   :  { %5087 = shalt.err (!%p5084_p0)
}
  0x84   :  { %s5088_s14 = scalar_lea.vmem %s172_s3, 16  ;;  %s5092_s25 = scalar_lea.vmem %s172_s3, 32 }
  0x85   :  { %p5089_p1 = scmp.ne.s32.totalorder %s172_s3, %s5088_s14  ;;  %p5093_p2 = scmp.lt.s32.totalorder %s172_s3, %s172_s3 }
  0x86   :  { %p5094_p3 = scmp.lt.s32.totalorder %s5092_s25, %s5088_s14 }
  0x88   :  { %p5095_p4 = por %p5094_p3, %p5093_p2 }
  0x8a   :  { %p5096_p5 = pnand %p5095_p4, %p5089_p1 }
  0x8c   :  { %5099 = shalt.err (!%p5096_p5)
}
  0x8d   :  { %174 = dma.hbm_to_vmem [thread:$0]  %s7021_s16, 16, %s172_s3, [#allocation20]  }
  0x8e   :  { %s5100_s5 = scalar_lea.hbm %s7024_s19, 96 }
  0x8f   :  { %p5101_p6 = scmp.ne.s32.totalorder %s7024_s19, %s5100_s5  ;;  %p5104_p7 = scmp.lt.u32.totalorder %s5100_s5, %s7024_s19 }
  0x91   :  { %p5106_p8 = pnand %p5104_p7, %p5101_p6 }
  0x93   :  { %5109 = shalt.err (!%p5106_p8)
}
  0x94   :  { %s5110_s7 = scalar_lea.vmem %s194_s2, 96  ;;  %p5115_p10 = scmp.lt.s32.totalorder %s194_s2, %s194_s2 }
  0x95   :  { %p5111_p9 = scmp.ne.s32.totalorder %s194_s2, %s5110_s7  ;;  %p5116_p11 = scmp.lt.s32.totalorder %s5110_s7, %s5110_s7 }
  0x97   :  { %p5117_p12 = por %p5116_p11, %p5115_p10 }
  0x99   :  { %p5118_p13 = pnand %p5117_p12, %p5111_p9 }
  0x9b   :  { %5121 = shalt.err (!%p5118_p13)
}
  0x9c   :  { %196 = dma.hbm_to_vmem [thread:$0]  %s7024_s19, 96, %s194_s2, [#allocation23]  }
  0x9d   :  { %s5369_s0 = smov [#allocation25]   ;;  %s5370_s21 = smov [#allocation2]  }
  0x9e   :  { %s217_s29 = sshll.u32 %s5369_s0, 4  ;;  %s51_s23 = sshll.u32 %s5370_s21, 4  ;;  %s218_s29 = int_to_ptr.vmem [resolvable:$true] %s217_s29  ;;  %s52_s23 = int_to_ptr.vmem [resolvable:$true] %s51_s23 }
  0x9f   :  { %s5122_s26 = scalar_lea.hbm %s7027_s22, 48 }
  0xa0   :  { %p5123_p0 = scmp.ne.s32.totalorder %s7027_s22, %s5122_s26  ;;  %p5126_p1 = scmp.lt.u32.totalorder %s5122_s26, %s7027_s22 }
  0xa2   :  { %p5128_p2 = pnand %p5126_p1, %p5123_p0 }
  0xa4   :  { %5131 = shalt.err (!%p5128_p2)
}
  0xa5   :  { %s5132_s19 = scalar_lea.vmem %s218_s29, 48  ;;  %s5136_s2 = scalar_lea.vmem %s218_s29, 64 }
  0xa6   :  { %p5133_p3 = scmp.ne.s32.totalorder %s218_s29, %s5132_s19  ;;  %p5137_p4 = scmp.lt.s32.totalorder %s218_s29, %s218_s29 }
  0xa7   :  { %p5138_p5 = scmp.lt.s32.totalorder %s5136_s2, %s5132_s19 }
  0xa9   :  { %p5139_p6 = por %p5138_p5, %p5137_p4 }
  0xab   :  { %p5140_p7 = pnand %p5139_p6, %p5133_p3 }
  0xad   :  { %5143 = shalt.err (!%p5140_p7)
}
  0xae   :  { %220 = dma.hbm_to_vmem [thread:$0]  %s7027_s22, 48, %s218_s29, [#allocation26]  }
  0xaf   :  { %s7140_s7 = sld [smem:[#allocation97_spill]] }
  0xb5   :  { %s5144_s16 = scalar_lea.hbm %s7140_s7, 16 }
  0xb6   :  { %p5145_p8 = scmp.ne.s32.totalorder %s7140_s7, %s5144_s16  ;;  %p5148_p9 = scmp.lt.u32.totalorder %s5144_s16, %s7140_s7 }
  0xb8   :  { %p5150_p10 = pnand %p5148_p9, %p5145_p8 }
  0xba   :  { %5153 = shalt.err (!%p5150_p10)
}
  0xbb   :  { %s5154_s25 = scalar_lea.vmem %s52_s23, 16  ;;  %s5158_s26 = scalar_lea.vmem %s52_s23, 32 }
  0xbc   :  { %p5155_p11 = scmp.ne.s32.totalorder %s52_s23, %s5154_s25  ;;  %p5159_p12 = scmp.lt.s32.totalorder %s52_s23, %s52_s23 }
  0xbd   :  { %p5160_p13 = scmp.lt.s32.totalorder %s5158_s26, %s5154_s25 }
  0xbf   :  { %p5161_p0 = por %p5160_p13, %p5159_p12 }
  0xc1   :  { %p5162_p1 = pnand %p5161_p0, %p5155_p11 }
  0xc3   :  { %5165 = shalt.err (!%p5162_p1)
}
  0xc4   :  { %54 = dma.hbm_to_vmem [thread:$0]  %s7140_s7, 16, %s52_s23, [#allocation3]  }
  0xc5   :  { %s5371_s1 = smov [#allocation6]   ;;  %s5372_s11 = smov [#allocation9]  }
  0xc6   :  { %s73_s27 = sshll.u32 %s5371_s1, 4  ;;  %s94_s5 = sshll.u32 %s5372_s11, 4  ;;  %s74_s27 = int_to_ptr.vmem [resolvable:$true] %s73_s27  ;;  %s95_s5 = int_to_ptr.vmem [resolvable:$true] %s94_s5 }
  0xc7   :  { %s7141_s4 = sld [smem:[#allocation99_spill]] }
  0xcd   :  { %s5166_s30 = scalar_lea.hbm %s7141_s4, 16 }
  0xce   :  { %p5167_p2 = scmp.ne.s32.totalorder %s7141_s4, %s5166_s30  ;;  %p5170_p3 = scmp.lt.u32.totalorder %s5166_s30, %s7141_s4 }
  0xd0   :  { %p5172_p4 = pnand %p5170_p3, %p5167_p2 }
  0xd2   :  { %5175 = shalt.err (!%p5172_p4)
}
  0xd3   :  { %s5176_s23 = scalar_lea.vmem %s74_s27, 16  ;;  %s5180_s7 = scalar_lea.vmem %s74_s27, 32 }
  0xd4   :  { %p5177_p5 = scmp.ne.s32.totalorder %s74_s27, %s5176_s23  ;;  %p5181_p6 = scmp.lt.s32.totalorder %s74_s27, %s74_s27 }
  0xd5   :  { %p5182_p7 = scmp.lt.s32.totalorder %s5180_s7, %s5176_s23 }
  0xd7   :  { %p5183_p8 = por %p5182_p7, %p5181_p6 }
  0xd9   :  { %p5184_p9 = pnand %p5183_p8, %p5177_p5 }
  0xdb   :  { %5187 = shalt.err (!%p5184_p9)
}
  0xdc   :  { %76 = dma.hbm_to_vmem [thread:$0]  %s7141_s4, 16, %s74_s27, [#allocation5]  }
  0xdd   :  { %s7142_s26 = sld [smem:[#allocation102_spill]] }
  0xe3   :  { %s5188_s22 = scalar_lea.hbm %s7142_s26, 512 }
  0xe4   :  { %p5189_p10 = scmp.ne.s32.totalorder %s7142_s26, %s5188_s22  ;;  %p5192_p11 = scmp.lt.u32.totalorder %s5188_s22, %s7142_s26 }
  0xe6   :  { %p5194_p12 = pnand %p5192_p11, %p5189_p10 }
  0xe8   :  { %5197 = shalt.err (!%p5194_p12)
}
  0xe9   :  { %s5198_s2 = scalar_lea.vmem %s95_s5, 512  ;;  %p5203_p0 = scmp.lt.s32.totalorder %s95_s5, %s95_s5 }
  0xea   :  { %p5199_p13 = scmp.ne.s32.totalorder %s95_s5, %s5198_s2  ;;  %p5204_p1 = scmp.lt.s32.totalorder %s5198_s2, %s5198_s2 }
  0xec   :  { %p5205_p2 = por %p5204_p1, %p5203_p0 }
  0xee   :  { %p5206_p3 = pnand %p5205_p2, %p5199_p13 }
  0xf0   :  { %5209 = shalt.err (!%p5206_p3)
}
  0xf1   :  { %100 = dma.hbm_to_vmem [thread:$0]  %s7142_s26, 512, %s95_s5, [#allocation8], %s5361_s28, %s5361_s28, %s5362_s9  }
  0xf2   :  { %s5373_s30 = smov [#allocation12]   ;;  %s5374_s8 = smov [#allocation15]  }
  0xf3   :  { %s116_s6 = sshll.u32 %s5373_s30, 4  ;;  %s141_s16 = sshll.u32 %s5374_s8, 4  ;;  %s117_s6 = int_to_ptr.vmem [resolvable:$true] %s116_s6  ;;  %s142_s16 = int_to_ptr.vmem [resolvable:$true] %s141_s16 }
  0xf4   :  { %s5210_s7 = scalar_lea.hbm %s7015_s10, 512 }
  0xf5   :  { %p5211_p4 = scmp.ne.s32.totalorder %s7015_s10, %s5210_s7  ;;  %p5214_p5 = scmp.lt.u32.totalorder %s5210_s7, %s7015_s10 }
  0xf7   :  { %p5216_p6 = pnand %p5214_p5, %p5211_p4 }
  0xf9   :  { %5219 = shalt.err (!%p5216_p6)
}
  0xfa   :  { %s5220_s5 = scalar_lea.vmem %s117_s6, 512  ;;  %p5225_p8 = scmp.lt.s32.totalorder %s117_s6, %s117_s6 }
  0xfb   :  { %p5221_p7 = scmp.ne.s32.totalorder %s117_s6, %s5220_s5  ;;  %p5226_p9 = scmp.lt.s32.totalorder %s5220_s5, %s5220_s5 }
  0xfd   :  { %p5227_p10 = por %p5226_p9, %p5225_p8 }
  0xff   :  { %p5228_p11 = pnand %p5227_p10, %p5221_p7 }
 0x101   :  { %5231 = shalt.err (!%p5228_p11)
}
 0x102   :  { %122 = dma.hbm_to_vmem [thread:$0]  %s7015_s10, 512, %s117_s6, [#allocation11], %s5361_s28, %s5361_s28, %s5362_s9  }
 0x103   :  { %s5232_s11 = scalar_lea.hbm %s7018_s13, 16 }
 0x104   :  { %p5233_p12 = scmp.ne.s32.totalorder %s7018_s13, %s5232_s11  ;;  %p5236_p13 = scmp.lt.u32.totalorder %s5232_s11, %s7018_s13 }
 0x106   :  { %p5238_p0 = pnand %p5236_p13, %p5233_p12 }
 0x108   :  { %5241 = shalt.err (!%p5238_p0)
}
 0x109   :  { %s5242_s30 = scalar_lea.vmem %s142_s16, 16  ;;  %s5246_s8 = scalar_lea.vmem %s142_s16, 32 }
 0x10a   :  { %p5243_p1 = scmp.ne.s32.totalorder %s142_s16, %s5242_s30  ;;  %p5247_p2 = scmp.lt.s32.totalorder %s142_s16, %s142_s16 }
 0x10b   :  { %p5248_p3 = scmp.lt.s32.totalorder %s5246_s8, %s5242_s30 }
 0x10d   :  { %p5249_p4 = por %p5248_p3, %p5247_p2 }
 0x10f   :  { %p5250_p5 = pnand %p5249_p4, %p5243_p1 }
 0x111   :  { %5253 = shalt.err (!%p5250_p5)
}
 0x112   :  { %144 = dma.hbm_to_vmem [thread:$0]  %s7018_s13, 16, %s142_s16, [#allocation14]  }
 0x113   :  { %s5375_s9 = smov [#allocation18]   ;;  %s5376_s3 = smov [#allocation21]  }
 0x114   :  { %s161_s6 = sshll.u32 %s5375_s9, 4  ;;  %s181_s23 = sshll.u32 %s5376_s3, 4  ;;  %s162_s6 = int_to_ptr.vmem [resolvable:$true] %s161_s6  ;;  %s182_s23 = int_to_ptr.vmem [resolvable:$true] %s181_s23 }
 0x115   :  { %s5254_s21 = scalar_lea.hbm %s7020_s15, 16 }
 0x116   :  { %p5255_p6 = scmp.ne.s32.totalorder %s7020_s15, %s5254_s21  ;;  %p5258_p7 = scmp.lt.u32.totalorder %s5254_s21, %s7020_s15 }
 0x118   :  { %p5260_p8 = pnand %p5258_p7, %p5255_p6 }
 0x11a   :  { %5263 = shalt.err (!%p5260_p8)
}
 0x11b   :  { %s5264_s13 = scalar_lea.vmem %s162_s6, 16  ;;  %s5268_s16 = scalar_lea.vmem %s162_s6, 32 }
 0x11c   :  { %p5265_p9 = scmp.ne.s32.totalorder %s162_s6, %s5264_s13  ;;  %p5269_p10 = scmp.lt.s32.totalorder %s162_s6, %s162_s6 }
 0x11d   :  { %p5270_p11 = scmp.lt.s32.totalorder %s5268_s16, %s5264_s13 }
 0x11f   :  { %p5271_p12 = por %p5270_p11, %p5269_p10 }
 0x121   :  { %p5272_p13 = pnand %p5271_p12, %p5265_p9 }
 0x123   :  { %5275 = shalt.err (!%p5272_p13)
}
 0x124   :  { %164 = dma.hbm_to_vmem [thread:$0]  %s7020_s15, 16, %s162_s6, [#allocation17]  }
 0x125   :  { %s5276_s19 = scalar_lea.hbm %s7022_s17, 16 }
 0x126   :  { %p5277_p0 = scmp.ne.s32.totalorder %s7022_s17, %s5276_s19  ;;  %p5280_p1 = scmp.lt.u32.totalorder %s5276_s19, %s7022_s17 }
 0x128   :  { %p5282_p2 = pnand %p5280_p1, %p5277_p0 }
 0x12a   :  { %5285 = shalt.err (!%p5282_p2)
}
 0x12b   :  { %s5286_s8 = scalar_lea.vmem %s182_s23, 16  ;;  %s5290_s10 = scalar_lea.vmem %s182_s23, 32 }
 0x12c   :  { %p5287_p3 = scmp.ne.s32.totalorder %s182_s23, %s5286_s8  ;;  %p5291_p4 = scmp.lt.s32.totalorder %s182_s23, %s182_s23 }
 0x12d   :  { %p5292_p5 = scmp.lt.s32.totalorder %s5290_s10, %s5286_s8 }
 0x12f   :  { %p5293_p6 = por %p5292_p5, %p5291_p4 }
 0x131   :  { %p5294_p7 = pnand %p5293_p6, %p5287_p3 }
 0x133   :  { %5297 = shalt.err (!%p5294_p7)
}
 0x134   :  { %184 = dma.hbm_to_vmem [thread:$0]  %s7022_s17, 16, %s182_s23, [#allocation20]  }
 0x135   :  { %s5377_s9 = smov [#allocation24]   ;;  %s5298_s0 = scalar_lea.hbm %s7025_s20, 12288 }
 0x136   :  { %s202_s6 = sshll.u32 %s5377_s9, 4  ;;  %p5299_p8 = scmp.ne.s32.totalorder %s7025_s20, %s5298_s0  ;;  %s203_s6 = int_to_ptr.vmem [resolvable:$true] %s202_s6 }
 0x137   :  { %p5302_p9 = scmp.lt.u32.totalorder %s5298_s0, %s7025_s20 }
 0x139   :  { %p5304_p10 = pnand %p5302_p9, %p5299_p8 }
 0x13b   :  { %5307 = shalt.err (!%p5304_p10)
}
 0x13c   :  { %s5308_s26 = scalar_lea.vmem %s203_s6, 12288  ;;  %p5313_p12 = scmp.lt.s32.totalorder %s203_s6, %s203_s6 }
 0x13d   :  { %p5309_p11 = scmp.ne.s32.totalorder %s203_s6, %s5308_s26  ;;  %p5314_p13 = scmp.lt.s32.totalorder %s5308_s26, %s5308_s26 }
 0x13f   :  { %p5315_p0 = por %p5314_p13, %p5313_p12 }
 0x141   :  { %p5316_p1 = pnand %p5315_p0, %p5309_p11 }
 0x143   :  { %5319 = shalt.err (!%p5316_p1)
}
 0x144   :  { %s5378_s17 = smov 384   ;;  %s5379_s23 = smov 24  }
 0x145   :  { %208 = dma.hbm_to_vmem [thread:$0]  %s7025_s20, 12288, %s203_s6, [#allocation23], %s5378_s17, %s5378_s17, %s5379_s23  }
 0x146   :  { %s5380_s22 = smov [#allocation27]   ;;  %s5320_s19 = scalar_lea.hbm %s7029_s24, 16 }
 0x147   :  { %s229_s29 = sshll.u32 %s5380_s22, 4  ;;  %p5321_p2 = scmp.ne.s32.totalorder %s7029_s24, %s5320_s19  ;;  %s230_s29 = int_to_ptr.vmem [resolvable:$true] %s229_s29 }
 0x148   :  { %p5324_p3 = scmp.lt.u32.totalorder %s5320_s19, %s7029_s24 }
 0x14a   :  { %p5326_p4 = pnand %p5324_p3, %p5321_p2 }
 0x14c   :  { %5329 = shalt.err (!%p5326_p4)
}
 0x14d   :  { %s5330_s8 = scalar_lea.vmem %s230_s29, 16  ;;  %s5334_s20 = scalar_lea.vmem %s230_s29, 32 }
 0x14e   :  { %p5331_p5 = scmp.ne.s32.totalorder %s230_s29, %s5330_s8  ;;  %p5335_p6 = scmp.lt.s32.totalorder %s230_s29, %s230_s29 }
 0x14f   :  { %p5336_p7 = scmp.lt.s32.totalorder %s5334_s20, %s5330_s8 }
 0x151   :  { %p5337_p8 = por %p5336_p7, %p5335_p6 }
 0x153   :  { %p5338_p9 = pnand %p5337_p8, %p5331_p5 }
 0x155   :  { %5341 = shalt.err (!%p5338_p9)
}
 0x156   :  { %232 = dma.hbm_to_vmem [thread:$0]  %s7029_s24, 16, %s230_s29, [#allocation26]  }
 0x157   :  { %5342 = dma.done.wait [#allocation3], 16  }
 0x158   :  { %5343 = vsyncadd [#allocation3], 4294967280 }
 0x159   :  { %5344 = dma.done.wait [#allocation5], 528  }
 0x15a   :  { %5345 = vsyncadd [#allocation5], 4294966768 }
 0x15b   :  { %5346 = dma.done.wait [#allocation8], 528  }
 0x15c   :  { %5347 = vsyncadd [#allocation8], 4294966768 }
 0x15d   :  { %5348 = dma.done.wait [#allocation11], 528  }
 0x15e   :  { %5349 = vsyncadd [#allocation11], 4294966768 }
 0x15f   :  { %5350 = dma.done.wait [#allocation14], 32  }
 0x160   :  { %5351 = vsyncadd [#allocation14], 4294967264 }
 0x161   :  { %5352 = dma.done.wait [#allocation17], 32  }
 0x162   :  { %5353 = vsyncadd [#allocation17], 4294967264 }
 0x163   :  { %5354 = dma.done.wait [#allocation20], 32  }
 0x164   :  { %5355 = vsyncadd [#allocation20], 4294967264 }
 0x165   :  { %5356 = dma.done.wait [#allocation23], 12384  }
 0x166   :  { %5357 = vsyncadd [#allocation23], 4294954912 }
 0x167   :  { %5358 = dma.done.wait [#allocation26], 64  }
 0x168   :  { %5359 = vsyncadd [#allocation26], 4294967232  ;;  %vm299_vm0 = vcmask 261120   ;;  %s7143_s9 = sld [smem:[#allocation96_spill]]  ;;  %s7144_s26 = sld [smem:[#allocation94_spill]]  ;;  %v381_v7 = vld [vmem:[#allocation4] sm:$0xff]  ;;  %v713_v36 = vlaneseq }
 0x169   :  { %v382_v8 = vld [vmem:[#allocation4 + $0x8] sm:$0xff]  ;;  %v383_v10 = vld [vmem:[#allocation4 + $0x10] sm:$0xff]  ;;  %v384_v11 = vld [vmem:[#allocation4 + $0x18] sm:$0xff]  ;;  %s7145_s22 = sld [smem:[#allocation100_spill]]  ;;  %v7043_v20 = vmov 0.0   ;;  %vm5382_vm1 = vmmov 0  }
 0x16a   :  { %v3957_v9 = vpack.c.bf16 %v382_v8, %v381_v7  ;;  %v3961_v13 = vpack.c.bf16 %v384_v11, %v383_v10  ;;  %3877 = vmatprep.subr.mxu1 %v7043_v20  ;;  %3879 = vmatprep.mubr.msk.f32.mxu1 %vm5382_vm1, %v7043_v20  ;;  %v3418_v23 = vld [vmem:[#allocation6] ss:$0 sm:$0xff]  ;;  %v3415_v25 = vld [vmem:[#allocation2] ss:$0 sm:$0xff]  ;;  %v3421_v31 = vld [vmem:[#allocation7] ss:$0 sm:$0xff] }
 0x16b   :  { %s7146_s8 = sld [smem:[#allocation95_spill]]  ;;  %v5794_v40 = vshrl.u32 %v713_v36, 7  ;;  %vm725_vm2 = vcmask 64512   ;;  %vm1587_vm3 = vcmask 1041409   ;;  %vm1604_vm4 = vcmask 1043459   ;;  %s7212_s19 = sld [smem:[#allocation104_spill]] }
 0x16c   :  { %vm1615_vm5 = vcmask 1041408   ;;  %s7315_s4 = sld [smem:[#allocation105_spill]]  ;;  %vm3267_vm7 = vcmask 1043456   ;;  %vm3269_vm8 = vcmask 1045504   ;;  %s7323_s10 = sld [smem:[#allocation106_spill]] }
 0x16d   :  { %v5797_v43 = vsub.s32 0, %v5794_v40  ;;  %vm1934_vm6 = vcmp.lt.s32.totalorder %v5794_v40, 2 }
 0x16e   :  { %v288_v0 = vld [vmem:[%s7143_s9] sm:$0xff]  ;;  %v289_v1 = vld [vmem:[%s7143_s9 + $0x8] sm:$0xff]  ;;  %v290_v2 = vld [vmem:[%s7143_s9 + $0x10] sm:$0xff] }
 0x16f   :  { %v3949_v3 = vpack.c.bf16 %v289_v1, %v288_v0  ;;  %v291_v4 = vld [vmem:[%s7143_s9 + $0x18] sm:$0xff]  ;;  %v5741_v5 = vld [vmem:[%s7144_s26] sm:$0xff]  ;;  %v5748_v12 = vld [vmem:[%s7144_s26 + $0x8] sm:$0xff] }
 0x170   :  { %v3953_v6 = vpack.c.bf16 %v291_v4, %v290_v2  ;;  %3847 = vmatprep.mubr.msk.f32.mxu0 %vm299_vm0, %v5741_v5  ;;  %v467_v14 = vld [vmem:[%s7145_s22] sm:$0xff]  ;;  %v468_v15 = vld [vmem:[%s7145_s22 + $0x8] sm:$0xff]  ;;  %v469_v17 = vld [vmem:[%s7145_s22 + $0x10] sm:$0xff] }
 0x171   :  { %3950 = vmatprep.subr.bf16.mxu0 %v3949_v3  ;;  %v3965_v16 = vpack.c.bf16 %v468_v15, %v467_v14  ;;  %v470_v18 = vld [vmem:[%s7145_s22 + $0x18] sm:$0xff]  ;;  %v286_v37 = vld [vmem:[%s7146_s8] sm:$0x1]  ;;  %v287_v38 = vld [vmem:[%s7146_s8 + $0x1] sm:$0x1] }
 0x172   :  { %3952 = vmatpush3.bf16.msra.mxu0 %v3949_v3  ;;  %v3969_v19 = vpack.c.bf16 %v470_v18, %v469_v17  ;;  %v707_v39 = vsub.f32 1.0, %v286_v37  ;;  %v708_v41 = vsub.f32 1.0, %v287_v38  ;;  %v894_v3 = vld [vmem:[#allocation9] sm:$0xff]  ;;  %v895_v4 = vld [vmem:[#allocation9 + $0x8] sm:$0xff]  ;;  %v896_v14 = vld [vmem:[#allocation9 + $0x10] sm:$0xff] }
 0x173   :  { %3954 = vmatprep.subr.bf16.mxu0 %v3953_v6  ;;  %v897_v15 = vld [vmem:[#allocation9 + $0x18] sm:$0xff] }
 0x174   :  { %v709_v42 = vmul.f32 -1e+09, %v707_v39  ;;  %v710_v44 = vmul.f32 -1e+09, %v708_v41  ;;  %v1034_v41 = vld [vmem:[#allocation12 + $0x8] sm:$0xff] }
 0x176   :  { %3956 = vmatpush3.bf16.msra.mxu0 %v3953_v6  ;;  %v716_v46 = vrot.slane %v709_v42, %v5797_v43  ;;  %v720_v52 = vrot.slane %v710_v44, %v5797_v43  ;;  %v3973_v6 = vpack.c.bf16 %v895_v4, %v894_v3  ;;  %v1035_v44 = vld [vmem:[#allocation12 + $0x10] sm:$0xff] }
 0x177   :  { %3958 = vmatprep.subr.bf16.mxu0 %v3957_v9  ;;  %v1146_v3 = vld [vmem:[%s7017_s12 + $0x18] sm:$0xff] }
 0x179   :  { %3848 = vmatmul.mubr.msk.f32.vlgmr.msra.gmra.mrb[0].mxu0 %vm299_vm0, %v5748_v12 }
 0x17a   :  { %3960 = vmatpush3.bf16.msra.mxu0 %v3957_v9  ;;  %3858 = vmatprep.mubr.msk.f32.mxu0 %vm299_vm0, %v5741_v5 }
 0x17b   :  { %3962 = vmatprep.subr.bf16.mxu0 %v3961_v13 }
 0x17e   :  { %3964 = vmatpush3.bf16.msra.mxu0 %v3961_v13 }
 0x17f   :  { %3966 = vmatprep.subr.bf16.mxu0 %v3965_v16 }
 0x181   :  { %3859 = vmatmul.mubr.msk.f32.vlgmr.msra.gmra.mrb[2].mxu0 %vm299_vm0, %v5748_v12 }
 0x182   :  { %3968 = vmatpush3.bf16.msra.mxu0 %v3965_v16  ;;  %3869 = vmatprep.mubr.msk.f32.mxu0 %vm299_vm0, %v5741_v5  ;;  %v3977_v16 = vpack.c.bf16 %v897_v15, %v896_v14  ;;  %v1152_v14 = vld [vmem:[%s7017_s12 + $0x48] sm:$0xff]  ;;  %v1153_v15 = vld [vmem:[%s7017_s12 + $0x50] sm:$0xff] }
 0x183   :  { %3970 = vmatprep.subr.bf16.mxu0 %v3969_v19 }
 0x186   :  { %3972 = vmatpush3.bf16.msra.mxu0 %v3969_v19 }
 0x187   :  { %3872 = vmatprep.subr.mxu0 %v7043_v20 }
 0x189   :  { %3870 = vmatmul.mubr.msk.f32.vlgmr.msra.gmra.mrb[4].mxu0 %vm299_vm0, %v5748_v12 }
 0x18a   :  { %3874 = vmatprep.mubr.msk.f32.mxu0 %vm5382_vm1, %v7043_v20 }
 0x24c   :  { %v3849_v21 = vpop.f32.mrb[0].mxu0 }
 0x24d   :  { %v372_v22 = vpop.f32.mrb[1].mxu0  ;;  %v378_v29 = vadd.f32 %v3849_v21, %v3415_v25 }
 0x24e   :  { %v373_v30 = vadd.f32 %v3415_v25, %v372_v22  ;;  %v3430_v22 = vld [vmem:[#allocation10] ss:$0 sm:$0xff] }
 0x254   :  { %v3860_v24 = vpop.f32.mrb[2].mxu0 }
 0x255   :  { %v464_v26 = vadd.f32 %v3860_v24, %v3418_v23  ;;  %v458_v27 = vpop.f32.mrb[3].mxu0 }
 0x256   :  { %v459_v28 = vadd.f32 %v3418_v23, %v458_v27 }
 0x257   :  { %3878 = vmatpush3.xpose.msk.msra.mxu1 %vm299_vm0, %v464_v26 }
 0x258   :  { %3873 = vmatpush3.xpose.msk.msra.mxu0 %vm299_vm0, %v459_v28  ;;  %3887 = vmatprep.subr.mxu1 %v7043_v20 }
 0x259   :  { %3882 = vmatprep.subr.mxu0 %v7043_v20 }
 0x25a   :  { %3880 = vmatmul.mubr.msk.f32.vlgmr.msra.gmra.mrb[0].mxu1 %vm299_vm0, %v378_v29 }
 0x25b   :  { %3875 = vmatmul.mubr.msk.f32.vlgmr.msra.gmra.mrb[6].mxu0 %vm299_vm0, %v373_v30  ;;  %3889 = vmatprep.mubr.msk.f32.mxu1 %vm5382_vm1, %v7043_v20 }
 0x25c   :  { %3884 = vmatprep.mubr.msk.f32.mxu0 %vm5382_vm1, %v7043_v20  ;;  %v3871_v32 = vpop.f32.mrb[4].mxu0 }
 0x25d   :  { %v550_v33 = vadd.f32 %v3871_v32, %v3421_v31  ;;  %v544_v34 = vpop.f32.mrb[5].mxu0 }
 0x25e   :  { %v545_v35 = vadd.f32 %v3421_v31, %v544_v34 }
 0x25f   :  { %3888 = vmatpush3.msra.mxu1 %v550_v33 }
 0x260   :  { %3883 = vmatpush3.msra.mxu0 %v545_v35 }
 0x261   :  { %3974 = vmatprep.subr.bf16.mxu0 %v3973_v6 }
 0x32d   :  { %v701_v45 = vpop.f32.mrb[0].mxu1 }
 0x32e   :  { %v625_v47 = vpop.f32.mrb[6].mxu0  ;;  %v3881_v48 = vpop.f32.mrb[1].mxu1  ;;  %v706_v49 = vmul.f32 0.17677669, %v701_v45  ;;  %v1036_v45 = vld [vmem:[#allocation12 + $0x18] sm:$0xff] }
 0x32f   :  { %v705_v50 = vmul.f32 0.17677669, %v625_v47  ;;  %v3876_v51 = vpop.f32.mrb[7].mxu0 }
 0x330   :  { %v724_v55 = vadd.f32 %v720_v52, %v706_v49 }
 0x331   :  { %v723_v53 = vadd.f32 %v716_v46, %v705_v50  ;;  %v3985_v46 = vpack.c.bf16 %v1036_v45, %v1035_v44 }
 0x332   :  { %v729_v56 = vsel %vm725_vm2, %v724_v55, -inf }
 0x333   :  { %v726_v54 = vsel %vm725_vm2, %v723_v53, -inf }
 0x334   :  { %727 = vmax.xlane.f32.xlu0 %v726_v54  ;;  %v3433_v54 = vld [vmem:[#allocation16] ss:$0 sm:$0xff] }
 0x338   :  { %730 = vmax.xlane.f32.xlu0 %v729_v56 }
 0x3c1   :  { %v728_v57 = vpop.xlane.xlu0 %727 }
 0x3c2   :  { %v732_v58 = vsub.f32 %v723_v53, %v728_v57 }
 0x3c4   :  { %v734_v59 = vmul.f32 1.442695, %v732_v58  ;;  %v3434_v58 = vld [vmem:[#allocation18] ss:$0 sm:$0xff] }
 0x3c5   :  { %v731_v60 = vpop.xlane.xlu0 %730 }
 0x3c6   :  { %4868 = vpow2.f32 %v734_v59  ;;  %v733_v61 = vsub.f32 %v724_v55, %v731_v60 }
 0x3c8   :  { %v736_v62 = vmul.f32 1.442695, %v733_v61 }
 0x3ca   :  { %4870 = vpow2.f32 %v736_v62 }
 0x3d0   :  { %v4869_v63 = vpop.eup %4868 }
 0x3d1   :  { %v738_v0 = vsel %vm725_vm2, %v4869_v63, 0.0 }
 0x3d2   :  { %739 = vadd.xlane.f32.xlu1 %v738_v0  ;;  %v1144_v0 = vld [vmem:[%s7017_s12 + $0x8] sm:$0xff] }
 0x3d4   :  { %v4871_v1 = vpop.eup %4870 }
 0x3d5   :  { %v741_v2 = vsel %vm725_vm2, %v4871_v1, 0.0 }
 0x3d6   :  { %742 = vadd.xlane.f32.xlu1 %v741_v2  ;;  %v1145_v2 = vld [vmem:[%s7017_s12 + $0x10] sm:$0xff] }
 0x3d7   :  { %v3993_v4 = vpack.c.bf16 %v1146_v3, %v1145_v2 }
 0x45f   :  { %v740_v7 = vpop.xlane.xlu1 %739 }
 0x460   :  { %4872 = vrcp.f32 %v740_v7  ;;  %v1148_v7 = vld [vmem:[%s7017_s12 + $0x28] sm:$0xff] }
 0x463   :  { %v743_v8 = vpop.xlane.xlu1 %742 }
 0x464   :  { %4874 = vrcp.f32 %v743_v8 }
 0x46a   :  { %v4873_v9 = vpop.eup %4872 }
 0x46b   :  { %v746_v10 = vmul.f32 %v4873_v9, %v4869_v63  ;;  %v1143_v63 = vld [vmem:[%s7017_s12] sm:$0xff]  ;;  %v1149_v9 = vld [vmem:[%s7017_s12 + $0x30] sm:$0xff] }
 0x46d   :  { %3885 = vmatmul.mubr.msk.f32.vlgmr.msra.gmra.mrb[8].mxu0 %vm725_vm2, %v746_v10  ;;  %v1150_v10 = vld [vmem:[%s7017_s12 + $0x38] sm:$0xff] }
 0x46e   :  { %v4875_v11 = vpop.eup %4874  ;;  %3976 = vmatpush3.bf16.msra.mxu0 %v3973_v6  ;;  %v1147_v6 = vld [vmem:[%s7017_s12 + $0x20] sm:$0xff] }
 0x46f   :  { %v747_v13 = vmul.f32 %v4875_v11, %v4871_v1  ;;  %3978 = vmatprep.subr.bf16.mxu0 %v3977_v16  ;;  %v3989_v1 = vpack.c.bf16 %v1144_v0, %v1143_v63  ;;  %v3997_v8 = vpack.c.bf16 %v1148_v7, %v1147_v6  ;;  %v4001_v11 = vpack.c.bf16 %v1150_v10, %v1149_v9  ;;  %v1294_v6 = vld [vmem:[%s7023_s18 + $0x38] sm:$0xff]  ;;  %v1293_v9 = vld [vmem:[%s7023_s18 + $0x30] sm:$0xff] }
 0x471   :  { %3890 = vmatmul.mubr.msk.f32.vlgmr.msra.gmra.mrb[2].mxu1 %vm725_vm2, %v747_v13  ;;  %v1151_v13 = vld [vmem:[%s7017_s12 + $0x40] sm:$0xff] }
 0x472   :  { %3980 = vmatpush3.bf16.msra.mxu0 %v3977_v16  ;;  %v4005_v16 = vpack.c.bf16 %v1152_v14, %v1151_v13  ;;  %v1306_v13 = vld [vmem:[%s7023_s18 + $0x98] sm:$0xff] }
 0x473   :  { %3990 = vmatprep.subr.bf16.mxu0 %v3989_v1 }
 0x540   :  { %v817_v17 = vpop.f32.mrb[8].mxu0 }
 0x541   :  { %v3886_v18 = vpop.f32.mrb[9].mxu0  ;;  %3900 = vmatprep.mubr.msk.f32.mxu0 %vm299_vm0, %v817_v17  ;;  %v1154_v17 = vld [vmem:[%s7017_s12 + $0x58] sm:$0xff] }
 0x542   :  { %v4009_v18 = vpack.c.bf16 %v1154_v17, %v1153_v15  ;;  %v1299_v15 = vld [vmem:[%s7023_s18 + $0x60] sm:$0xff] }
 0x544   :  { %v890_v19 = vpop.f32.mrb[2].mxu1 }
 0x545   :  { %v3891_v21 = vpop.f32.mrb[3].mxu1  ;;  %3901 = vmatmul.mubr.msk.f32.vlgmr.msra.gmra.mrb[10].mxu0 %vm299_vm0, %v890_v19  ;;  %v1155_v19 = vld [vmem:[%s7017_s12 + $0x60] sm:$0xff] }
 0x546   :  { %3992 = vmatpush3.bf16.msra.mxu0 %v3989_v1  ;;  %v1156_v21 = vld [vmem:[%s7017_s12 + $0x68] sm:$0xff] }
 0x547   :  { %3994 = vmatprep.subr.bf16.mxu0 %v3993_v4 }
 0x54a   :  { %3996 = vmatpush3.bf16.msra.mxu0 %v3993_v4  ;;  %v1288_v4 = vld [vmem:[%s7023_s18 + $0x8] sm:$0xff] }
 0x54b   :  { %3998 = vmatprep.subr.bf16.mxu0 %v3997_v8  ;;  %v4021_v7 = vpack.c.bf16 %v1294_v6, %v1288_v4  ;;  %v1843_v6 = vld [vmem:[#allocation24 + $0x160] sm:$0xff] }
 0x54e   :  { %4000 = vmatpush3.bf16.msra.mxu0 %v3997_v8  ;;  %v1287_v8 = vld [vmem:[%s7023_s18] sm:$0xff] }
 0x54f   :  { %4002 = vmatprep.subr.bf16.mxu0 %v4001_v11  ;;  %v4023_v10 = vpack.c.bf16 %v1293_v9, %v1287_v8  ;;  %v1800_v8 = vld [vmem:[#allocation24 + $0x8] sm:$0xff]  ;;  %v1803_v9 = vld [vmem:[#allocation24 + $0x20] sm:$0xff] }
 0x552   :  { %4004 = vmatpush3.bf16.msra.mxu0 %v4001_v11  ;;  %v1300_v11 = vld [vmem:[%s7023_s18 + $0x68] sm:$0xff] }
 0x553   :  { %4006 = vmatprep.subr.bf16.mxu0 %v4005_v16  ;;  %v4025_v14 = vpack.c.bf16 %v1306_v13, %v1300_v11  ;;  %v5964_v11 = vpack.c.bf16 %v1803_v9, %v1800_v8  ;;  %v1799_v13 = vld [vmem:[#allocation24] sm:$0xff]  ;;  %v1829_v8 = vld [vmem:[#allocation24 + $0xf0] sm:$0xff]  ;;  %v1832_v9 = vld [vmem:[#allocation24 + $0x108] sm:$0xff] }
 0x555   :  { %7157 = vst [vmem:[#allocation47_spill] sm:$0xff] %v5964_v11 }
 0x556   :  { %4008 = vmatpush3.bf16.msra.mxu0 %v4005_v16  ;;  %v1305_v16 = vld [vmem:[%s7023_s18 + $0x90] sm:$0xff] }
 0x557   :  { %4010 = vmatprep.subr.bf16.mxu0 %v4009_v18  ;;  %v4027_v17 = vpack.c.bf16 %v1305_v16, %v1299_v15  ;;  %v1806_v15 = vld [vmem:[#allocation24 + $0x38] sm:$0xff]  ;;  %v1809_v16 = vld [vmem:[#allocation24 + $0x50] sm:$0xff] }
 0x55a   :  { %4012 = vmatpush3.bf16.msra.mxu0 %v4009_v18  ;;  %v1290_v18 = vld [vmem:[%s7023_s18 + $0x18] sm:$0xff] }
 0x618   :  { %v3902_v23 = vpop.f32.mrb[10].mxu0 }
 0x619   :  { %v983_v24 = vadd.f32 %v3902_v23, %v3430_v22  ;;  %v977_v25 = vpop.f32.mrb[11].mxu0  ;;  %v1157_v23 = vld [vmem:[%s7017_s12 + $0x70] sm:$0xff] }
 0x61a   :  { %v978_v26 = vadd.f32 %v3430_v22, %v977_v25  ;;  %v4013_v22 = vpack.c.bf16 %v1156_v21, %v1155_v19  ;;  %v1296_v19 = vld [vmem:[%s7023_s18 + $0x48] sm:$0xff] }
 0x61b   :  { %v987_v27 = vadd.f32 %v983_v24, %v5748_v12  ;;  %v1158_v24 = vld [vmem:[%s7017_s12 + $0x78] sm:$0xff]  ;;  %v4029_v21 = vpack.c.bf16 %v1296_v19, %v1290_v18  ;;  %v5970_v19 = vpack.c.bf16 %v1809_v16, %v1806_v15  ;;  %v1836_v16 = vld [vmem:[#allocation24 + $0x128] sm:$0xff] }
 0x61c   :  { %v986_v28 = vadd.f32 %v978_v26, %v5741_v5  ;;  %v1033_v5 = vld [vmem:[#allocation12] sm:$0xff]  ;;  %4014 = vmatprep.subr.bf16.mxu0 %v4013_v22  ;;  %v4017_v25 = vpack.c.bf16 %v1158_v24, %v1157_v23 }
 0x61d   :  { %v993_v29 = vsel %vm299_vm0, %v987_v27, 0.0  ;;  %v3981_v42 = vpack.c.bf16 %v1034_v41, %v1033_v5  ;;  %4016 = vmatpush3.bf16.msra.mxu0 %v4013_v22  ;;  %v3435_v26 = vld [vmem:[#allocation13] ss:$0 sm:$0xff]  ;;  %v1849_v22 = vld [vmem:[#allocation24 + $0x190] sm:$0xff] }
 0x61e   :  { %994 = vadd.xlane.f32.xlu1 %v993_v29  ;;  %v990_v30 = vsel %vm299_vm0, %v986_v28, 0.0  ;;  %4018 = vmatprep.subr.bf16.mxu0 %v4017_v25  ;;  %v1852_v23 = vld [vmem:[#allocation24 + $0x1a8] sm:$0xff] }
 0x61f   :  { %991 = vadd.xlane.f32.xlu0 %v990_v30  ;;  %3982 = vmatprep.subr.bf16.mxu1 %v3981_v42  ;;  %v5917_v24 = vpack.c.bf16 %v1852_v23, %v1849_v22  ;;  %v1808_v22 = vld [vmem:[#allocation24 + $0x48] sm:$0xff] }
 0x620   :  { %3984 = vmatpush3.bf16.msra.mxu1 %v3981_v42 }
 0x621   :  { %3986 = vmatprep.subr.bf16.mxu1 %v3985_v46  ;;  %4020 = vmatpush3.bf16.msra.mxu0 %v4017_v25  ;;  %7147 = vst [vmem:[#allocation37_spill] sm:$0xff] %v5917_v24  ;;  %v1801_v25 = vld [vmem:[#allocation24 + $0x10] sm:$0xff] }
 0x622   :  { %4110 = vmatprep.subr.bf16.mxu0 %v5917_v24 }
 0x624   :  { %3988 = vmatpush3.bf16.msra.mxu1 %v3985_v46 }
 0x625   :  { %4022 = vmatprep.subr.bf16.mxu1 %v4021_v7  ;;  %v1846_v7 = vld [vmem:[#allocation24 + $0x178] sm:$0xff] }
 0x6ab   :  { %v995_v31 = vpop.xlane.xlu1 %994 }
 0x6ac   :  { %v998_v32 = vmul.f32 0.03125, %v995_v31  ;;  %v992_v33 = vpop.xlane.xlu0 %991 }
 0x6ad   :  { %v997_v34 = vmul.f32 0.03125, %v992_v33 }
 0x6ae   :  { %v1000_v35 = vsub.f32 %v987_v27, %v998_v32 }
 0x6af   :  { %v999_v36 = vsub.f32 %v986_v28, %v997_v34 }
 0x6b0   :  { %v1002_v37 = vmul.f32 %v1000_v35, %v1000_v35 }
 0x6b1   :  { %v1001_v38 = vmul.f32 %v999_v36, %v999_v36 }
 0x6b2   :  { %v1006_v39 = vsel %vm299_vm0, %v1002_v37, 0.0 }
 0x6b3   :  { %1007 = vadd.xlane.f32.xlu1 %v1006_v39  ;;  %v1003_v12 = vsel %vm299_vm0, %v1001_v38, 0.0 }
 0x6b4   :  { %1004 = vadd.xlane.f32.xlu0 %v1003_v12 }
 0x740   :  { %v1008_v47 = vpop.xlane.xlu1 %1007 }
 0x741   :  { %v1010_v48 = vmul.f32 0.03125, %v1008_v47  ;;  %v1005_v49 = vpop.xlane.xlu0 %1004 }
 0x742   :  { %v1009_v50 = vmul.f32 0.03125, %v1005_v49  ;;  %v3438_v49 = vld [vmem:[#allocation15] ss:$0 sm:$0xff] }
 0x743   :  { %v1012_v51 = vadd.f32 1e-05, %v1010_v48 }
 0x744   :  { %v1011_v52 = vadd.f32 1e-05, %v1009_v50 }
 0x745   :  { %4876 = vrsqrt.f32 %v1012_v51 }
 0x746   :  { %4878 = vrsqrt.f32 %v1011_v52 }
 0x74f   :  { %v4877_v53 = vpop.eup %4876 }
 0x750   :  { %v4879_v55 = vpop.eup %4878  ;;  %v1016_v56 = vmul.f32 %v4877_v53, %v1000_v35 }
 0x751   :  { %v1015_v57 = vmul.f32 %v4879_v55, %v999_v36 }
 0x752   :  { %v1024_v59 = vmul.f32 %v3433_v54, %v1016_v56 }
 0x753   :  { %v1023_v60 = vmul.f32 %v3433_v54, %v1015_v57 }
 0x754   :  { %v5817_v62 = vadd.f32 %v3434_v58, %v1024_v59 }
 0x755   :  { %v5815_v61 = vadd.f32 %v3434_v58, %v1023_v60 }
 0x757   :  { %3911 = vmatprep.mubr.msk.f32.mxu1 %vm299_vm0, %v5815_v61 }
 0x758   :  { %3912 = vmatmul.mubr.msk.f32.vlgmr.msra.gmra.mrb[4].mxu1 %vm299_vm0, %v5817_v62 }
 0x759   :  { %1413 = vmatprep.mubr.f32.mxu1 %v7043_v20  ;;  %4024 = vmatpush1.bf16.msra.mxu1 %v4023_v10  ;;  %v5961_v10 = vpack.c.bf16 %v1846_v7, %v1843_v6  ;;  %v1289_v6 = vld [vmem:[%s7023_s18 + $0x10] sm:$0xff] }
 0x75a   :  { %4026 = vmatprep.subr.bf16.mxu1 %v4025_v14  ;;  %v1802_v14 = vld [vmem:[#allocation24 + $0x18] sm:$0xff] }
 0x75b   :  { %7156 = vst [vmem:[#allocation46_spill] sm:$0xff] %v5961_v10 }
 0x75d   :  { %4028 = vmatpush1.bf16.msra.mxu1 %v4027_v17  ;;  %v5968_v17 = vpack.c.bf16 %v1802_v14, %v1799_v13  ;;  %v1295_v14 = vld [vmem:[%s7023_s18 + $0x40] sm:$0xff] }
 0x75e   :  { %4030 = vmatprep.subr.bf16.mxu1 %v4029_v21  ;;  %v1805_v21 = vld [vmem:[#allocation24 + $0x30] sm:$0xff] }
 0x82b   :  { %v3913_v27 = vpop.f32.mrb[4].mxu1 }
 0x82c   :  { %v1122_v28 = vadd.f32 %v3913_v27, %v3435_v26  ;;  %v1116_v29 = vpop.f32.mrb[5].mxu1 }
 0x82d   :  { %v1117_v30 = vadd.f32 %v3435_v26, %v1116_v29  ;;  %v1804_v26 = vld [vmem:[#allocation24 + $0x28] sm:$0xff]  ;;  %v1858_v29 = vld [vmem:[#allocation24 + $0x1d8] sm:$0xff] }
 0x82e   :  { %v1126_v31 = vmul.f32 %v1122_v28, %v1122_v28  ;;  %v5919_v27 = vpack.c.bf16 %v1804_v26, %v1801_v25  ;;  %v1812_v26 = vld [vmem:[#allocation24 + $0x68] sm:$0xff] }
 0x82f   :  { %v1125_v32 = vmul.f32 %v1117_v30, %v1117_v30 }
 0x830   :  { %v1128_v33 = vmul.f32 %v1126_v31, %v1122_v28  ;;  %v1807_v31 = vld [vmem:[#allocation24 + $0x40] sm:$0xff] }
 0x831   :  { %v1127_v34 = vmul.f32 %v1125_v32, %v1117_v30  ;;  %v1810_v32 = vld [vmem:[#allocation24 + $0x58] sm:$0xff] }
 0x832   :  { %v1130_v35 = vmul.f32 0.044715, %v1128_v33  ;;  %v5925_v33 = vpack.c.bf16 %v1810_v32, %v1807_v31  ;;  %v5975_v32 = vpack.c.bf16 %v1808_v22, %v1805_v21  ;;  %v3440_v21 = vld [vmem:[#allocation21] ss:$0 sm:$0xff]  ;;  %v1302_v22 = vld [vmem:[%s7023_s18 + $0x78] sm:$0xff] }
 0x833   :  { %v1129_v36 = vmul.f32 0.044715, %v1127_v34  ;;  %v1861_v34 = vld [vmem:[#allocation24 + $0x1f0] sm:$0xff] }
 0x834   :  { %v1132_v37 = vadd.f32 %v1130_v35, %v1122_v28  ;;  %v1864_v35 = vld [vmem:[#allocation24 + $0x208] sm:$0xff] }
 0x835   :  { %v1131_v38 = vadd.f32 %v1129_v36, %v1117_v30  ;;  %v5929_v36 = vpack.c.bf16 %v1864_v35, %v1861_v34 }
 0x836   :  { %v1134_v39 = vmul.f32 0.7978846, %v1132_v37  ;;  %v1813_v37 = vld [vmem:[#allocation24 + $0x70] sm:$0xff] }
 0x837   :  { %v1133_v12 = vmul.f32 0.7978846, %v1131_v38  ;;  %v1816_v38 = vld [vmem:[#allocation24 + $0x88] sm:$0xff] }
 0x838   :  { %4880 = vtanh.f32 %v1134_v39  ;;  %v5931_v39 = vpack.c.bf16 %v1816_v38, %v1813_v37  ;;  %v1811_v37 = vld [vmem:[#allocation24 + $0x60] sm:$0xff]  ;;  %v1814_v38 = vld [vmem:[#allocation24 + $0x78] sm:$0xff] }
 0x839   :  { %4882 = vtanh.f32 %v1133_v12  ;;  %v1867_v12 = vld [vmem:[#allocation24 + $0x220] sm:$0xff] }
 0x842   :  { %v4881_v5 = vpop.eup %4880 }
 0x843   :  { %v4883_v41 = vpop.eup %4882  ;;  %v1138_v42 = vadd.f32 1.0, %v4881_v5  ;;  %v1870_v5 = vld [vmem:[#allocation24 + $0x238] sm:$0xff] }
 0x844   :  { %v1137_v44 = vadd.f32 1.0, %v4883_v41  ;;  %v1819_v41 = vld [vmem:[#allocation24 + $0xa0] sm:$0xff] }
 0x845   :  { %v1140_v45 = vmul.f32 0.5, %v1138_v42  ;;  %v5934_v42 = vpack.c.bf16 %v1870_v5, %v1867_v12  ;;  %v1818_v12 = vld [vmem:[#allocation24 + $0x98] sm:$0xff]  ;;  %v1821_v5 = vld [vmem:[#allocation24 + $0xb0] sm:$0xff] }
 0x846   :  { %v1139_v46 = vmul.f32 0.5, %v1137_v44  ;;  %v1822_v44 = vld [vmem:[#allocation24 + $0xb8] sm:$0xff] }
 0x847   :  { %v1142_v48 = vmul.f32 %v1140_v45, %v1122_v28  ;;  %v1855_v28 = vld [vmem:[#allocation24 + $0x1c0] sm:$0xff]  ;;  %v1873_v45 = vld [vmem:[#allocation24 + $0x250] sm:$0xff] }
 0x848   :  { %v1141_v47 = vmul.f32 %v1139_v46, %v1117_v30  ;;  %v5923_v30 = vpack.c.bf16 %v1858_v29, %v1855_v28  ;;  %v1876_v46 = vld [vmem:[#allocation24 + $0x268] sm:$0xff]  ;;  %v1815_v28 = vld [vmem:[#allocation24 + $0x80] sm:$0xff] }
 0x849   :  { %v5977_v35 = vpack.c.bf16 %v1815_v28, %v1812_v26  ;;  %v4031_v26 = vpack.c.bf16 %v1295_v14, %v1289_v6  ;;  %v1297_v6 = vld [vmem:[%s7023_s18 + $0x50] sm:$0xff]  ;;  %v1310_v14 = vld [vmem:[%s7023_s18 + $0xb8] sm:$0xff] }
 0x84a   :  { %3946 = vmatprep.mubr.f32.mxu0 %v1141_v47  ;;  %v5937_v47 = vpack.c.bf16 %v1822_v44, %v1819_v41  ;;  %v5981_v41 = vpack.c.bf16 %v1814_v38, %v1811_v37  ;;  %v5983_v44 = vpack.c.bf16 %v1821_v5, %v1818_v12  ;;  %v1307_v12 = vld [vmem:[%s7023_s18 + $0xa0] sm:$0xff]  ;;  %v1842_v5 = vld [vmem:[#allocation24 + $0x158] sm:$0xff] }
 0x84b   :  { %3947 = vmatmul.mubr.f32.vlgmr.msra.gmra.mrb[12].mxu0 %v1142_v48  ;;  %v5940_v48 = vpack.c.bf16 %v1876_v46, %v1873_v45  ;;  %v1817_v45 = vld [vmem:[#allocation24 + $0x90] sm:$0xff]  ;;  %v1820_v46 = vld [vmem:[#allocation24 + $0xa8] sm:$0xff] }
 0x84c   :  { %2073 = vmatprep.mubr.f32.mxu0 %v7043_v20  ;;  %4112 = vmatpush3.bf16.msra.mxu0 %v5919_v27  ;;  %7148 = vst [vmem:[#allocation38_spill] sm:$0xff] %v5937_v47 }
 0x84d   :  { %4114 = vmatprep.subr.bf16.mxu0 %v5923_v30  ;;  %7149 = vst [vmem:[#allocation39_spill] sm:$0xff] %v5940_v48 }
 0x850   :  { %4116 = vmatpush3.bf16.msra.mxu0 %v5925_v33 }
 0x851   :  { %4118 = vmatprep.subr.bf16.mxu0 %v5929_v36 }
 0x854   :  { %4120 = vmatpush3.bf16.msra.mxu0 %v5931_v39 }
 0x855   :  { %4122 = vmatprep.subr.bf16.mxu0 %v5934_v42 }
 0x858   :  { %4124 = vmatpush3.bf16.msra.mxu0 %v5937_v47 }
 0x859   :  { %4126 = vmatprep.subr.bf16.mxu0 %v5940_v48 }
 0x91e   :  { %v3948_v50 = vpop.f32.mrb[12].mxu0 }
 0x91f   :  { %v1238_v51 = vadd.f32 %v3948_v50, %v3438_v49  ;;  %v1232_v52 = vpop.f32.mrb[13].mxu0  ;;  %v1828_v50 = vld [vmem:[#allocation24 + $0xe8] sm:$0xff] }
 0x920   :  { %v1233_v53 = vadd.f32 %v3438_v49, %v1232_v52  ;;  %v1825_v49 = vld [vmem:[#allocation24 + $0xd0] sm:$0xff]  ;;  %v1882_v52 = vld [vmem:[#allocation24 + $0x298] sm:$0xff] }
 0x921   :  { %v1242_v54 = vadd.f32 %v1238_v51, %v5817_v62  ;;  %v1879_v51 = vld [vmem:[#allocation24 + $0x280] sm:$0xff] }
 0x922   :  { %v1241_v55 = vadd.f32 %v1233_v53, %v5815_v61  ;;  %v5943_v53 = vpack.c.bf16 %v1828_v50, %v1825_v49  ;;  %v1824_v49 = vld [vmem:[#allocation24 + $0xc8] sm:$0xff]  ;;  %v1827_v50 = vld [vmem:[#allocation24 + $0xe0] sm:$0xff] }
 0x923   :  { %v1248_v56 = vsel %vm299_vm0, %v1242_v54, 0.0 }
 0x924   :  { %1249 = vadd.xlane.f32.xlu1 %v1248_v56  ;;  %v1245_v57 = vsel %vm299_vm0, %v1241_v55, 0.0  ;;  %7150 = vst [vmem:[#allocation40_spill] sm:$0xff] %v5943_v53  ;;  %v1834_v56 = vld [vmem:[#allocation24 + $0x118] sm:$0xff]  ;;  %4128 = vmatpush3.bf16.msra.mxu0 %v5943_v53 }
 0x925   :  { %1246 = vadd.xlane.f32.xlu0 %v1245_v57  ;;  %v1885_v57 = vld [vmem:[#allocation24 + $0x2b0] sm:$0xff] }
 0x9b1   :  { %v1250_v58 = vpop.xlane.xlu1 %1249 }
 0x9b2   :  { %v1252_v59 = vmul.f32 0.03125, %v1250_v58  ;;  %v1247_v60 = vpop.xlane.xlu0 %1246  ;;  %v1888_v58 = vld [vmem:[#allocation24 + $0x2c8] sm:$0xff] }
 0x9b3   :  { %v1251_v63 = vmul.f32 0.03125, %v1247_v60  ;;  %v5952_v60 = vpack.c.bf16 %v1888_v58, %v1885_v57  ;;  %v1830_v57 = vld [vmem:[#allocation24 + $0xf8] sm:$0xff]  ;;  %v1833_v58 = vld [vmem:[#allocation24 + $0x110] sm:$0xff] }
 0x9b4   :  { %v5877_v0 = vsub.f32 %v1242_v54, %v1252_v59  ;;  %v5946_v54 = vpack.c.bf16 %v1882_v52, %v1879_v51  ;;  %v5987_v51 = vpack.c.bf16 %v1820_v46, %v1817_v45  ;;  %v5989_v52 = vpack.c.bf16 %v1827_v50, %v1824_v49  ;;  %v1845_v45 = vld [vmem:[#allocation24 + $0x170] sm:$0xff]  ;;  %v1298_v49 = vld [vmem:[%s7023_s18 + $0x58] sm:$0xff] }
 0x9b5   :  { %v5879_v1 = vsub.f32 %v1241_v55, %v1251_v63  ;;  %v1831_v55 = vld [vmem:[#allocation24 + $0x100] sm:$0xff]  ;;  %7153 = vst [vmem:[#allocation43_spill] sm:$0xff] %v5952_v60  ;;  %v1837_v63 = vld [vmem:[#allocation24 + $0x130] sm:$0xff]  ;;  %v5998_v7 = vpack.c.bf16 %v1833_v58, %v1830_v57  ;;  %v6041_v57 = vpack.c.bf16 %v1845_v45, %v1842_v5  ;;  %v1856_v5 = vld [vmem:[#allocation24 + $0x1c8] sm:$0xff] }
 0x9b6   :  { %v1256_v2 = vmul.f32 %v5877_v0, %v5877_v0  ;;  %7151 = vst [vmem:[#allocation41_spill] sm:$0xff] %v5946_v54  ;;  %v5949_v59 = vpack.c.bf16 %v1834_v56, %v1831_v55  ;;  %4130 = vmatprep.subr.bf16.mxu0 %v5946_v54  ;;  %7158 = vst [vmem:[#allocation48_spill] sm:$0xff] %v5987_v51  ;;  %v1823_v55 = vld [vmem:[#allocation24 + $0xc0] sm:$0xff]  ;;  %v1826_v56 = vld [vmem:[#allocation24 + $0xd8] sm:$0xff] }
 0x9b7   :  { %v1255_v61 = vmul.f32 %v5879_v1, %v5879_v1  ;;  %7159 = vst [vmem:[#allocation49_spill] sm:$0xff] %v5989_v52  ;;  %7161 = vst [vmem:[#allocation51_spill] sm:$0xff] %v5998_v7  ;;  %v1292_v46 = vld [vmem:[%s7023_s18 + $0x28] sm:$0xff] }
 0x9b8   :  { %v1260_v62 = vsel %vm299_vm0, %v1256_v2, 0.0  ;;  %7152 = vst [vmem:[#allocation42_spill] sm:$0xff] %v5949_v59  ;;  %v1840_v2 = vld [vmem:[#allocation24 + $0x148] sm:$0xff]  ;;  %4132 = vmatpush3.bf16.msra.mxu0 %v5949_v59  ;;  %7165 = vst [vmem:[#allocation55_spill] sm:$0xff] %v6041_v57  ;;  %v1841_v58 = vld [vmem:[#allocation24 + $0x150] sm:$0xff] }
 0x9b9   :  { %1261 = vadd.xlane.f32.xlu1 %v1260_v62  ;;  %v1257_v3 = vsel %vm299_vm0, %v1255_v61, 0.0  ;;  %v1891_v61 = vld [vmem:[#allocation24 + $0x2e0] sm:$0xff]  ;;  %v1894_v62 = vld [vmem:[#allocation24 + $0x2f8] sm:$0xff]  ;;  %4134 = vmatprep.subr.bf16.mxu0 %v5952_v60  ;;  %v1860_v45 = vld [vmem:[#allocation24 + $0x1e8] sm:$0xff] }
 0x9ba   :  { %1258 = vadd.xlane.f32.xlu0 %v1257_v3  ;;  %v5955_v3 = vpack.c.bf16 %v1840_v2, %v1837_v63  ;;  %v5958_v4 = vpack.c.bf16 %v1894_v62, %v1891_v61  ;;  %v3439_v2 = vld [vmem:[#allocation19] ss:$0 sm:$0xff]  ;;  %v5993_v61 = vpack.c.bf16 %v1826_v56, %v1823_v55  ;;  %v1291_v56 = vld [vmem:[%s7023_s18 + $0x20] sm:$0xff] }
 0x9bc   :  { %7154 = vst [vmem:[#allocation44_spill] sm:$0xff] %v5955_v3  ;;  %7155 = vst [vmem:[#allocation45_spill] sm:$0xff] %v5958_v4  ;;  %4136 = vmatpush3.bf16.msra.mxu0 %v5955_v3 }
 0x9bd   :  { %4138 = vmatprep.subr.bf16.mxu0 %v5958_v4  ;;  %7160 = vst [vmem:[#allocation50_spill] sm:$0xff] %v5993_v61 }
 0x9c0   :  { %4140 = vmatpush3.bf16.msra.mxu0 %v5961_v10 }
 0x9c1   :  { %4142 = vmatprep.subr.bf16.mxu0 %v5964_v11 }
 0x9c3   :  { %2074 = vmatmul.mubr.f32.vlgmr.msra.gmra.mrb[14].mxu0 %v7043_v20 }
 0x9c4   :  { %4144 = vmatpush1.bf16.msra.mxu0 %v5968_v17 }
 0x9c5   :  { %4146 = vmatprep.subr.bf16.mxu0 %v5970_v19 }
 0x9c8   :  { %4148 = vmatpush1.bf16.msra.mxu0 %v5975_v32 }
 0x9c9   :  { %4150 = vmatprep.subr.bf16.mxu0 %v5977_v35 }
 0x9cc   :  { %4152 = vmatpush1.bf16.msra.mxu0 %v5981_v41 }
 0x9cd   :  { %4154 = vmatprep.subr.bf16.mxu0 %v5983_v44 }
 0x9d0   :  { %4156 = vmatpush1.bf16.msra.mxu0 %v5987_v51 }
 0x9d1   :  { %4158 = vmatprep.subr.bf16.mxu0 %v5989_v52 }
 0x9d4   :  { %4160 = vmatpush1.bf16.msra.mxu0 %v5993_v61 }
 0x9d5   :  { %4162 = vmatprep.subr.bf16.mxu0 %v5998_v7 }
 0xa46   :  { %v1262_v18 = vpop.xlane.xlu1 %1261 }
 0xa47   :  { %v1264_v23 = vmul.f32 0.03125, %v1262_v18  ;;  %v1259_v25 = vpop.xlane.xlu0 %1258  ;;  %v1839_v18 = vld [vmem:[#allocation24 + $0x140] sm:$0xff] }
 0xa48   :  { %v1263_v29 = vmul.f32 0.03125, %v1259_v25  ;;  %v6013_v25 = vpack.c.bf16 %v1832_v9, %v1829_v8  ;;  %v6018_v28 = vpack.c.bf16 %v1839_v18, %v1836_v16  ;;  %v1848_v8 = vld [vmem:[#allocation24 + $0x188] sm:$0xff]  ;;  %v1851_v9 = vld [vmem:[#allocation24 + $0x1a0] sm:$0xff]  ;;  %v4039_v16 = vpack.c.bf16 %v1297_v6, %v1291_v56 }
 0xa49   :  { %v1266_v31 = vadd.f32 1e-05, %v1264_v23  ;;  %v1308_v23 = vld [vmem:[%s7023_s18 + $0xa8] sm:$0xff]  ;;  %v1303_v18 = vld [vmem:[%s7023_s18 + $0x80] sm:$0xff] }
 0xa4a   :  { %v1265_v34 = vadd.f32 1e-05, %v1263_v29  ;;  %7162 = vst [vmem:[#allocation52_spill] sm:$0xff] %v6013_v25  ;;  %7163 = vst [vmem:[#allocation53_spill] sm:$0xff] %v6018_v28  ;;  %v1835_v29 = vld [vmem:[#allocation24 + $0x120] sm:$0xff]  ;;  %v4033_v37 = vpack.c.bf16 %v1308_v23, %v1302_v22  ;;  %4164 = vmatpush1.bf16.msra.mxu0 %v6013_v25  ;;  %v1850_v23 = vld [vmem:[#allocation24 + $0x198] sm:$0xff] }
 0xa4b   :  { %4884 = vrsqrt.f32 %v1266_v31  ;;  %v1838_v31 = vld [vmem:[#allocation24 + $0x138] sm:$0xff]  ;;  %4166 = vmatprep.subr.bf16.mxu0 %v6018_v28  ;;  %v1847_v22 = vld [vmem:[#allocation24 + $0x180] sm:$0xff] }
 0xa4c   :  { %4886 = vrsqrt.f32 %v1265_v34  ;;  %v6035_v50 = vpack.c.bf16 %v1838_v31, %v1835_v29  ;;  %v1857_v29 = vld [vmem:[#allocation24 + $0x1d0] sm:$0xff]  ;;  %v6070_v31 = vpack.c.bf16 %v1850_v23, %v1847_v22  ;;  %v1859_v56 = vld [vmem:[#allocation24 + $0x1e0] sm:$0xff]  ;;  %v1874_v23 = vld [vmem:[#allocation24 + $0x258] sm:$0xff] }
 0xa4d   :  { %v1871_v22 = vld [vmem:[#allocation24 + $0x240] sm:$0xff] }
 0xa4e   :  { %7164 = vst [vmem:[#allocation54_spill] sm:$0xff] %v6035_v50  ;;  %4168 = vmatpush1.bf16.msra.mxu0 %v6035_v50  ;;  %7168 = vst [vmem:[#allocation58_spill] sm:$0xff] %v6070_v31 }
 0xa4f   :  { %4170 = vmatprep.subr.bf16.mxu0 %v6041_v57 }
 0xa55   :  { %v4885_v63 = vpop.eup %4884 }
 0xa56   :  { %v4887_v62 = vpop.eup %4886  ;;  %v1270_v15 = vmul.f32 %v4885_v63, %v5877_v0  ;;  %v1301_v0 = vld [vmem:[%s7023_s18 + $0x70] sm:$0xff]  ;;  %v1844_v63 = vld [vmem:[#allocation24 + $0x168] sm:$0xff] }
 0xa57   :  { %v1269_v13 = vmul.f32 %v4887_v62, %v5879_v1  ;;  %v4035_v55 = vpack.c.bf16 %v1307_v12, %v1301_v0  ;;  %v4037_v62 = vpack.c.bf16 %v1298_v49, %v1292_v46  ;;  %v1854_v0 = vld [vmem:[#allocation24 + $0x1b8] sm:$0xff]  ;;  %v1853_v12 = vld [vmem:[#allocation24 + $0x1b0] sm:$0xff]  ;;  %v1863_v46 = vld [vmem:[#allocation24 + $0x200] sm:$0xff] }
 0xa58   :  { %v1278_v38 = vmul.f32 %v3439_v2, %v1270_v15  ;;  %v6055_v15 = vpack.c.bf16 %v1844_v63, %v1841_v58  ;;  %v6078_v49 = vpack.c.bf16 %v1856_v5, %v1853_v12  ;;  %v1862_v58 = vld [vmem:[#allocation24 + $0x1f8] sm:$0xff]  ;;  %v1884_v12 = vld [vmem:[#allocation24 + $0x2a8] sm:$0xff]  ;;  %v1887_v5 = vld [vmem:[#allocation24 + $0x2c0] sm:$0xff] }
 0xa59   :  { %v1277_v1 = vmul.f32 %v3439_v2, %v1269_v13  ;;  %v1304_v13 = vld [vmem:[%s7023_s18 + $0x88] sm:$0xff]  ;;  %v1866_v63 = vld [vmem:[#allocation24 + $0x218] sm:$0xff]  ;;  %v6088_v6 = vpack.c.bf16 %v1862_v58, %v1859_v56  ;;  %v1883_v56 = vld [vmem:[#allocation24 + $0x2a0] sm:$0xff] }
 0xa5a   :  { %v1286_v2 = vadd.f32 %v3440_v21, %v1278_v38  ;;  %7166 = vst [vmem:[#allocation56_spill] sm:$0xff] %v6055_v15  ;;  %4172 = vmatpush1.bf16.msra.mxu0 %v6055_v15  ;;  %v6073_v38 = vpack.c.bf16 %v1857_v29, %v1854_v0  ;;  %7170 = vst [vmem:[#allocation60_spill] sm:$0xff] %v6078_v49  ;;  %v6107_v0 = vpack.c.bf16 %v1874_v23, %v1871_v22  ;;  %v1877_v29 = vld [vmem:[#allocation24 + $0x270] sm:$0xff]  ;;  %v1886_v58 = vld [vmem:[#allocation24 + $0x2b8] sm:$0xff] }
 0xa5b   :  { %v6020_v34 = vadd.f32 %v3440_v21, %v1277_v1  ;;  %v6061_v21 = vpack.c.bf16 %v1851_v9, %v1848_v8  ;;  %v4041_v1 = vpack.c.bf16 %v1310_v14, %v1304_v13  ;;  %7172 = vst [vmem:[#allocation62_spill] sm:$0xff] %v6088_v6  ;;  %v1865_v9 = vld [vmem:[#allocation24 + $0x210] sm:$0xff]  ;;  %v1868_v13 = vld [vmem:[#allocation24 + $0x228] sm:$0xff] }
 0xa5c   :  { %7169 = vst [vmem:[#allocation59_spill] sm:$0xff] %v6073_v38  ;;  %v1872_v14 = vld [vmem:[#allocation24 + $0x248] sm:$0xff]  ;;  %7176 = vst [vmem:[#allocation66_spill] sm:$0xff] %v6107_v0 }
 0xa5d   :  { %3441 = vmatmul.mubr.msk.f32.vlgmr.msra.gmra.mrb[6].mxu1 %vm299_vm0, %v6020_v34  ;;  %7167 = vst [vmem:[#allocation57_spill] sm:$0xff] %v6061_v21  ;;  %4174 = vmatprep.subr.bf16.mxu0 %v6061_v21 }
 0xa5e   :  { %4032 = vmatpush1.bf16.msra.mxu1 %v4031_v26  ;;  %1419 = vmatprep.mubr.f32.mxu1 %v7043_v20  ;;  %v1309_v26 = vld [vmem:[%s7023_s18 + $0xb0] sm:$0xff] }
 0xa5f   :  { %4034 = vmatprep.subr.bf16.mxu1 %v4033_v37  ;;  %v4043_v37 = vpack.c.bf16 %v1309_v26, %v1303_v18  ;;  %4176 = vmatpush1.bf16.msra.mxu0 %v6070_v31  ;;  %v1881_v26 = vld [vmem:[#allocation24 + $0x290] sm:$0xff] }
 0xa60   :  { %4178 = vmatprep.subr.bf16.mxu0 %v6073_v38 }
 0xa61   :  { %3442 = vmatmul.mubr.msk.f32.gmra.mrb[8].mxu1 %vm299_vm0, %v1286_v2 }
 0xa62   :  { %4036 = vmatpush1.bf16.msra.mxu1 %v4035_v55  ;;  %1490 = vmatprep.mubr.f32.mxu1 %v7043_v20  ;;  %v6081_v55 = vpack.c.bf16 %v1863_v46, %v1860_v45  ;;  %v6118_v46 = vpack.c.bf16 %v1887_v5, %v1884_v12 }
 0xa63   :  { %4038 = vmatprep.subr.bf16.mxu1 %v4037_v62  ;;  %v1869_v62 = vld [vmem:[#allocation24 + $0x230] sm:$0xff]  ;;  %4180 = vmatpush1.bf16.msra.mxu0 %v6078_v49 }
 0xa64   :  { %7171 = vst [vmem:[#allocation61_spill] sm:$0xff] %v6081_v55  ;;  %4182 = vmatprep.subr.bf16.mxu0 %v6081_v55  ;;  %v6092_v8 = vpack.c.bf16 %v1869_v62, %v1866_v63  ;;  %7179 = vst [vmem:[#allocation69_spill] sm:$0xff] %v6118_v46  ;;  %v1890_v63 = vld [vmem:[#allocation24 + $0x2d8] sm:$0xff]  ;;  %v1893_v62 = vld [vmem:[#allocation24 + $0x2f0] sm:$0xff] }
 0xa65   :  { %3443 = vmatmul.mubr.msk.f32.vlgmr.msra.gmra.mrb[10].mxu1 %vm299_vm0, %v6020_v34 }
 0xa66   :  { %4040 = vmatpush1.bf16.msra.mxu1 %v4039_v16  ;;  %1496 = vmatprep.mubr.f32.mxu1 %v7043_v20  ;;  %7173 = vst [vmem:[#allocation63_spill] sm:$0xff] %v6092_v8  ;;  %v1875_v16 = vld [vmem:[#allocation24 + $0x260] sm:$0xff] }
 0xa67   :  { %4042 = vmatprep.subr.bf16.mxu1 %v4041_v1  ;;  %4184 = vmatpush1.bf16.msra.mxu0 %v6088_v6  ;;  %v6101_v18 = vpack.c.bf16 %v1875_v16, %v1872_v14  ;;  %v1878_v1 = vld [vmem:[#allocation24 + $0x278] sm:$0xff]  ;;  %v1889_v14 = vld [vmem:[#allocation24 + $0x2d0] sm:$0xff]  ;;  %v1892_v16 = vld [vmem:[#allocation24 + $0x2e8] sm:$0xff] }
 0xa68   :  { %4186 = vmatprep.subr.bf16.mxu0 %v6092_v8  ;;  %v6131_v22 = vpack.c.bf16 %v1892_v16, %v1889_v14 }
 0xa69   :  { %3444 = vmatmul.mubr.msk.f32.gmra.mrb[12].mxu1 %vm299_vm0, %v1286_v2  ;;  %7175 = vst [vmem:[#allocation65_spill] sm:$0xff] %v6101_v18 }
 0xa6a   :  { %4044 = vmatpush1.bf16.msra.mxu1 %v4043_v37  ;;  %1567 = vmatprep.mubr.f32.mxu1 %v7043_v20  ;;  %v1880_v37 = vld [vmem:[#allocation24 + $0x288] sm:$0xff]  ;;  %7182 = vst [vmem:[#allocation72_spill] sm:$0xff] %v6131_v22 }
 0xa6b   :  { %4046 = vmatprep.subr.bf16.mxu1 %v5964_v11  ;;  %v6115_v45 = vpack.c.bf16 %v1880_v37, %v1877_v29  ;;  %v1311_v29 = vld [vmem:[#allocation22] sm:$0x3f]  ;;  %v6177_v37 = vsub.s32 1, %v5794_v40 }
 0xa6c   :  { %v1316_v12 = vrot.slane %v1311_v29, %v5797_v43 }
 0xa6d   :  { %3445 = vmatmul.mubr.msk.f32.vlgmr.msra.gmra.mrb[14].mxu1 %vm299_vm0, %v6020_v34  ;;  %v6098_v34 = vpack.c.bf16 %v1868_v13, %v1865_v9  ;;  %7178 = vst [vmem:[#allocation68_spill] sm:$0xff] %v6115_v45  ;;  %v6123_v9 = vpack.c.bf16 %v1886_v58, %v1883_v56  ;;  %v6126_v13 = vpack.c.bf16 %v1893_v62, %v1890_v63  ;;  %v6182_v56 = vsub.s32 2, %v5794_v40 }
 0xa6e   :  { %4048 = vmatpush1.bf16.msra.mxu1 %v5968_v17  ;;  %1573 = vmatprep.mubr.f32.mxu1 %v7043_v20  ;;  %v1320_v5 = vrot.slane %v1311_v29, %v6177_v37  ;;  %v1327_v58 = vsub.s32 3, %v5794_v40  ;;  %v1331_v63 = vsub.s32 4, %v5794_v40  ;;  %v1335_v62 = vsub.s32 5, %v5794_v40  ;;  %v7216_v40 = vld [vmem:[#allocation48_spill] sm:$0xff] }
 0xa6f   :  { %4050 = vmatprep.subr.bf16.mxu1 %v5970_v19  ;;  %7174 = vst [vmem:[#allocation64_spill] sm:$0xff] %v6098_v34  ;;  %4188 = vmatpush1.bf16.msra.mxu0 %v6098_v34  ;;  %7180 = vst [vmem:[#allocation70_spill] sm:$0xff] %v6123_v9 }
 0xa70   :  { %4190 = vmatprep.subr.bf16.mxu0 %v6101_v18  ;;  %7181 = vst [vmem:[#allocation71_spill] sm:$0xff] %v6126_v13 }
 0xa71   :  { %3446 = vmatmul.mubr.msk.f32.gmra.mrb[16].mxu1 %vm299_vm0, %v1286_v2  ;;  %v6110_v2 = vpack.c.bf16 %v1881_v26, %v1878_v1 }
 0xa72   :  { %4052 = vmatpush1.bf16.msra.mxu1 %v5975_v32  ;;  %2002 = vmatprep.mubr.f32.mxu1 %v7043_v20 }
 0xa73   :  { %4054 = vmatprep.subr.bf16.mxu1 %v5977_v35  ;;  %7177 = vst [vmem:[#allocation67_spill] sm:$0xff] %v6110_v2  ;;  %4192 = vmatpush1.bf16.msra.mxu0 %v6107_v0 }
 0xa74   :  { %4194 = vmatprep.subr.bf16.mxu0 %v6110_v2 }
 0xa76   :  { %4056 = vmatpush1.bf16.msra.mxu1 %v5981_v41 }
 0xa77   :  { %4058 = vmatprep.subr.bf16.mxu1 %v5983_v44  ;;  %4196 = vmatpush1.bf16.msra.mxu0 %v6115_v45 }
 0xa78   :  { %4198 = vmatprep.subr.bf16.mxu0 %v6118_v46 }
 0xa7a   :  { %4060 = vmatpush1.bf16.msra.mxu1 %v5987_v51 }
 0xa7b   :  { %4062 = vmatprep.subr.bf16.mxu1 %v5989_v52  ;;  %4200 = vmatpush1.bf16.msra.mxu0 %v6123_v9 }
 0xa7c   :  { %4202 = vmatprep.subr.bf16.mxu0 %v6126_v13 }
 0xa7e   :  { %4064 = vmatpush1.bf16.msra.mxu1 %v5993_v61 }
 0xa7f   :  { %4066 = vmatprep.subr.bf16.mxu1 %v5998_v7  ;;  %4204 = vmatpush1.bf16.msra.mxu0 %v6131_v22 }
 0xa80   :  { %4302 = vmatprep.subr.bf16.mxu0 %v5917_v24 }
 0xa82   :  { %4068 = vmatpush1.bf16.msra.mxu1 %v6013_v25 }
 0xa83   :  { %4070 = vmatprep.subr.bf16.mxu1 %v6018_v28 }
 0xa86   :  { %4072 = vmatpush1.bf16.msra.mxu1 %v6035_v50 }
 0xa87   :  { %4074 = vmatprep.subr.bf16.mxu1 %v6041_v57 }
 0xa8a   :  { %4076 = vmatpush1.bf16.msra.mxu1 %v6055_v15 }
 0xa8b   :  { %4078 = vmatprep.subr.bf16.mxu1 %v6061_v21 }
 0xa8e   :  { %4080 = vmatpush1.bf16.msra.mxu1 %v6070_v31 }
 0xa8f   :  { %4082 = vmatprep.subr.bf16.mxu1 %v6073_v38 }
 0xa92   :  { %4084 = vmatpush1.bf16.msra.mxu1 %v6078_v49 }
 0xa93   :  { %4086 = vmatprep.subr.bf16.mxu1 %v6081_v55 }
 0xa96   :  { %4088 = vmatpush1.bf16.msra.mxu1 %v6088_v6  ;;  %v3553_v23 = vpop.f32.mrb[14].mxu0 }
 0xa97   :  { %4090 = vmatprep.subr.bf16.mxu1 %v6092_v8  ;;  %v3554_v1 = vpop.f32.mrb[15].mxu0 }
 0xa98   :  { %v6174_v26 = vadd.f32 %v3554_v1, %v3553_v23 }
 0xa9a   :  { %4092 = vmatpush1.bf16.msra.mxu1 %v6098_v34 }
 0xa9b   :  { %4094 = vmatprep.subr.bf16.mxu1 %v6101_v18 }
 0xa9e   :  { %4096 = vmatpush1.bf16.msra.mxu1 %v6107_v0 }
 0xa9f   :  { %4098 = vmatprep.subr.bf16.mxu1 %v6110_v2 }
 0xaa2   :  { %4100 = vmatpush1.bf16.msra.mxu1 %v6115_v45 }
 0xaa3   :  { %4102 = vmatprep.subr.bf16.mxu1 %v6118_v46 }
 0xaa6   :  { %4104 = vmatpush1.bf16.msra.mxu1 %v6123_v9 }
 0xaa7   :  { %4106 = vmatprep.subr.bf16.mxu1 %v6126_v13  ;;  %v6194_v13 = vrot.slane %v1311_v29, %v1335_v62 }
 0xaaa   :  { %4108 = vmatpush1.bf16.msra.mxu1 %v6131_v22  ;;  %v6192_v22 = vrot.slane %v1311_v29, %v1331_v63 }
 0xaab   :  { %4206 = vmatprep.subr.bf16.mxu1 %v5917_v24  ;;  %v1328_v24 = vrot.slane %v1311_v29, %v1327_v58 }
 0xaad   :  { %2003 = vmatmul.mubr.f32.vlgmr.msra.gmra.mrb[18].mxu1 %v7043_v20  ;;  %v1324_v20 = vrot.slane %v1311_v29, %v6182_v56 }
 0xaae   :  { %4208 = vmatpush3.bf16.msra.mxu1 %v5919_v27 }
 0xaaf   :  { %4210 = vmatprep.subr.bf16.mxu1 %v5923_v30 }
 0xab2   :  { %4212 = vmatpush3.bf16.msra.mxu1 %v5925_v33 }
 0xab3   :  { %4214 = vmatprep.subr.bf16.mxu1 %v5929_v36 }
 0xab6   :  { %4216 = vmatpush3.bf16.msra.mxu1 %v5931_v39 }
 0xab7   :  { %4218 = vmatprep.subr.bf16.mxu1 %v5934_v42 }
 0xaba   :  { %4220 = vmatpush3.bf16.msra.mxu1 %v5937_v47 }
 0xabb   :  { %4222 = vmatprep.subr.bf16.mxu1 %v5940_v48 }
 0xabe   :  { %4224 = vmatpush3.bf16.msra.mxu1 %v5943_v53 }
 0xabf   :  { %4226 = vmatprep.subr.bf16.mxu1 %v5946_v54 }
 0xac2   :  { %4228 = vmatpush3.bf16.msra.mxu1 %v5949_v59 }
 0xac3   :  { %4230 = vmatprep.subr.bf16.mxu1 %v5952_v60 }
 0xac6   :  { %4232 = vmatpush3.bf16.msra.mxu1 %v5955_v3 }
 0xac7   :  { %4234 = vmatprep.subr.bf16.mxu1 %v5958_v4 }
 0xaca   :  { %4236 = vmatpush3.bf16.msra.mxu1 %v5961_v10 }
 0xacb   :  { %4238 = vmatprep.subr.bf16.mxu1 %v5964_v11 }
 0xb30   :  { %v1415_v14 = vpop.f32.mrb[6].mxu1 }
 0xb31   :  { %v6187_v16 = vadd.f32 %v1415_v14, %v1316_v12  ;;  %v1417_v23 = vpop.f32.mrb[7].mxu1 }
 0xb32   :  { %v6189_v1 = vadd.f32 %v1417_v23, %v1320_v5 }
 0xb33   :  { %v1619_v9 = vrot.slane %v6187_v16, 1  ;;  %v1643_v46 = vrot.slane %v6187_v16, 2  ;;  %v1670_v45 = vrot.slane %v6187_v16, 3  ;;  %v1697_v18 = vrot.slane %v6187_v16, 4 }
 0xb34   :  { %v1421_v2 = vpop.f32.mrb[8].mxu1  ;;  %v1621_v14 = vrot.slane %v6189_v1, 1  ;;  %v1646_v0 = vrot.slane %v6189_v1, 2  ;;  %v1673_v23 = vrot.slane %v6189_v1, 3 }
 0xb35   :  { %v6203_v58 = vadd.f32 %v1421_v2, %v1316_v12  ;;  %v1423_v63 = vpop.f32.mrb[9].mxu1 }
 0xb36   :  { %v6208_v8 = vadd.f32 %v1423_v63, %v1320_v5 }
 0xb37   :  { %v1586_v38 = vrot.slane %v6203_v58, 7  ;;  %v1620_v2 = vsel %vm1587_vm3, %v6203_v58, %v1619_v9  ;;  %v1644_v12 = vrot.slane %v6203_v58, 1  ;;  %v1671_v29 = vrot.slane %v6203_v58, 2 }
 0xb38   :  { %v1492_v62 = vpop.f32.mrb[10].mxu1  ;;  %v1589_v34 = vrot.slane %v6208_v8, 7  ;;  %v6221_v5 = vsel %vm1587_vm3, %v6208_v8, %v1621_v14  ;;  %v1647_v63 = vrot.slane %v6208_v8, 1  ;;  %v1674_v49 = vrot.slane %v6208_v8, 2 }
 0xb39   :  { %v6225_v55 = vadd.f32 %v1492_v62, %v1324_v20  ;;  %v1494_v6 = vpop.f32.mrb[11].mxu1  ;;  %v1588_v9 = vsel %vm1587_vm3, %v1586_v38, %v6187_v16  ;;  %v1645_v31 = vsel %vm1587_vm3, %v1644_v12, %v1643_v46  ;;  %v1672_v11 = vsel %vm1587_vm3, %v1671_v29, %v1670_v45 }
 0xb3a   :  { %v6231_v21 = vadd.f32 %v1494_v6, %v1328_v24  ;;  %v6235_v14 = vsel %vm1587_vm3, %v1589_v34, %v6189_v1  ;;  %v6238_v10 = vsel %vm1587_vm3, %v1647_v63, %v1646_v0  ;;  %v6241_v62 = vsel %vm1587_vm3, %v1674_v49, %v1673_v23 }
 0xb3b   :  { %v1623_v38 = vrot.slane %v6225_v55, 1  ;;  %v1649_v15 = vrot.slane %v6225_v55, 2  ;;  %v1676_v46 = vrot.slane %v6225_v55, 3  ;;  %v1698_v45 = vrot.slane %v6203_v58, 3 }
 0xb3c   :  { %v1498_v6 = vpop.f32.mrb[12].mxu1  ;;  %v1602_v29 = vrot.slane %v6231_v21, 5  ;;  %v1628_v34 = vrot.slane %v6231_v21, 4  ;;  %v1655_v12 = vrot.slane %v6231_v21, 3  ;;  %v1682_v0 = vrot.slane %v6231_v21, 2 }
 0xb3d   :  { %v6251_v63 = vadd.f32 %v1498_v6, %v1324_v20  ;;  %v1500_v49 = vpop.f32.mrb[13].mxu1  ;;  %v6254_v23 = vsel %vm1587_vm3, %v1698_v45, %v1697_v18  ;;  %v1709_v4 = vrot.slane %v6231_v21, 1 }
 0xb3e   :  { %v6258_v3 = vadd.f32 %v1500_v49, %v1328_v24 }
 0xb3f   :  { %v1591_v59 = vrot.slane %v6251_v63, 7  ;;  %v1624_v20 = vsel %vm1587_vm3, %v6251_v63, %v1623_v38  ;;  %v1650_v18 = vrot.slane %v6251_v63, 1  ;;  %v1677_v45 = vrot.slane %v6251_v63, 2 }
 0xb40   :  { %v1569_v6 = vpop.f32.mrb[14].mxu1  ;;  %v1603_v57 = vrot.slane %v6258_v3, 4  ;;  %v1629_v24 = vrot.slane %v6258_v3, 3  ;;  %v1656_v49 = vrot.slane %v6258_v3, 2  ;;  %v1683_v50 = vrot.slane %v6258_v3, 1 }
 0xb41   :  { %v6273_v28 = vadd.f32 %v1569_v6, %v6192_v22  ;;  %v1571_v60 = vpop.f32.mrb[15].mxu1  ;;  %v1592_v38 = vsel %vm1587_vm3, %v1591_v59, %v6225_v55  ;;  %v1651_v25 = vsel %vm1587_vm3, %v1650_v18, %v1649_v15  ;;  %v1678_v54 = vsel %vm1587_vm3, %v1677_v45, %v1676_v46 }
 0xb42   :  { %v6280_v7 = vadd.f32 %v1571_v60, %v6194_v13  ;;  %v1605_v53 = vsel %vm1604_vm4, %v1603_v57, %v1602_v29  ;;  %v1630_v61 = vsel %vm1604_vm4, %v1629_v24, %v1628_v34  ;;  %v1657_v48 = vsel %vm1604_vm4, %v1656_v49, %v1655_v12 }
 0xb43   :  { %v6286_v6 = vsel %vm1615_vm5, %v1588_v9, %v1605_v53  ;;  %v1606_v52 = vrot.slane %v6273_v28, 5  ;;  %v6290_v59 = vsel %vm1615_vm5, %v1620_v2, %v1630_v61  ;;  %v1631_v15 = vrot.slane %v6273_v28, 4 }
 0xb44   :  { %7183 = vst [vmem:[#allocation73_spill] sm:$0xff] %v6290_v59  ;;  %v1575_v46 = vpop.f32.mrb[16].mxu1  ;;  %v1609_v60 = vrot.slane %v6280_v7, 5  ;;  %v1634_v18 = vrot.slane %v6280_v7, 4  ;;  %v6296_v57 = vsel %vm1615_vm5, %v1645_v31, %v1657_v48  ;;  %v1658_v29 = vrot.slane %v6273_v28, 3 }
 0xb45   :  { %7184 = vst [vmem:[#allocation74_spill] sm:$0xff] %v6296_v57  ;;  %v6300_v53 = vadd.f32 %v1575_v46, %v6192_v22  ;;  %v1577_v9 = vpop.f32.mrb[17].mxu1  ;;  %v1661_v34 = vrot.slane %v6280_v7, 3  ;;  %v1684_v61 = vsel %vm1604_vm4, %v1683_v50, %v1682_v0  ;;  %v1685_v2 = vrot.slane %v6273_v28, 2 }
 0xb46   :  { %v6306_v12 = vadd.f32 %v1577_v9, %v6194_v13  ;;  %v6309_v45 = vsel %vm1615_vm5, %v1672_v11, %v1684_v61  ;;  %v1688_v48 = vrot.slane %v6280_v7, 2  ;;  %v1710_v31 = vsel %vm1604_vm4, %v6258_v3, %v1709_v4 }
 0xb47   :  { %7185 = vst [vmem:[#allocation75_spill] sm:$0xff] %v6309_v45  ;;  %v1607_v22 = vrot.slane %v6300_v53, 4  ;;  %v1632_v24 = vrot.slane %v6300_v53, 3  ;;  %v1659_v49 = vrot.slane %v6300_v53, 2  ;;  %v1686_v50 = vrot.slane %v6300_v53, 1 }
 0xb48   :  { %v1610_v0 = vrot.slane %v6306_v12, 4  ;;  %v1635_v13 = vrot.slane %v6306_v12, 3  ;;  %v1662_v11 = vrot.slane %v6306_v12, 2  ;;  %v1689_v46 = vrot.slane %v6306_v12, 1 }
 0xb49   :  { %v1608_v9 = vsel %vm1604_vm4, %v1607_v22, %v1606_v52  ;;  %v1633_v4 = vsel %vm1604_vm4, %v1632_v24, %v1631_v15  ;;  %v1660_v61 = vsel %vm1604_vm4, %v1659_v49, %v1658_v29  ;;  %v1687_v45 = vsel %vm1604_vm4, %v1686_v50, %v1685_v2 }
 0xb4a   :  { %v6328_v57 = vsel %vm1615_vm5, %v6235_v14, %v1608_v9  ;;  %v1611_v59 = vsel %vm1604_vm4, %v1610_v0, %v1609_v60  ;;  %v6333_v47 = vsel %vm1615_vm5, %v6221_v5, %v1633_v4  ;;  %v1636_v51 = vsel %vm1604_vm4, %v1635_v13, %v1634_v18 }
 0xb4b   :  { %v6337_v52 = vsel %vm1615_vm5, %v1592_v38, %v1611_v59  ;;  %v6340_v15 = vsel %vm1615_vm5, %v1624_v20, %v1636_v51  ;;  %v6344_v29 = vsel %vm1615_vm5, %v6238_v10, %v1660_v61  ;;  %v1663_v14 = vsel %vm1604_vm4, %v1662_v11, %v1661_v34 }
 0xb4c   :  { %7186 = vst [vmem:[#allocation76_spill] sm:$0xff] %v6344_v29  ;;  %v6348_v60 = vsel %vm1615_vm5, %v1651_v25, %v1663_v14  ;;  %v6352_v5 = vsel %vm1615_vm5, %v6241_v62, %v1687_v45  ;;  %v1690_v18 = vsel %vm1604_vm4, %v1689_v46, %v1688_v48  ;;  %v6357_v38 = vsel %vm1615_vm5, %v6254_v23, %v1710_v31  ;;  %v7252_v29 = vld [vmem:[#allocation73_spill] sm:$0xff] }
 0xb4d   :  { %7187 = vst [vmem:[#allocation77_spill] sm:$0xff] %v6348_v60  ;;  %7188 = vst [vmem:[#allocation78_spill] sm:$0xff] %v6352_v5  ;;  %v6360_v51 = vsel %vm1615_vm5, %v1678_v54, %v1690_v18  ;;  %v7191_v10 = vrot.slane %v6189_v1, 4  ;;  %v7192_v20 = vrot.slane %v6208_v8, 3  ;;  %v1711_v59 = vrot.slane %v6273_v28, 1 }
 0xb4e   :  { %7189 = vst [vmem:[#allocation79_spill] sm:$0xff] %v6357_v38  ;;  %7190 = vst [vmem:[#allocation80_spill] sm:$0xff] %v6360_v51  ;;  %v1704_v62 = vrot.slane %v6251_v63, 3  ;;  %v1713_v34 = vrot.slane %v6280_v7, 1  ;;  %v7193_v2 = vrot.slane %v6187_v16, 5  ;;  %v7194_v23 = vrot.slane %v6203_v58, 4 }
 0xb4f   :  { %v1702_v25 = vsel %vm1587_vm3, %v7192_v20, %v7191_v10  ;;  %v1733_v54 = vrot.slane %v6258_v3, 7  ;;  %v7195_v48 = vrot.slane %v6189_v1, 5  ;;  %v7196_v31 = vrot.slane %v6208_v8, 4 }
 0xb50   :  { %v1723_v45 = vsel %vm1587_vm3, %v7194_v23, %v7193_v2  ;;  %v1712_v24 = vsel %vm1604_vm4, %v6300_v53, %v1711_v59  ;;  %v7197_v49 = vrot.slane %v6225_v55, 4  ;;  %v1735_v0 = vrot.slane %v6300_v53, 7 }
 0xb51   :  { %v1726_v22 = vsel %vm1587_vm3, %v7196_v31, %v7195_v48  ;;  %v1727_v13 = vrot.slane %v6225_v55, 5  ;;  %v6389_v11 = vsel %vm1615_vm5, %v1702_v25, %v1712_v24  ;;  %v1714_v46 = vsel %vm1604_vm4, %v6306_v12, %v1713_v34 }
 0xb52   :  { %v1705_v50 = vsel %vm1587_vm3, %v1704_v62, %v7197_v49  ;;  %7198 = vst [vmem:[#allocation81_spill] sm:$0xff] %v6389_v11  ;;  %v1734_v9 = vsel %vm1604_vm4, %v1733_v54, %v6231_v21  ;;  %v1728_v4 = vrot.slane %v6251_v63, 4  ;;  %v1736_v18 = vsel %vm1604_vm4, %v1735_v0, %v6273_v28 }
 0xb53   :  { %v6397_v61 = vsel %vm1615_vm5, %v1705_v50, %v1714_v46  ;;  %v6400_v14 = vsel %vm1615_vm5, %v1723_v45, %v1734_v9  ;;  %v1737_v10 = vrot.slane %v6306_v12, 7  ;;  %v6406_v20 = vsel %vm1615_vm5, %v1726_v22, %v1736_v18 }
 0xb54   :  { %7199 = vst [vmem:[#allocation82_spill] sm:$0xff] %v6397_v61  ;;  %7200 = vst [vmem:[#allocation83_spill] sm:$0xff] %v6400_v14  ;;  %v1729_v25 = vsel %vm1587_vm3, %v1728_v4, %v1727_v13  ;;  %v1746_v59 = vrot.slane %v6203_v58, 5  ;;  %v1757_v62 = vrot.slane %v6231_v21, 7  ;;  %v1758_v2 = vrot.slane %v6258_v3, 6 }
 0xb55   :  { %7201 = vst [vmem:[#allocation84_spill] sm:$0xff] %v6406_v20  ;;  %v1738_v34 = vsel %vm1604_vm4, %v1737_v10, %v6280_v7  ;;  %v1749_v23 = vrot.slane %v6208_v8, 5  ;;  %v1760_v45 = vrot.slane %v6273_v28, 7  ;;  %v7203_v48 = vrot.slane %v6187_v16, 6  ;;  %v7251_v20 = vld [vmem:[#allocation37_spill] sm:$0xff] }
 0xb56   :  { %v6417_v54 = vsel %vm1615_vm5, %v1729_v25, %v1738_v34  ;;  %v1761_v22 = vrot.slane %v6300_v53, 6  ;;  %v1751_v24 = vrot.slane %v6225_v55, 6  ;;  %v1759_v49 = vsel %vm1604_vm4, %v1758_v2, %v1757_v62 }
 0xb57   :  { %7202 = vst [vmem:[#allocation85_spill] sm:$0xff] %v6417_v54  ;;  %v1747_v31 = vsel %vm1587_vm3, %v1746_v59, %v7203_v48  ;;  %v7204_v50 = vrot.slane %v6189_v1, 6  ;;  %v1752_v13 = vrot.slane %v6251_v63, 5  ;;  %v1763_v46 = vrot.slane %v6280_v7, 7  ;;  %v7250_v54 = vld [vmem:[#allocation72_spill] sm:$0xff] }
 0xb58   :  { %v6431_v9 = vsel %vm1615_vm5, %v1747_v31, %v1759_v49  ;;  %v1762_v4 = vsel %vm1604_vm4, %v1761_v22, %v1760_v45  ;;  %v1764_v18 = vrot.slane %v6306_v12, 6  ;;  %v1773_v10 = vrot.slane %v6203_v58, 6 }
 0xb59   :  { %v1750_v0 = vsel %vm1587_vm3, %v1749_v23, %v7204_v50  ;;  %7205 = vst [vmem:[#allocation86_spill] sm:$0xff] %v6431_v9  ;;  %v1753_v59 = vsel %vm1587_vm3, %v1752_v13, %v1751_v24  ;;  %v1784_v62 = vrot.slane %v6231_v21, 6  ;;  %v1785_v34 = vrot.slane %v6258_v3, 5  ;;  %v7249_v9 = vld [vmem:[#allocation71_spill] sm:$0xff] }
 0xb5a   :  { %v6437_v25 = vsel %vm1615_vm5, %v1750_v0, %v1762_v4  ;;  %v1765_v2 = vsel %vm1604_vm4, %v1764_v18, %v1763_v46  ;;  %v7207_v23 = vrot.slane %v6187_v16, 7  ;;  %v1775_v45 = vrot.slane %v6189_v1, 7 }
 0xb5b   :  { %7206 = vst [vmem:[#allocation87_spill] sm:$0xff] %v6437_v25  ;;  %v1776_v31 = vrot.slane %v6208_v8, 6  ;;  %v6449_v58 = vsel %vm1615_vm5, %v1753_v59, %v1765_v2  ;;  %v1786_v22 = vsel %vm1604_vm4, %v1785_v34, %v1784_v62  ;;  %v1787_v24 = vrot.slane %v6273_v28, 6  ;;  %v7248_v25 = vld [vmem:[#allocation70_spill] sm:$0xff] }
 0xb5c   :  { %v1774_v48 = vsel %vm1587_vm3, %v1773_v10, %v7207_v23  ;;  %7208 = vst [vmem:[#allocation88_spill] sm:$0xff] %v6449_v58  ;;  %v1788_v21 = vrot.slane %v6300_v53, 5  ;;  %v1778_v49 = vrot.slane %v6225_v55, 7  ;;  %v1779_v1 = vrot.slane %v6251_v63, 6  ;;  %v1895_v55 = vld [vmem:[%s7212_s19] sm:$0x7] }
 0xb5d   :  { %v6455_v3 = vsel %vm1615_vm5, %v1774_v48, %v1786_v22  ;;  %v1777_v16 = vsel %vm1587_vm3, %v1776_v31, %v1775_v45  ;;  %v1790_v50 = vrot.slane %v6280_v7, 6  ;;  %v1791_v0 = vrot.slane %v6306_v12, 5  ;;  %v1912_v63 = vld [vmem:[#allocation25] sm:$0x7]  ;;  %v7247_v58 = vld [vmem:[#allocation69_spill] sm:$0xff] }
 0xb5e   :  { %7209 = vst [vmem:[#allocation89_spill] sm:$0xff] %v6455_v3  ;;  %v1789_v8 = vsel %vm1604_vm4, %v1788_v21, %v1787_v24  ;;  %v1780_v28 = vsel %vm1587_vm3, %v1779_v1, %v1778_v49  ;;  %v1900_v4 = vrot.slane %v1895_v55, %v5797_v43  ;;  %v1917_v7 = vrot.slane %v1912_v63, %v5797_v43  ;;  %v7246_v3 = vld [vmem:[#allocation68_spill] sm:$0xff] }
 0xb5f   :  { %v6464_v13 = vsel %vm1615_vm5, %v1777_v16, %v1789_v8  ;;  %v1792_v53 = vsel %vm1604_vm4, %v1791_v0, %v1790_v50  ;;  %v1904_v12 = vrot.slane %v1895_v55, %v6177_v37  ;;  %v1921_v18 = vrot.slane %v1912_v63, %v6177_v37 }
 0xb60   :  { %7210 = vst [vmem:[#allocation90_spill] sm:$0xff] %v6464_v13  ;;  %v6469_v46 = vsel %vm1615_vm5, %v1780_v28, %v1792_v53  ;;  %v6479_v10 = vsel %vm1615_vm5, %v1900_v4, %v1917_v7  ;;  %v1908_v24 = vrot.slane %v1895_v55, %v6182_v56  ;;  %v1925_v21 = vrot.slane %v1912_v63, %v6182_v56  ;;  %v7245_v13 = vld [vmem:[#allocation67_spill] sm:$0xff] }
 0xb61   :  { %7211 = vst [vmem:[#allocation91_spill] sm:$0xff] %v6469_v46  ;;  %7213 = vst [vmem:[#allocation92_spill] sm:$0xff] %v6479_v10  ;;  %v6482_v59 = vsel %vm1615_vm5, %v1904_v12, %v1921_v18  ;;  %v7214_v28 = vmov 0.0   ;;  %v7217_v18 = vld [vmem:[#allocation38_spill] sm:$0xff] }
 0xb62   :  { %v6491_v49 = vsel %vm1615_vm5, %v1908_v24, %v1925_v21  ;;  %v6498_v56 = vsel %vm1934_vm6, 1.0, %v7214_v28  ;;  %v7228_v24 = vld [vmem:[#allocation54_spill] sm:$0xff]  ;;  %v7229_v21 = vld [vmem:[#allocation44_spill] sm:$0xff]  ;;  %v7237_v28 = vld [vmem:[#allocation59_spill] sm:$0xff] }
 0xb63   :  { %v6501_v7 = vsub.f32 1.0, %v6498_v56  ;;  %v7244_v46 = vld [vmem:[#allocation66_spill] sm:$0xff] }
 0xb80   :  { %v2004_v62 = vpop.f32.mrb[18].mxu1 }
 0xb81   :  { %v2005_v34 = vadd.f32 %v2004_v62, %v6479_v10  ;;  %v2006_v2 = vpop.f32.mrb[19].mxu1  ;;  %v7218_v62 = vld [vmem:[#allocation49_spill] sm:$0xff] }
 0xb82   :  { %v2007_v23 = vadd.f32 %v2006_v2, %v6482_v59  ;;  %v7220_v2 = vld [vmem:[#allocation50_spill] sm:$0xff] }
 0xb83   :  { %v2079_v48 = vadd.f32 %v2005_v34, %v6286_v6  ;;  %v2076_v6 = vadd.f32 %v6174_v26, %v6491_v49  ;;  %v7219_v34 = vld [vmem:[#allocation39_spill] sm:$0xff] }
 0xb84   :  { %v2086_v43 = vadd.f32 %v2007_v23, %v6328_v57  ;;  %v7221_v23 = vld [vmem:[#allocation40_spill] sm:$0xff] }
 0xb85   :  { %v3448_v45 = vmul.f32 -1.442695, %v2079_v48  ;;  %v7222_v48 = vld [vmem:[#allocation51_spill] sm:$0xff] }
 0xb86   :  { %v3449_v31 = vmul.f32 -1.442695, %v2086_v43  ;;  %v7223_v43 = vld [vmem:[#allocation41_spill] sm:$0xff] }
 0xb87   :  { %4888 = vpow2.f32 %v3448_v45  ;;  %v7224_v45 = vld [vmem:[#allocation52_spill] sm:$0xff] }
 0xb88   :  { %4890 = vpow2.f32 %v3449_v31  ;;  %v7225_v31 = vld [vmem:[#allocation42_spill] sm:$0xff] }
 0xb91   :  { %v4889_v37 = vpop.eup %4888 }
 0xb92   :  { %v2083_v22 = vadd.f32 1.0, %v4889_v37  ;;  %v4891_v16 = vpop.eup %4890  ;;  %v7226_v37 = vld [vmem:[#allocation53_spill] sm:$0xff] }
 0xb93   :  { %v2090_v1 = vadd.f32 1.0, %v4891_v16  ;;  %v7230_v16 = vld [vmem:[#allocation55_spill] sm:$0xff] }
 0xb94   :  { %4892 = vrcp.f32 %v2083_v22  ;;  %v7227_v22 = vld [vmem:[#allocation43_spill] sm:$0xff] }
 0xb95   :  { %4894 = vrcp.f32 %v2090_v1  ;;  %v7231_v1 = vld [vmem:[#allocation45_spill] sm:$0xff] }
 0xb9e   :  { %v4893_v57 = vpop.eup %4892 }
 0xb9f   :  { %v2093_v8 = vmul.f32 %v4893_v57, %v2076_v6  ;;  %v4895_v0 = vpop.eup %4894  ;;  %v7232_v6 = vld [vmem:[#allocation56_spill] sm:$0xff]  ;;  %v7233_v57 = vld [vmem:[#allocation46_spill] sm:$0xff] }
 0xba0   :  { %v2096_v53 = vsub.f32 1.0, %v4895_v0  ;;  %v2098_v63 = vmul.f32 0.0, %v4895_v0  ;;  %v7236_v0 = vld [vmem:[#allocation58_spill] sm:$0xff] }
 0xba1   :  { %v2094_v50 = vadd.f32 %v2093_v8, %v6337_v52  ;;  %v7234_v8 = vld [vmem:[#allocation57_spill] sm:$0xff] }
 0xba3   :  { %4896 = vtanh.f32 %v2094_v50  ;;  %v7235_v50 = vld [vmem:[#allocation47_spill] sm:$0xff] }
 0xbad   :  { %v4897_v55 = vpop.eup %4896 }
 0xbae   :  { %v2097_v4 = vmul.f32 %v4897_v55, %v2096_v53  ;;  %v7238_v53 = vld [vmem:[#allocation60_spill] sm:$0xff]  ;;  %v7239_v55 = vld [vmem:[#allocation61_spill] sm:$0xff] }
 0xbb0   :  { %v6503_v26 = vadd.f32 %v2098_v63, %v2097_v4  ;;  %v7240_v63 = vld [vmem:[#allocation62_spill] sm:$0xff]  ;;  %v7241_v4 = vld [vmem:[#allocation63_spill] sm:$0xff] }
 0xbb2   :  { %7215 = vst [vmem:[#allocation93_spill] sm:$0xff] %v6503_v26  ;;  %v2101_v12 = vmul.f32 %v6503_v26, %v6501_v7  ;;  %v2100_v52 = vmul.f32 %v6498_v56, %v6503_v26 }
 0xbb4   :  { %2166 = vmatprep.mubr.f32.mxu0 %v2101_v12  ;;  %2237 = vmatprep.mubr.f32.mxu1 %v2101_v12  ;;  %v7242_v12 = vld [vmem:[#allocation64_spill] sm:$0xff] }
 0xbb5   :  { %2167 = vmatmul.mubr.f32.vlgmr.msra.gmra.mrb[16].mxu0 %v2100_v52  ;;  %2238 = vmatmul.mubr.f32.vlgmr.msra.gmra.mrb[20].mxu1 %v2100_v52  ;;  %v7243_v52 = vld [vmem:[#allocation65_spill] sm:$0xff] }
 0xbb6   :  { %4240 = vmatpush1.bf16.msra.mxu1 %v5968_v17  ;;  %4304 = vmatpush3.bf16.msra.mxu0 %v5919_v27 }
 0xbb7   :  { %4242 = vmatprep.subr.bf16.mxu1 %v5970_v19  ;;  %4306 = vmatprep.subr.bf16.mxu0 %v5923_v30 }
 0xbba   :  { %4244 = vmatpush1.bf16.msra.mxu1 %v5975_v32  ;;  %4308 = vmatpush3.bf16.msra.mxu0 %v5925_v33 }
 0xbbb   :  { %4246 = vmatprep.subr.bf16.mxu1 %v5977_v35  ;;  %4310 = vmatprep.subr.bf16.mxu0 %v5929_v36 }
 0xbbe   :  { %4248 = vmatpush1.bf16.msra.mxu1 %v5981_v41  ;;  %4312 = vmatpush3.bf16.msra.mxu0 %v5931_v39 }
 0xbbf   :  { %4250 = vmatprep.subr.bf16.mxu1 %v5983_v44  ;;  %4314 = vmatprep.subr.bf16.mxu0 %v5934_v42 }
 0xbc2   :  { %4252 = vmatpush1.bf16.msra.mxu1 %v7216_v40  ;;  %4316 = vmatpush3.bf16.msra.mxu0 %v7217_v18 }
 0xbc3   :  { %4254 = vmatprep.subr.bf16.mxu1 %v7218_v62  ;;  %4318 = vmatprep.subr.bf16.mxu0 %v7219_v34 }
 0xbc6   :  { %4256 = vmatpush1.bf16.msra.mxu1 %v7220_v2  ;;  %4320 = vmatpush3.bf16.msra.mxu0 %v7221_v23 }
 0xbc7   :  { %4258 = vmatprep.subr.bf16.mxu1 %v7222_v48  ;;  %4322 = vmatprep.subr.bf16.mxu0 %v7223_v43 }
 0xbca   :  { %4260 = vmatpush1.bf16.msra.mxu1 %v7224_v45  ;;  %4324 = vmatpush3.bf16.msra.mxu0 %v7225_v31 }
 0xbcb   :  { %4262 = vmatprep.subr.bf16.mxu1 %v7226_v37  ;;  %4326 = vmatprep.subr.bf16.mxu0 %v7227_v22 }
 0xbce   :  { %4264 = vmatpush1.bf16.msra.mxu1 %v7228_v24  ;;  %4328 = vmatpush3.bf16.msra.mxu0 %v7229_v21 }
 0xbcf   :  { %4266 = vmatprep.subr.bf16.mxu1 %v7230_v16  ;;  %4330 = vmatprep.subr.bf16.mxu0 %v7231_v1 }
 0xbd2   :  { %4268 = vmatpush1.bf16.msra.mxu1 %v7232_v6  ;;  %4332 = vmatpush3.bf16.msra.mxu0 %v7233_v57 }
 0xbd3   :  { %4270 = vmatprep.subr.bf16.mxu1 %v7234_v8  ;;  %4334 = vmatprep.subr.bf16.mxu0 %v7235_v50 }
 0xbd6   :  { %4272 = vmatpush1.bf16.msra.mxu1 %v7236_v0 }
 0xbd7   :  { %4274 = vmatprep.subr.bf16.mxu1 %v7237_v28 }
 0xbda   :  { %4276 = vmatpush1.bf16.msra.mxu1 %v7238_v53 }
 0xbdb   :  { %4278 = vmatprep.subr.bf16.mxu1 %v7239_v55 }
 0xbde   :  { %4280 = vmatpush1.bf16.msra.mxu1 %v7240_v63 }
 0xbdf   :  { %4282 = vmatprep.subr.bf16.mxu1 %v7241_v4 }
 0xbe2   :  { %4284 = vmatpush1.bf16.msra.mxu1 %v7242_v12 }
 0xbe3   :  { %4286 = vmatprep.subr.bf16.mxu1 %v7243_v52 }
 0xbe6   :  { %4288 = vmatpush1.bf16.msra.mxu1 %v7244_v46 }
 0xbe7   :  { %4290 = vmatprep.subr.bf16.mxu1 %v7245_v13 }
 0xbea   :  { %4292 = vmatpush1.bf16.msra.mxu1 %v7246_v3 }
 0xbeb   :  { %4294 = vmatprep.subr.bf16.mxu1 %v7247_v58 }
 0xbee   :  { %4296 = vmatpush1.bf16.msra.mxu1 %v7248_v25 }
 0xbef   :  { %4298 = vmatprep.subr.bf16.mxu1 %v7249_v9 }
 0xbf2   :  { %4300 = vmatpush1.bf16.msra.mxu1 %v7250_v54 }
 0xbf3   :  { %4398 = vmatprep.subr.bf16.mxu1 %v7251_v20 }
 0xc88   :  { %v2168_v14 = vpop.f32.mrb[16].mxu0  ;;  %v3588_v61 = vpop.f32.mrb[20].mxu1 }
 0xc89   :  { %v2169_v11 = vadd.f32 %v2168_v14, %v6479_v10  ;;  %v2170_v38 = vpop.f32.mrb[17].mxu0  ;;  %v3589_v51 = vpop.f32.mrb[21].mxu1 }
 0xc8a   :  { %v2171_v5 = vadd.f32 %v2170_v38, %v6482_v59  ;;  %v3590_v60 = vadd.f32 %v3589_v51, %v3588_v61 }
 0xc8b   :  { %v2243_v3 = vadd.f32 %v2169_v11, %v7252_v29 }
 0xc8c   :  { %v2250_v58 = vadd.f32 %v2171_v5, %v6333_v47  ;;  %v2240_v14 = vadd.f32 %v3590_v60, %v6491_v49 }
 0xc8d   :  { %v3450_v25 = vmul.f32 -1.442695, %v2243_v3  ;;  %v7259_v3 = vld [vmem:[#allocation70_spill] sm:$0xff] }
 0xc8e   :  { %v3451_v9 = vmul.f32 -1.442695, %v2250_v58  ;;  %v7258_v58 = vld [vmem:[#allocation69_spill] sm:$0xff] }
 0xc8f   :  { %4898 = vpow2.f32 %v3450_v25  ;;  %v7257_v25 = vld [vmem:[#allocation68_spill] sm:$0xff] }
 0xc90   :  { %4900 = vpow2.f32 %v3451_v9  ;;  %v7256_v9 = vld [vmem:[#allocation67_spill] sm:$0xff] }
 0xc99   :  { %v4899_v54 = vpop.eup %4898 }
 0xc9a   :  { %v2247_v13 = vadd.f32 1.0, %v4899_v54  ;;  %v4901_v20 = vpop.eup %4900 }
 0xc9b   :  { %v2254_v46 = vadd.f32 1.0, %v4901_v20  ;;  %v7255_v20 = vld [vmem:[#allocation66_spill] sm:$0xff] }
 0xc9c   :  { %4902 = vrcp.f32 %v2247_v13  ;;  %v7260_v13 = vld [vmem:[#allocation71_spill] sm:$0xff] }
 0xc9d   :  { %4904 = vrcp.f32 %v2254_v46  ;;  %v7261_v46 = vld [vmem:[#allocation72_spill] sm:$0xff] }
 0xca6   :  { %v4903_v10 = vpop.eup %4902 }
 0xca7   :  { %v2257_v52 = vmul.f32 %v4903_v10, %v2240_v14  ;;  %v4905_v29 = vpop.eup %4904  ;;  %v7262_v10 = vld [vmem:[#allocation37_spill] sm:$0xff] }
 0xca8   :  { %v2260_v51 = vsub.f32 1.0, %v4905_v29  ;;  %v2262_v11 = vmul.f32 %v4905_v29, %v6503_v26  ;;  %v7265_v26 = vld [vmem:[#allocation76_spill] sm:$0xff] }
 0xca9   :  { %v2258_v38 = vadd.f32 %v2257_v52, %v6340_v15  ;;  %v7254_v15 = vld [vmem:[#allocation65_spill] sm:$0xff] }
 0xcab   :  { %4906 = vtanh.f32 %v2258_v38  ;;  %v7263_v38 = vld [vmem:[#allocation92_spill] sm:$0xff] }
 0xcb5   :  { %v4907_v47 = vpop.eup %4906 }
 0xcb6   :  { %v2261_v5 = vmul.f32 %v4907_v47, %v2260_v51 }
 0xcb8   :  { %v6564_v61 = vadd.f32 %v2262_v11, %v2261_v5 }
 0xcba   :  { %7253 = vst [vmem:[#allocation48_spill] sm:$0xff] %v6564_v61  ;;  %v2265_v54 = vmul.f32 %v6564_v61, %v6501_v7  ;;  %v2264_v60 = vmul.f32 %v6498_v56, %v6564_v61 }
 0xcbc   :  { %2330 = vmatprep.mubr.f32.mxu1 %v2265_v54  ;;  %2401 = vmatprep.mubr.f32.mxu0 %v2265_v54  ;;  %v7264_v54 = vld [vmem:[#allocation74_spill] sm:$0xff] }
 0xcbd   :  { %2331 = vmatmul.mubr.f32.vlgmr.msra.gmra.mrb[22].mxu1 %v2264_v60  ;;  %2402 = vmatmul.mubr.f32.vlgmr.msra.gmra.mrb[18].mxu0 %v2264_v60 }
 0xcbe   :  { %4336 = vmatpush1.bf16.msra.mxu0 %v5968_v17  ;;  %4400 = vmatpush3.bf16.msra.mxu1 %v5919_v27 }
 0xcbf   :  { %4338 = vmatprep.subr.bf16.mxu0 %v5970_v19  ;;  %4402 = vmatprep.subr.bf16.mxu1 %v5923_v30 }
 0xcc2   :  { %4340 = vmatpush1.bf16.msra.mxu0 %v5975_v32  ;;  %4404 = vmatpush3.bf16.msra.mxu1 %v5925_v33 }
 0xcc3   :  { %4342 = vmatprep.subr.bf16.mxu0 %v5977_v35  ;;  %4406 = vmatprep.subr.bf16.mxu1 %v5929_v36 }
 0xcc6   :  { %4344 = vmatpush1.bf16.msra.mxu0 %v5981_v41  ;;  %4408 = vmatpush3.bf16.msra.mxu1 %v5931_v39 }
 0xcc7   :  { %4346 = vmatprep.subr.bf16.mxu0 %v5983_v44  ;;  %4410 = vmatprep.subr.bf16.mxu1 %v5934_v42 }
 0xcca   :  { %4348 = vmatpush1.bf16.msra.mxu0 %v7216_v40  ;;  %4412 = vmatpush3.bf16.msra.mxu1 %v7217_v18 }
 0xccb   :  { %4350 = vmatprep.subr.bf16.mxu0 %v7218_v62  ;;  %4414 = vmatprep.subr.bf16.mxu1 %v7219_v34 }
 0xcce   :  { %4352 = vmatpush1.bf16.msra.mxu0 %v7220_v2  ;;  %4416 = vmatpush3.bf16.msra.mxu1 %v7221_v23 }
 0xccf   :  { %4354 = vmatprep.subr.bf16.mxu0 %v7222_v48  ;;  %4418 = vmatprep.subr.bf16.mxu1 %v7223_v43 }
 0xcd2   :  { %4356 = vmatpush1.bf16.msra.mxu0 %v7224_v45  ;;  %4420 = vmatpush3.bf16.msra.mxu1 %v7225_v31 }
 0xcd3   :  { %4358 = vmatprep.subr.bf16.mxu0 %v7226_v37  ;;  %4422 = vmatprep.subr.bf16.mxu1 %v7227_v22 }
 0xcd6   :  { %4360 = vmatpush1.bf16.msra.mxu0 %v7228_v24  ;;  %4424 = vmatpush3.bf16.msra.mxu1 %v7229_v21 }
 0xcd7   :  { %4362 = vmatprep.subr.bf16.mxu0 %v7230_v16  ;;  %4426 = vmatprep.subr.bf16.mxu1 %v7231_v1 }
 0xcda   :  { %4364 = vmatpush1.bf16.msra.mxu0 %v7232_v6  ;;  %4428 = vmatpush3.bf16.msra.mxu1 %v7233_v57 }
 0xcdb   :  { %4366 = vmatprep.subr.bf16.mxu0 %v7234_v8  ;;  %4430 = vmatprep.subr.bf16.mxu1 %v7235_v50 }
 0xcde   :  { %4368 = vmatpush1.bf16.msra.mxu0 %v7236_v0 }
 0xcdf   :  { %4370 = vmatprep.subr.bf16.mxu0 %v7237_v28 }
 0xce2   :  { %4372 = vmatpush1.bf16.msra.mxu0 %v7238_v53 }
 0xce3   :  { %4374 = vmatprep.subr.bf16.mxu0 %v7239_v55 }
 0xce6   :  { %4376 = vmatpush1.bf16.msra.mxu0 %v7240_v63 }
 0xce7   :  { %4378 = vmatprep.subr.bf16.mxu0 %v7241_v4 }
 0xcea   :  { %4380 = vmatpush1.bf16.msra.mxu0 %v7242_v12 }
 0xceb   :  { %4382 = vmatprep.subr.bf16.mxu0 %v7254_v15 }
 0xcee   :  { %4384 = vmatpush1.bf16.msra.mxu0 %v7255_v20 }
 0xcef   :  { %4386 = vmatprep.subr.bf16.mxu0 %v7256_v9 }
 0xcf2   :  { %4388 = vmatpush1.bf16.msra.mxu0 %v7257_v25 }
 0xcf3   :  { %4390 = vmatprep.subr.bf16.mxu0 %v7258_v58 }
 0xcf6   :  { %4392 = vmatpush1.bf16.msra.mxu0 %v7259_v3 }
 0xcf7   :  { %4394 = vmatprep.subr.bf16.mxu0 %v7260_v13 }
 0xcfa   :  { %4396 = vmatpush1.bf16.msra.mxu0 %v7261_v46 }
 0xcfb   :  { %4494 = vmatprep.subr.bf16.mxu0 %v7262_v10 }
 0xd90   :  { %v2332_v52 = vpop.f32.mrb[22].mxu1  ;;  %v3623_v14 = vpop.f32.mrb[18].mxu0 }
 0xd91   :  { %v2333_v29 = vadd.f32 %v2332_v52, %v7263_v38  ;;  %v2334_v51 = vpop.f32.mrb[23].mxu1  ;;  %v3624_v47 = vpop.f32.mrb[19].mxu0 }
 0xd92   :  { %v2335_v5 = vadd.f32 %v2334_v51, %v6482_v59  ;;  %v3625_v11 = vadd.f32 %v3624_v47, %v3623_v14  ;;  %v7266_v51 = vld [vmem:[#allocation77_spill] sm:$0xff] }
 0xd93   :  { %v2407_v60 = vadd.f32 %v2333_v29, %v7264_v54  ;;  %v7274_v54 = vld [vmem:[#allocation72_spill] sm:$0xff] }
 0xd94   :  { %v2414_v58 = vadd.f32 %v2335_v5, %v7265_v26  ;;  %v2404_v52 = vadd.f32 %v3625_v11, %v6491_v49  ;;  %v7272_v5 = vld [vmem:[#allocation70_spill] sm:$0xff]  ;;  %v7273_v11 = vld [vmem:[#allocation71_spill] sm:$0xff] }
 0xd95   :  { %v3452_v3 = vmul.f32 -1.442695, %v2407_v60  ;;  %v7275_v60 = vld [vmem:[#allocation37_spill] sm:$0xff] }
 0xd96   :  { %v3453_v13 = vmul.f32 -1.442695, %v2414_v58 }
 0xd97   :  { %4908 = vpow2.f32 %v3452_v3 }
 0xd98   :  { %4910 = vpow2.f32 %v3453_v13 }
 0xda1   :  { %v4909_v46 = vpop.eup %4908 }
 0xda2   :  { %v2411_v25 = vadd.f32 1.0, %v4909_v46  ;;  %v4911_v10 = vpop.eup %4910 }
 0xda3   :  { %v2418_v9 = vadd.f32 1.0, %v4911_v10  ;;  %v7270_v10 = vld [vmem:[#allocation68_spill] sm:$0xff] }
 0xda4   :  { %4912 = vrcp.f32 %v2411_v25 }
 0xda5   :  { %4914 = vrcp.f32 %v2418_v9  ;;  %v7269_v9 = vld [vmem:[#allocation67_spill] sm:$0xff] }
 0xdae   :  { %v4913_v38 = vpop.eup %4912 }
 0xdaf   :  { %v2421_v20 = vmul.f32 %v4913_v38, %v2404_v52  ;;  %v4915_v29 = vpop.eup %4914  ;;  %v7271_v38 = vld [vmem:[#allocation69_spill] sm:$0xff] }
 0xdb0   :  { %v2424_v47 = vsub.f32 1.0, %v4915_v29  ;;  %v2426_v3 = vmul.f32 %v4915_v29, %v6564_v61  ;;  %v7278_v61 = vld [vmem:[#allocation78_spill] sm:$0xff] }
 0xdb1   :  { %v2422_v14 = vadd.f32 %v2421_v20, %v7266_v51  ;;  %v7268_v20 = vld [vmem:[#allocation66_spill] sm:$0xff] }
 0xdb3   :  { %4916 = vtanh.f32 %v2422_v14  ;;  %v7276_v14 = vld [vmem:[#allocation92_spill] sm:$0xff] }
 0xdbd   :  { %v4917_v26 = vpop.eup %4916 }
 0xdbe   :  { %v2425_v58 = vmul.f32 %v4917_v26, %v2424_v47 }
 0xdc0   :  { %v6625_v13 = vadd.f32 %v2426_v3, %v2425_v58 }
 0xdc2   :  { %7267 = vst [vmem:[#allocation38_spill] sm:$0xff] %v6625_v13  ;;  %v2429_v25 = vmul.f32 %v6625_v13, %v6501_v7  ;;  %v2428_v46 = vmul.f32 %v6498_v56, %v6625_v13 }
 0xdc4   :  { %2494 = vmatprep.mubr.f32.mxu0 %v2429_v25  ;;  %2565 = vmatprep.mubr.f32.mxu1 %v2429_v25  ;;  %v7277_v25 = vld [vmem:[#allocation75_spill] sm:$0xff] }
 0xdc5   :  { %2495 = vmatmul.mubr.f32.vlgmr.msra.gmra.mrb[20].mxu0 %v2428_v46  ;;  %2566 = vmatmul.mubr.f32.vlgmr.msra.gmra.mrb[24].mxu1 %v2428_v46 }
 0xdc6   :  { %4432 = vmatpush1.bf16.msra.mxu1 %v5968_v17  ;;  %4496 = vmatpush3.bf16.msra.mxu0 %v5919_v27 }
 0xdc7   :  { %4434 = vmatprep.subr.bf16.mxu1 %v5970_v19  ;;  %4498 = vmatprep.subr.bf16.mxu0 %v5923_v30 }
 0xdca   :  { %4436 = vmatpush1.bf16.msra.mxu1 %v5975_v32  ;;  %4500 = vmatpush3.bf16.msra.mxu0 %v5925_v33 }
 0xdcb   :  { %4438 = vmatprep.subr.bf16.mxu1 %v5977_v35  ;;  %4502 = vmatprep.subr.bf16.mxu0 %v5929_v36 }
 0xdce   :  { %4440 = vmatpush1.bf16.msra.mxu1 %v5981_v41  ;;  %4504 = vmatpush3.bf16.msra.mxu0 %v5931_v39 }
 0xdcf   :  { %4442 = vmatprep.subr.bf16.mxu1 %v5983_v44  ;;  %4506 = vmatprep.subr.bf16.mxu0 %v5934_v42 }
 0xdd2   :  { %4444 = vmatpush1.bf16.msra.mxu1 %v7216_v40  ;;  %4508 = vmatpush3.bf16.msra.mxu0 %v7217_v18 }
 0xdd3   :  { %4446 = vmatprep.subr.bf16.mxu1 %v7218_v62  ;;  %4510 = vmatprep.subr.bf16.mxu0 %v7219_v34 }
 0xdd6   :  { %4448 = vmatpush1.bf16.msra.mxu1 %v7220_v2  ;;  %4512 = vmatpush3.bf16.msra.mxu0 %v7221_v23 }
 0xdd7   :  { %4450 = vmatprep.subr.bf16.mxu1 %v7222_v48  ;;  %4514 = vmatprep.subr.bf16.mxu0 %v7223_v43 }
 0xdda   :  { %4452 = vmatpush1.bf16.msra.mxu1 %v7224_v45  ;;  %4516 = vmatpush3.bf16.msra.mxu0 %v7225_v31 }
 0xddb   :  { %4454 = vmatprep.subr.bf16.mxu1 %v7226_v37  ;;  %4518 = vmatprep.subr.bf16.mxu0 %v7227_v22 }
 0xdde   :  { %4456 = vmatpush1.bf16.msra.mxu1 %v7228_v24  ;;  %4520 = vmatpush3.bf16.msra.mxu0 %v7229_v21 }
 0xddf   :  { %4458 = vmatprep.subr.bf16.mxu1 %v7230_v16  ;;  %4522 = vmatprep.subr.bf16.mxu0 %v7231_v1 }
 0xde2   :  { %4460 = vmatpush1.bf16.msra.mxu1 %v7232_v6  ;;  %4524 = vmatpush3.bf16.msra.mxu0 %v7233_v57 }
 0xde3   :  { %4462 = vmatprep.subr.bf16.mxu1 %v7234_v8  ;;  %4526 = vmatprep.subr.bf16.mxu0 %v7235_v50 }
 0xde6   :  { %4464 = vmatpush1.bf16.msra.mxu1 %v7236_v0 }
 0xde7   :  { %4466 = vmatprep.subr.bf16.mxu1 %v7237_v28 }
 0xdea   :  { %4468 = vmatpush1.bf16.msra.mxu1 %v7238_v53 }
 0xdeb   :  { %4470 = vmatprep.subr.bf16.mxu1 %v7239_v55 }
 0xdee   :  { %4472 = vmatpush1.bf16.msra.mxu1 %v7240_v63 }
 0xdef   :  { %4474 = vmatprep.subr.bf16.mxu1 %v7241_v4 }
 0xdf2   :  { %4476 = vmatpush1.bf16.msra.mxu1 %v7242_v12 }
 0xdf3   :  { %4478 = vmatprep.subr.bf16.mxu1 %v7254_v15 }
 0xdf6   :  { %4480 = vmatpush1.bf16.msra.mxu1 %v7268_v20 }
 0xdf7   :  { %4482 = vmatprep.subr.bf16.mxu1 %v7269_v9 }
 0xdfa   :  { %4484 = vmatpush1.bf16.msra.mxu1 %v7270_v10 }
 0xdfb   :  { %4486 = vmatprep.subr.bf16.mxu1 %v7271_v38 }
 0xdfe   :  { %4488 = vmatpush1.bf16.msra.mxu1 %v7272_v5 }
 0xdff   :  { %4490 = vmatprep.subr.bf16.mxu1 %v7273_v11 }
 0xe02   :  { %4492 = vmatpush1.bf16.msra.mxu1 %v7274_v54 }
 0xe03   :  { %4590 = vmatprep.subr.bf16.mxu1 %v7275_v60 }
 0xe98   :  { %v2496_v52 = vpop.f32.mrb[20].mxu0  ;;  %v3658_v51 = vpop.f32.mrb[24].mxu1 }
 0xe99   :  { %v2497_v29 = vadd.f32 %v2496_v52, %v7276_v14  ;;  %v2498_v47 = vpop.f32.mrb[21].mxu0  ;;  %v3659_v26 = vpop.f32.mrb[25].mxu1 }
 0xe9a   :  { %v2499_v3 = vadd.f32 %v2498_v47, %v6482_v59  ;;  %v3660_v58 = vadd.f32 %v3659_v26, %v3658_v51  ;;  %v7279_v47 = vld [vmem:[#allocation80_spill] sm:$0xff] }
 0xe9b   :  { %v2571_v46 = vadd.f32 %v2497_v29, %v7277_v25  ;;  %v7287_v25 = vld [vmem:[#allocation72_spill] sm:$0xff] }
 0xe9c   :  { %v2578_v38 = vadd.f32 %v2499_v3, %v7278_v61  ;;  %v2568_v52 = vadd.f32 %v3660_v58, %v6491_v49  ;;  %v7286_v58 = vld [vmem:[#allocation71_spill] sm:$0xff] }
 0xe9d   :  { %v3454_v5 = vmul.f32 -1.442695, %v2571_v46  ;;  %v7288_v46 = vld [vmem:[#allocation37_spill] sm:$0xff] }
 0xe9e   :  { %v3455_v11 = vmul.f32 -1.442695, %v2578_v38 }
 0xe9f   :  { %4918 = vpow2.f32 %v3454_v5 }
 0xea0   :  { %4920 = vpow2.f32 %v3455_v11 }
 0xea9   :  { %v4919_v54 = vpop.eup %4918 }
 0xeaa   :  { %v2575_v10 = vadd.f32 1.0, %v4919_v54  ;;  %v4921_v60 = vpop.eup %4920  ;;  %v7283_v54 = vld [vmem:[#allocation68_spill] sm:$0xff] }
 0xeab   :  { %v2582_v9 = vadd.f32 1.0, %v4921_v60  ;;  %v7284_v60 = vld [vmem:[#allocation69_spill] sm:$0xff] }
 0xeac   :  { %4922 = vrcp.f32 %v2575_v10 }
 0xead   :  { %4924 = vrcp.f32 %v2582_v9  ;;  %v7282_v9 = vld [vmem:[#allocation67_spill] sm:$0xff] }
 0xeb6   :  { %v4923_v14 = vpop.eup %4922 }
 0xeb7   :  { %v2585_v20 = vmul.f32 %v4923_v14, %v2568_v52  ;;  %v4925_v29 = vpop.eup %4924  ;;  %v7285_v14 = vld [vmem:[#allocation70_spill] sm:$0xff] }
 0xeb8   :  { %v2588_v26 = vsub.f32 1.0, %v4925_v29  ;;  %v2590_v38 = vmul.f32 %v4925_v29, %v6625_v13  ;;  %v7291_v13 = vld [vmem:[#allocation81_spill] sm:$0xff] }
 0xeb9   :  { %v2586_v51 = vadd.f32 %v2585_v20, %v7279_v47  ;;  %v7281_v20 = vld [vmem:[#allocation66_spill] sm:$0xff] }
 0xebb   :  { %4926 = vtanh.f32 %v2586_v51  ;;  %v7289_v51 = vld [vmem:[#allocation92_spill] sm:$0xff] }
 0xec5   :  { %v4927_v61 = vpop.eup %4926 }
 0xec6   :  { %v2589_v3 = vmul.f32 %v4927_v61, %v2588_v26 }
 0xec8   :  { %v6686_v5 = vadd.f32 %v2590_v38, %v2589_v3 }
 0xeca   :  { %7280 = vst [vmem:[#allocation49_spill] sm:$0xff] %v6686_v5  ;;  %v2593_v10 = vmul.f32 %v6686_v5, %v6501_v7  ;;  %v2592_v11 = vmul.f32 %v6498_v56, %v6686_v5 }
 0xecc   :  { %2658 = vmatprep.mubr.f32.mxu1 %v2593_v10  ;;  %2729 = vmatprep.mubr.f32.mxu0 %v2593_v10  ;;  %v7290_v10 = vld [vmem:[#allocation79_spill] sm:$0xff] }
 0xecd   :  { %2659 = vmatmul.mubr.f32.vlgmr.msra.gmra.mrb[26].mxu1 %v2592_v11  ;;  %2730 = vmatmul.mubr.f32.vlgmr.msra.gmra.mrb[22].mxu0 %v2592_v11 }
 0xece   :  { %4528 = vmatpush1.bf16.msra.mxu0 %v5968_v17  ;;  %4592 = vmatpush3.bf16.msra.mxu1 %v5919_v27 }
 0xecf   :  { %4530 = vmatprep.subr.bf16.mxu0 %v5970_v19  ;;  %4594 = vmatprep.subr.bf16.mxu1 %v5923_v30 }
 0xed2   :  { %4532 = vmatpush1.bf16.msra.mxu0 %v5975_v32  ;;  %4596 = vmatpush3.bf16.msra.mxu1 %v5925_v33 }
 0xed3   :  { %4534 = vmatprep.subr.bf16.mxu0 %v5977_v35  ;;  %4598 = vmatprep.subr.bf16.mxu1 %v5929_v36 }
 0xed6   :  { %4536 = vmatpush1.bf16.msra.mxu0 %v5981_v41  ;;  %4600 = vmatpush3.bf16.msra.mxu1 %v5931_v39 }
 0xed7   :  { %4538 = vmatprep.subr.bf16.mxu0 %v5983_v44  ;;  %4602 = vmatprep.subr.bf16.mxu1 %v5934_v42 }
 0xeda   :  { %4540 = vmatpush1.bf16.msra.mxu0 %v7216_v40  ;;  %4604 = vmatpush3.bf16.msra.mxu1 %v7217_v18 }
 0xedb   :  { %4542 = vmatprep.subr.bf16.mxu0 %v7218_v62  ;;  %4606 = vmatprep.subr.bf16.mxu1 %v7219_v34 }
 0xede   :  { %4544 = vmatpush1.bf16.msra.mxu0 %v7220_v2  ;;  %4608 = vmatpush3.bf16.msra.mxu1 %v7221_v23 }
 0xedf   :  { %4546 = vmatprep.subr.bf16.mxu0 %v7222_v48  ;;  %4610 = vmatprep.subr.bf16.mxu1 %v7223_v43 }
 0xee2   :  { %4548 = vmatpush1.bf16.msra.mxu0 %v7224_v45  ;;  %4612 = vmatpush3.bf16.msra.mxu1 %v7225_v31 }
 0xee3   :  { %4550 = vmatprep.subr.bf16.mxu0 %v7226_v37  ;;  %4614 = vmatprep.subr.bf16.mxu1 %v7227_v22 }
 0xee6   :  { %4552 = vmatpush1.bf16.msra.mxu0 %v7228_v24  ;;  %4616 = vmatpush3.bf16.msra.mxu1 %v7229_v21 }
 0xee7   :  { %4554 = vmatprep.subr.bf16.mxu0 %v7230_v16  ;;  %4618 = vmatprep.subr.bf16.mxu1 %v7231_v1 }
 0xeea   :  { %4556 = vmatpush1.bf16.msra.mxu0 %v7232_v6  ;;  %4620 = vmatpush3.bf16.msra.mxu1 %v7233_v57 }
 0xeeb   :  { %4558 = vmatprep.subr.bf16.mxu0 %v7234_v8  ;;  %4622 = vmatprep.subr.bf16.mxu1 %v7235_v50 }
 0xeee   :  { %4560 = vmatpush1.bf16.msra.mxu0 %v7236_v0 }
 0xeef   :  { %4562 = vmatprep.subr.bf16.mxu0 %v7237_v28 }
 0xef2   :  { %4564 = vmatpush1.bf16.msra.mxu0 %v7238_v53 }
 0xef3   :  { %4566 = vmatprep.subr.bf16.mxu0 %v7239_v55 }
 0xef6   :  { %4568 = vmatpush1.bf16.msra.mxu0 %v7240_v63 }
 0xef7   :  { %4570 = vmatprep.subr.bf16.mxu0 %v7241_v4 }
 0xefa   :  { %4572 = vmatpush1.bf16.msra.mxu0 %v7242_v12 }
 0xefb   :  { %4574 = vmatprep.subr.bf16.mxu0 %v7254_v15 }
 0xefe   :  { %4576 = vmatpush1.bf16.msra.mxu0 %v7281_v20 }
 0xeff   :  { %4578 = vmatprep.subr.bf16.mxu0 %v7282_v9 }
 0xf02   :  { %4580 = vmatpush1.bf16.msra.mxu0 %v7283_v54 }
 0xf03   :  { %4582 = vmatprep.subr.bf16.mxu0 %v7284_v60 }
 0xf06   :  { %4584 = vmatpush1.bf16.msra.mxu0 %v7285_v14 }
 0xf07   :  { %4586 = vmatprep.subr.bf16.mxu0 %v7286_v58 }
 0xf0a   :  { %4588 = vmatpush1.bf16.msra.mxu0 %v7287_v25 }
 0xf0b   :  { %4686 = vmatprep.subr.bf16.mxu0 %v7288_v46 }
 0xfa0   :  { %v2660_v52 = vpop.f32.mrb[26].mxu1  ;;  %v3693_v47 = vpop.f32.mrb[22].mxu0 }
 0xfa1   :  { %v2661_v29 = vadd.f32 %v2660_v52, %v7289_v51  ;;  %v2662_v26 = vpop.f32.mrb[27].mxu1  ;;  %v3694_v61 = vpop.f32.mrb[23].mxu0 }
 0xfa2   :  { %v2663_v3 = vadd.f32 %v2662_v26, %v6482_v59  ;;  %v3695_v38 = vadd.f32 %v3694_v61, %v3693_v47  ;;  %v7292_v26 = vld [vmem:[#allocation82_spill] sm:$0xff] }
 0xfa3   :  { %v2735_v11 = vadd.f32 %v2661_v29, %v7290_v10  ;;  %v7300_v10 = vld [vmem:[#allocation37_spill] sm:$0xff] }
 0xfa4   :  { %v2742_v60 = vadd.f32 %v2663_v3, %v7291_v13  ;;  %v2732_v52 = vadd.f32 %v3695_v38, %v6491_v49  ;;  %v7298_v3 = vld [vmem:[#allocation71_spill] sm:$0xff]  ;;  %v7299_v38 = vld [vmem:[#allocation72_spill] sm:$0xff] }
 0xfa5   :  { %v3456_v14 = vmul.f32 -1.442695, %v2735_v11 }
 0xfa6   :  { %v3457_v58 = vmul.f32 -1.442695, %v2742_v60 }
 0xfa7   :  { %4928 = vpow2.f32 %v3456_v14 }
 0xfa8   :  { %4930 = vpow2.f32 %v3457_v58 }
 0xfb1   :  { %v4929_v25 = vpop.eup %4928 }
 0xfb2   :  { %v2739_v54 = vadd.f32 1.0, %v4929_v25  ;;  %v4931_v46 = vpop.eup %4930 }
 0xfb3   :  { %v2746_v9 = vadd.f32 1.0, %v4931_v46  ;;  %v7296_v46 = vld [vmem:[#allocation69_spill] sm:$0xff] }
 0xfb4   :  { %4932 = vrcp.f32 %v2739_v54 }
 0xfb5   :  { %4934 = vrcp.f32 %v2746_v9  ;;  %v7294_v9 = vld [vmem:[#allocation67_spill] sm:$0xff] }
 0xfbe   :  { %v4933_v51 = vpop.eup %4932 }
 0xfbf   :  { %v2749_v20 = vmul.f32 %v4933_v51, %v2732_v52  ;;  %v4935_v29 = vpop.eup %4934  ;;  %v7297_v51 = vld [vmem:[#allocation70_spill] sm:$0xff] }
 0xfc0   :  { %v2752_v61 = vsub.f32 1.0, %v4935_v29  ;;  %v2754_v14 = vmul.f32 %v4935_v29, %v6686_v5 }
 0xfc1   :  { %v2750_v47 = vadd.f32 %v2749_v20, %v7292_v26  ;;  %v7293_v20 = vld [vmem:[#allocation66_spill] sm:$0xff]  ;;  %v7301_v26 = vld [vmem:[#allocation92_spill] sm:$0xff] }
 0xfc3   :  { %4936 = vtanh.f32 %v2750_v47 }
 0xfcd   :  { %v4937_v13 = vpop.eup %4936 }
 0xfce   :  { %v2753_v60 = vmul.f32 %v4937_v13, %v2752_v61 }
 0xfd0   :  { %v6747_v58 = vadd.f32 %v2754_v14, %v2753_v60  ;;  %v7302_v60 = vld [vmem:[#allocation83_spill] sm:$0xff] }
 0xfd2   :  { %v2757_v54 = vmul.f32 %v6747_v58, %v6501_v7  ;;  %v2756_v25 = vmul.f32 %v6498_v56, %v6747_v58 }
 0xfd4   :  { %2822 = vmatprep.mubr.f32.mxu0 %v2757_v54  ;;  %2893 = vmatprep.mubr.f32.mxu1 %v2757_v54 }
 0xfd5   :  { %2823 = vmatmul.mubr.f32.vlgmr.msra.gmra.mrb[24].mxu0 %v2756_v25  ;;  %2894 = vmatmul.mubr.f32.vlgmr.msra.gmra.mrb[28].mxu1 %v2756_v25  ;;  %v7303_v25 = vld [vmem:[#allocation84_spill] sm:$0xff] }
 0xfd6   :  { %4624 = vmatpush1.bf16.msra.mxu1 %v5968_v17  ;;  %4688 = vmatpush3.bf16.msra.mxu0 %v5919_v27 }
 0xfd7   :  { %4626 = vmatprep.subr.bf16.mxu1 %v5970_v19  ;;  %4690 = vmatprep.subr.bf16.mxu0 %v5923_v30 }
 0xfda   :  { %4628 = vmatpush1.bf16.msra.mxu1 %v5975_v32  ;;  %4692 = vmatpush3.bf16.msra.mxu0 %v5925_v33 }
 0xfdb   :  { %4630 = vmatprep.subr.bf16.mxu1 %v5977_v35  ;;  %4694 = vmatprep.subr.bf16.mxu0 %v5929_v36 }
 0xfde   :  { %4632 = vmatpush1.bf16.msra.mxu1 %v5981_v41  ;;  %4696 = vmatpush3.bf16.msra.mxu0 %v5931_v39 }
 0xfdf   :  { %4634 = vmatprep.subr.bf16.mxu1 %v5983_v44  ;;  %4698 = vmatprep.subr.bf16.mxu0 %v5934_v42 }
 0xfe2   :  { %4636 = vmatpush1.bf16.msra.mxu1 %v7216_v40  ;;  %4700 = vmatpush3.bf16.msra.mxu0 %v7217_v18 }
 0xfe3   :  { %4638 = vmatprep.subr.bf16.mxu1 %v7218_v62  ;;  %4702 = vmatprep.subr.bf16.mxu0 %v7219_v34 }
 0xfe6   :  { %4640 = vmatpush1.bf16.msra.mxu1 %v7220_v2  ;;  %4704 = vmatpush3.bf16.msra.mxu0 %v7221_v23 }
 0xfe7   :  { %4642 = vmatprep.subr.bf16.mxu1 %v7222_v48  ;;  %4706 = vmatprep.subr.bf16.mxu0 %v7223_v43 }
 0xfea   :  { %4644 = vmatpush1.bf16.msra.mxu1 %v7224_v45  ;;  %4708 = vmatpush3.bf16.msra.mxu0 %v7225_v31 }
 0xfeb   :  { %4646 = vmatprep.subr.bf16.mxu1 %v7226_v37  ;;  %4710 = vmatprep.subr.bf16.mxu0 %v7227_v22 }
 0xfee   :  { %4648 = vmatpush1.bf16.msra.mxu1 %v7228_v24  ;;  %4712 = vmatpush3.bf16.msra.mxu0 %v7229_v21 }
 0xfef   :  { %4650 = vmatprep.subr.bf16.mxu1 %v7230_v16  ;;  %4714 = vmatprep.subr.bf16.mxu0 %v7231_v1 }
 0xff2   :  { %4652 = vmatpush1.bf16.msra.mxu1 %v7232_v6  ;;  %4716 = vmatpush3.bf16.msra.mxu0 %v7233_v57 }
 0xff3   :  { %4654 = vmatprep.subr.bf16.mxu1 %v7234_v8  ;;  %4718 = vmatprep.subr.bf16.mxu0 %v7235_v50  ;;  %v7295_v50 = vld [vmem:[#allocation68_spill] sm:$0xff] }
 0xff6   :  { %4656 = vmatpush1.bf16.msra.mxu1 %v7236_v0 }
 0xff7   :  { %4658 = vmatprep.subr.bf16.mxu1 %v7237_v28 }
 0xffa   :  { %4660 = vmatpush1.bf16.msra.mxu1 %v7238_v53 }
 0xffb   :  { %4662 = vmatprep.subr.bf16.mxu1 %v7239_v55 }
 0xffe   :  { %4664 = vmatpush1.bf16.msra.mxu1 %v7240_v63 }
 0xfff   :  { %4666 = vmatprep.subr.bf16.mxu1 %v7241_v4 }
0x1002   :  { %4668 = vmatpush1.bf16.msra.mxu1 %v7242_v12 }
0x1003   :  { %4670 = vmatprep.subr.bf16.mxu1 %v7254_v15 }
0x1006   :  { %4672 = vmatpush1.bf16.msra.mxu1 %v7293_v20 }
0x1007   :  { %4674 = vmatprep.subr.bf16.mxu1 %v7294_v9 }
0x100a   :  { %4676 = vmatpush1.bf16.msra.mxu1 %v7295_v50 }
0x100b   :  { %4678 = vmatprep.subr.bf16.mxu1 %v7296_v46 }
0x100e   :  { %4680 = vmatpush1.bf16.msra.mxu1 %v7297_v51 }
0x100f   :  { %4682 = vmatprep.subr.bf16.mxu1 %v7298_v3 }
0x1012   :  { %4684 = vmatpush1.bf16.msra.mxu1 %v7299_v38 }
0x1013   :  { %4782 = vmatprep.subr.bf16.mxu1 %v7300_v10 }
0x10a8   :  { %v2824_v11 = vpop.f32.mrb[24].mxu0  ;;  %v3728_v52 = vpop.f32.mrb[28].mxu1 }
0x10a9   :  { %v2825_v47 = vadd.f32 %v2824_v11, %v7301_v26  ;;  %v2826_v29 = vpop.f32.mrb[25].mxu0  ;;  %v3729_v61 = vpop.f32.mrb[29].mxu1 }
0x10aa   :  { %v2827_v13 = vadd.f32 %v2826_v29, %v6482_v59  ;;  %v3730_v14 = vadd.f32 %v3729_v61, %v3728_v52  ;;  %v7304_v29 = vld [vmem:[#allocation85_spill] sm:$0xff] }
0x10ab   :  { %v2899_v54 = vadd.f32 %v2825_v47, %v7302_v60 }
0x10ac   :  { %v2906_v5 = vadd.f32 %v2827_v13, %v7303_v25  ;;  %v2896_v11 = vadd.f32 %v3730_v14, %v6491_v49  ;;  %v3288_v14 = vld [vmem:[%s7315_s4 + $0x10] sm:$0xff]  ;;  %v3306_v25 = vld [vmem:[%s7315_s4 + $0xa0] sm:$0xff] }
0x10ad   :  { %v3458_v51 = vmul.f32 -1.442695, %v2899_v54  ;;  %v3289_v54 = vld [vmem:[%s7315_s4 + $0x18] sm:$0xff] }
0x10ae   :  { %v3459_v3 = vmul.f32 -1.442695, %v2906_v5 }
0x10af   :  { %4938 = vpow2.f32 %v3458_v51 }
0x10b0   :  { %4940 = vpow2.f32 %v3459_v3 }
0x10b9   :  { %v4939_v38 = vpop.eup %4938 }
0x10ba   :  { %v2903_v46 = vadd.f32 1.0, %v4939_v38  ;;  %v4941_v10 = vpop.eup %4940 }
0x10bb   :  { %v2910_v50 = vadd.f32 1.0, %v4941_v10  ;;  %v3307_v10 = vld [vmem:[%s7315_s4 + $0xa8] sm:$0xff] }
0x10bc   :  { %4942 = vrcp.f32 %v2903_v46 }
0x10bd   :  { %4944 = vrcp.f32 %v2910_v50  ;;  %v3305_v50 = vld [vmem:[%s7315_s4 + $0x98] sm:$0xff] }
0x10c6   :  { %v4943_v26 = vpop.eup %4942 }
0x10c7   :  { %v2913_v9 = vmul.f32 %v4943_v26, %v2896_v11  ;;  %v4945_v47 = vpop.eup %4944  ;;  %v4819_v11 = vpack.c.bf16 %v3289_v54, %v3288_v14 }
0x10c8   :  { %v2916_v61 = vsub.f32 1.0, %v4945_v47  ;;  %v2918_v5 = vmul.f32 %v4945_v47, %v6747_v58  ;;  %v3291_v47 = vld [vmem:[%s7315_s4 + $0x28] sm:$0xff] }
0x10c9   :  { %v2914_v52 = vadd.f32 %v2913_v9, %v7304_v29  ;;  %v3304_v9 = vld [vmem:[%s7315_s4 + $0x90] sm:$0xff]  ;;  %v4821_v29 = vpack.c.bf16 %v3307_v10, %v3306_v25 }
0x10ca   :  { %v4817_v26 = vpack.c.bf16 %v3305_v50, %v3304_v9 }
0x10cb   :  { %4946 = vtanh.f32 %v2914_v52  ;;  %v3290_v52 = vld [vmem:[%s7315_s4 + $0x20] sm:$0xff] }
0x10d5   :  { %v4947_v13 = vpop.eup %4946 }
0x10d6   :  { %v2917_v60 = vmul.f32 %v4947_v13, %v2916_v61  ;;  %v3308_v61 = vld [vmem:[%s7315_s4 + $0xb0] sm:$0xff]  ;;  %v3309_v13 = vld [vmem:[%s7315_s4 + $0xb8] sm:$0xff] }
0x10d8   :  { %v6808_v51 = vadd.f32 %v2918_v5, %v2917_v60  ;;  %v4823_v60 = vpack.c.bf16 %v3291_v47, %v3290_v52  ;;  %v4825_v5 = vpack.c.bf16 %v3309_v13, %v3308_v61  ;;  %v7319_v52 = vld [vmem:[#allocation49_spill] sm:$0xff]  ;;  %v7320_v13 = vld [vmem:[#allocation48_spill] sm:$0xff] }
0x10d9   :  { %v3255_v47 = vrot.slane %v7319_v52, 2 }
0x10da   :  { %v2921_v46 = vmul.f32 %v6808_v51, %v6501_v7  ;;  %v2920_v3 = vmul.f32 %v6498_v56, %v6808_v51 }
0x10dc   :  { %2986 = vmatprep.mubr.f32.mxu1 %v2921_v46  ;;  %3057 = vmatprep.mubr.f32.mxu0 %v2921_v46  ;;  %v3292_v46 = vld [vmem:[%s7315_s4 + $0x30] sm:$0xff] }
0x10dd   :  { %2987 = vmatmul.mubr.f32.vlgmr.msra.gmra.mrb[30].mxu1 %v2920_v3  ;;  %3058 = vmatmul.mubr.f32.vlgmr.msra.gmra.mrb[26].mxu0 %v2920_v3  ;;  %v3293_v3 = vld [vmem:[%s7315_s4 + $0x38] sm:$0xff] }
0x10de   :  { %4720 = vmatpush1.bf16.msra.mxu0 %v5968_v17  ;;  %4784 = vmatpush3.bf16.msra.mxu1 %v5919_v27  ;;  %v7305_v27 = vld [vmem:[#allocation67_spill] sm:$0xff] }
0x10df   :  { %4722 = vmatprep.subr.bf16.mxu0 %v5970_v19  ;;  %4786 = vmatprep.subr.bf16.mxu1 %v5923_v30  ;;  %v7306_v30 = vld [vmem:[#allocation68_spill] sm:$0xff] }
0x10e2   :  { %4724 = vmatpush1.bf16.msra.mxu0 %v5975_v32  ;;  %4788 = vmatpush3.bf16.msra.mxu1 %v5925_v33  ;;  %v7307_v33 = vld [vmem:[#allocation69_spill] sm:$0xff]  ;;  %v7311_v32 = vld [vmem:[#allocation92_spill] sm:$0xff] }
0x10e3   :  { %4726 = vmatprep.subr.bf16.mxu0 %v5977_v35  ;;  %4790 = vmatprep.subr.bf16.mxu1 %v5929_v36  ;;  %v7308_v36 = vld [vmem:[#allocation70_spill] sm:$0xff] }
0x10e6   :  { %4728 = vmatpush1.bf16.msra.mxu0 %v5981_v41  ;;  %4792 = vmatpush3.bf16.msra.mxu1 %v5931_v39  ;;  %v7309_v39 = vld [vmem:[#allocation71_spill] sm:$0xff] }
0x10e7   :  { %4730 = vmatprep.subr.bf16.mxu0 %v5983_v44  ;;  %4794 = vmatprep.subr.bf16.mxu1 %v5934_v42  ;;  %v7310_v42 = vld [vmem:[#allocation72_spill] sm:$0xff] }
0x10ea   :  { %4732 = vmatpush1.bf16.msra.mxu0 %v7216_v40  ;;  %4796 = vmatpush3.bf16.msra.mxu1 %v7217_v18 }
0x10eb   :  { %4734 = vmatprep.subr.bf16.mxu0 %v7218_v62  ;;  %4798 = vmatprep.subr.bf16.mxu1 %v7219_v34  ;;  %v7312_v62 = vld [vmem:[#allocation86_spill] sm:$0xff] }
0x10ee   :  { %4736 = vmatpush1.bf16.msra.mxu0 %v7220_v2  ;;  %4800 = vmatpush3.bf16.msra.mxu1 %v7221_v23  ;;  %v7313_v2 = vld [vmem:[#allocation87_spill] sm:$0xff] }
0x10ef   :  { %4738 = vmatprep.subr.bf16.mxu0 %v7222_v48  ;;  %4802 = vmatprep.subr.bf16.mxu1 %v7223_v43 }
0x10f2   :  { %4740 = vmatpush1.bf16.msra.mxu0 %v7224_v45  ;;  %4804 = vmatpush3.bf16.msra.mxu1 %v7225_v31 }
0x10f3   :  { %4742 = vmatprep.subr.bf16.mxu0 %v7226_v37  ;;  %4806 = vmatprep.subr.bf16.mxu1 %v7227_v22 }
0x10f6   :  { %4744 = vmatpush1.bf16.msra.mxu0 %v7228_v24  ;;  %4808 = vmatpush3.bf16.msra.mxu1 %v7229_v21 }
0x10f7   :  { %4746 = vmatprep.subr.bf16.mxu0 %v7230_v16  ;;  %4810 = vmatprep.subr.bf16.mxu1 %v7231_v1  ;;  %v7314_v1 = vld [vmem:[#allocation88_spill] sm:$0xff] }
0x10fa   :  { %4748 = vmatpush1.bf16.msra.mxu0 %v7232_v6  ;;  %4812 = vmatpush3.bf16.msra.mxu1 %v7233_v57 }
0x10fb   :  { %4750 = vmatprep.subr.bf16.mxu0 %v7234_v8 }
0x10fe   :  { %4752 = vmatpush1.bf16.msra.mxu0 %v7236_v0 }
0x10ff   :  { %4754 = vmatprep.subr.bf16.mxu0 %v7237_v28 }
0x1102   :  { %4756 = vmatpush1.bf16.msra.mxu0 %v7238_v53 }
0x1103   :  { %4758 = vmatprep.subr.bf16.mxu0 %v7239_v55 }
0x1106   :  { %4760 = vmatpush1.bf16.msra.mxu0 %v7240_v63 }
0x1107   :  { %4762 = vmatprep.subr.bf16.mxu0 %v7241_v4 }
0x110a   :  { %4764 = vmatpush1.bf16.msra.mxu0 %v7242_v12  ;;  %v3302_v12 = vld [vmem:[%s7315_s4 + $0x80] sm:$0xff] }
0x110b   :  { %4766 = vmatprep.subr.bf16.mxu0 %v7254_v15  ;;  %v3303_v15 = vld [vmem:[%s7315_s4 + $0x88] sm:$0xff] }
0x110e   :  { %4768 = vmatpush1.bf16.msra.mxu0 %v7293_v20  ;;  %v3286_v20 = vld [vmem:[%s7315_s4] sm:$0xff] }
0x110f   :  { %4770 = vmatprep.subr.bf16.mxu0 %v7305_v27  ;;  %v3310_v27 = vld [vmem:[%s7315_s4 + $0xc0] sm:$0xff] }
0x1112   :  { %4772 = vmatpush1.bf16.msra.mxu0 %v7306_v30  ;;  %v3311_v30 = vld [vmem:[%s7315_s4 + $0xc8] sm:$0xff] }
0x1113   :  { %4774 = vmatprep.subr.bf16.mxu0 %v7307_v33  ;;  %v4827_v33 = vpack.c.bf16 %v3293_v3, %v3292_v46  ;;  %v7321_v46 = vld [vmem:[#allocation38_spill] sm:$0xff] }
0x1114   :  { %v3283_v3 = vsel %vm1615_vm5, %v3255_v47, %v7321_v46 }
0x1116   :  { %4776 = vmatpush1.bf16.msra.mxu0 %v7308_v36  ;;  %v4829_v36 = vpack.c.bf16 %v3311_v30, %v3310_v27  ;;  %v3258_v27 = vrot.slane %v6808_v51, 6  ;;  %v3275_v30 = vrot.slane %v6747_v58, 4 }
0x1117   :  { %4778 = vmatprep.subr.bf16.mxu0 %v7309_v39  ;;  %v3294_v39 = vld [vmem:[%s7315_s4 + $0x40] sm:$0xff] }
0x111a   :  { %4780 = vmatpush1.bf16.msra.mxu0 %v7310_v42  ;;  %v3295_v42 = vld [vmem:[%s7315_s4 + $0x48] sm:$0xff] }
0x11b0   :  { %v2988_v17 = vpop.f32.mrb[30].mxu1  ;;  %v3763_v19 = vpop.f32.mrb[26].mxu0 }
0x11b1   :  { %v2989_v35 = vadd.f32 %v2988_v17, %v7311_v32  ;;  %v2990_v41 = vpop.f32.mrb[31].mxu1  ;;  %v3764_v44 = vpop.f32.mrb[27].mxu0  ;;  %v3312_v17 = vld [vmem:[%s7315_s4 + $0xd0] sm:$0xff] }
0x11b2   :  { %v2991_v40 = vadd.f32 %v2990_v41, %v6482_v59  ;;  %v3765_v18 = vadd.f32 %v3764_v44, %v3763_v19  ;;  %v3313_v19 = vld [vmem:[%s7315_s4 + $0xd8] sm:$0xff]  ;;  %v3296_v44 = vld [vmem:[%s7315_s4 + $0x50] sm:$0xff] }
0x11b3   :  { %v3063_v34 = vadd.f32 %v2989_v35, %v7312_v62  ;;  %v4831_v35 = vpack.c.bf16 %v3295_v42, %v3294_v39  ;;  %v4833_v41 = vpack.c.bf16 %v3313_v19, %v3312_v17  ;;  %v3315_v62 = vld [vmem:[%s7315_s4 + $0xe8] sm:$0xff]  ;;  %v7322_v39 = vld [vmem:[#allocation93_spill] sm:$0xff] }
0x11b4   :  { %v3070_v23 = vadd.f32 %v2991_v40, %v7313_v2  ;;  %v3060_v24 = vadd.f32 %v3765_v18, %v6491_v49  ;;  %v3297_v40 = vld [vmem:[%s7315_s4 + $0x58] sm:$0xff]  ;;  %v3314_v18 = vld [vmem:[%s7315_s4 + $0xe0] sm:$0xff] }
0x11b5   :  { %v3460_v48 = vmul.f32 -1.442695, %v3063_v34  ;;  %v4835_v34 = vpack.c.bf16 %v3297_v40, %v3296_v44  ;;  %v4837_v2 = vpack.c.bf16 %v3315_v62, %v3314_v18  ;;  %v3271_v18 = vsel %vm1615_vm5, %v6747_v58, %v3258_v27 }
0x11b6   :  { %v3461_v43 = vmul.f32 -1.442695, %v3070_v23  ;;  %v3298_v23 = vld [vmem:[%s7315_s4 + $0x60] sm:$0xff] }
0x11b7   :  { %4948 = vpow2.f32 %v3460_v48  ;;  %v3299_v48 = vld [vmem:[%s7315_s4 + $0x68] sm:$0xff] }
0x11b8   :  { %4950 = vpow2.f32 %v3461_v43  ;;  %v3316_v43 = vld [vmem:[%s7315_s4 + $0xf0] sm:$0xff] }
0x11c1   :  { %v4949_v45 = vpop.eup %4948 }
0x11c2   :  { %v3067_v31 = vadd.f32 1.0, %v4949_v45  ;;  %v4951_v37 = vpop.eup %4950  ;;  %v3317_v45 = vld [vmem:[%s7315_s4 + $0xf8] sm:$0xff] }
0x11c3   :  { %v3074_v22 = vadd.f32 1.0, %v4951_v37  ;;  %v4841_v37 = vpack.c.bf16 %v3317_v45, %v3316_v43 }
0x11c4   :  { %4952 = vrcp.f32 %v3067_v31  ;;  %v4839_v31 = vpack.c.bf16 %v3299_v48, %v3298_v23  ;;  %v3464_v23 = vld [vmem:[#allocation27] ss:$0 sm:$0xff] }
0x11c5   :  { %4954 = vrcp.f32 %v3074_v22  ;;  %v3300_v22 = vld [vmem:[%s7315_s4 + $0x70] sm:$0xff] }
0x11ce   :  { %v4953_v21 = vpop.eup %4952 }
0x11cf   :  { %v3077_v16 = vmul.f32 %v4953_v21, %v3060_v24  ;;  %v4955_v57 = vpop.eup %4954  ;;  %v3301_v24 = vld [vmem:[%s7315_s4 + $0x78] sm:$0xff] }
0x11d0   :  { %v3080_v8 = vsub.f32 1.0, %v4955_v57  ;;  %v3082_v28 = vmul.f32 %v4955_v57, %v6808_v51  ;;  %v4843_v21 = vpack.c.bf16 %v3301_v24, %v3300_v22  ;;  %v3278_v51 = vrot.slane %v7322_v39, 4 }
0x11d1   :  { %v3078_v6 = vadd.f32 %v3077_v16, %v7314_v1 }
0x11d3   :  { %4956 = vtanh.f32 %v3078_v6 }
0x11dd   :  { %v4957_v0 = vpop.eup %4956 }
0x11de   :  { %v3081_v53 = vmul.f32 %v4957_v0, %v3080_v8 }
0x11e0   :  { %v6867_v55 = vadd.f32 %v3082_v28, %v3081_v53  ;;  %v7316_v53 = vld [vmem:[#allocation89_spill] sm:$0xff] }
0x11e2   :  { %v3085_v63 = vmul.f32 %v6867_v55, %v6501_v7  ;;  %v3084_v4 = vmul.f32 %v6498_v56, %v6867_v55  ;;  %v4813_v7 = vpack.c.bf16 %v3303_v15, %v3302_v12  ;;  %v3287_v56 = vld [vmem:[%s7315_s4 + $0x8] sm:$0xff] }
0x11e3   :  { %v4815_v38 = vpack.c.bf16 %v3287_v56, %v3286_v20 }
0x11e4   :  { %3150 = vmatprep.mubr.f32.mxu0 %v3085_v63  ;;  %3221 = vmatprep.mubr.f32.mxu1 %v3085_v63 }
0x11e5   :  { %3151 = vmatmul.mubr.f32.vlgmr.msra.gmra.mrb[28].mxu0 %v3084_v4  ;;  %3222 = vmatmul.mubr.f32.vlgmr.msra.gmra.mrb[32].mxu1 %v3084_v4  ;;  %v7317_v4 = vld [vmem:[#allocation90_spill] sm:$0xff] }
0x11e6   :  { %4814 = vmatprep.subr.bf16.mxu1 %v4813_v7 }
0x11e7   :  { %4816 = vmatpush3.bf16.msra.mxu1 %v4815_v38 }
0x11e8   :  { %4818 = vmatprep.subr.bf16.mxu1 %v4817_v26 }
0x11eb   :  { %4820 = vmatpush3.bf16.msra.mxu1 %v4819_v11 }
0x11ec   :  { %4822 = vmatprep.subr.bf16.mxu1 %v4821_v29 }
0x11ef   :  { %4824 = vmatpush3.bf16.msra.mxu1 %v4823_v60  ;;  %v3249_v60 = vrot.slane %v7320_v13, 6 }
0x11f0   :  { %4826 = vmatprep.subr.bf16.mxu1 %v4825_v5 }
0x11f1   :  { %v3266_v42 = vsel %vm1615_vm5, %v7322_v39, %v3249_v60  ;;  %v3284_v17 = vsel %vm3267_vm7, %v3283_v3, %v3249_v60 }
0x11f2   :  { %v3285_v40 = vsel %vm3269_vm8, %v3284_v17, %v3278_v51 }
0x11f3   :  { %4828 = vmatpush3.bf16.msra.mxu1 %v4827_v33 }
0x11f4   :  { %4830 = vmatprep.subr.bf16.mxu1 %v4829_v36 }
0x11f7   :  { %4832 = vmatpush3.bf16.msra.mxu1 %v4831_v35 }
0x11f8   :  { %4834 = vmatprep.subr.bf16.mxu1 %v4833_v41  ;;  %v3261_v41 = vrot.slane %v6867_v55, 4 }
0x11fa   :  { %v3272_v62 = vsel %vm3267_vm7, %v3271_v18, %v3261_v41 }
0x11fb   :  { %4836 = vmatpush3.bf16.msra.mxu1 %v4835_v34 }
0x11fc   :  { %4838 = vmatprep.subr.bf16.mxu1 %v4837_v2 }
0x11ff   :  { %4840 = vmatpush3.bf16.msra.mxu1 %v4839_v31 }
0x1200   :  { %4842 = vmatprep.subr.bf16.mxu1 %v4841_v37 }
0x1203   :  { %4844 = vmatpush3.bf16.msra.mxu1 %v4843_v21 }
0x12b8   :  { %v3152_v16 = vpop.f32.mrb[28].mxu0  ;;  %v3798_v1 = vpop.f32.mrb[32].mxu1 }
0x12b9   :  { %v3153_v6 = vadd.f32 %v3152_v16, %v7311_v32  ;;  %v3154_v57 = vpop.f32.mrb[29].mxu0  ;;  %v3799_v8 = vpop.f32.mrb[33].mxu1 }
0x12ba   :  { %v3155_v0 = vadd.f32 %v3154_v57, %v6482_v59  ;;  %v3800_v28 = vadd.f32 %v3799_v8, %v3798_v1  ;;  %v7318_v59 = vld [vmem:[#allocation91_spill] sm:$0xff] }
0x12bb   :  { %v3227_v63 = vadd.f32 %v3153_v6, %v7316_v53 }
0x12bc   :  { %v3234_v12 = vadd.f32 %v3155_v0, %v7317_v4  ;;  %v3224_v32 = vadd.f32 %v3800_v28, %v6491_v49  ;;  %v3252_v49 = vrot.slane %v7321_v46, 4 }
0x12bd   :  { %v3462_v15 = vmul.f32 -1.442695, %v3227_v63 }
0x12be   :  { %v3463_v20 = vmul.f32 -1.442695, %v3234_v12  ;;  %v3268_v35 = vsel %vm3267_vm7, %v3266_v42, %v3252_v49 }
0x12bf   :  { %4958 = vpow2.f32 %v3462_v15  ;;  %v3270_v44 = vsel %vm3269_vm8, %v3268_v35, %v3255_v47 }
0x12c0   :  { %4960 = vpow2.f32 %v3463_v20 }
0x12c9   :  { %v4959_v7 = vpop.eup %4958 }
0x12ca   :  { %v3231_v56 = vadd.f32 1.0, %v4959_v7  ;;  %v4961_v9 = vpop.eup %4960 }
0x12cb   :  { %v3238_v50 = vadd.f32 1.0, %v4961_v9 }
0x12cc   :  { %4962 = vrcp.f32 %v3231_v56 }
0x12cd   :  { %4964 = vrcp.f32 %v3238_v50 }
0x12d6   :  { %v4963_v38 = vpop.eup %4962 }
0x12d7   :  { %v3241_v26 = vmul.f32 %v4963_v38, %v3224_v32  ;;  %v4965_v54 = vpop.eup %4964 }
0x12d8   :  { %v3244_v25 = vsub.f32 1.0, %v4965_v54  ;;  %v3246_v29 = vmul.f32 %v4965_v54, %v6867_v55 }
0x12d9   :  { %v3242_v14 = vadd.f32 %v3241_v26, %v7318_v59 }
0x12db   :  { %4966 = vtanh.f32 %v3242_v14 }
0x12e5   :  { %v4967_v10 = vpop.eup %4966 }
0x12e6   :  { %v3245_v11 = vmul.f32 %v4967_v10, %v3244_v25 }
0x12e8   :  { %v3247_v61 = vadd.f32 %v3246_v29, %v3245_v11 }
0x12ea   :  { %v3264_v5 = vrot.slane %v3247_v61, 2 }
0x12ec   :  { %v3280_v33 = vsel %vm1615_vm5, %v3264_v5, %v6867_v55  ;;  %v3273_v34 = vsel %vm3269_vm8, %v3272_v62, %v3264_v5 }
0x12ed   :  { %v3281_v36 = vsel %vm3267_vm7, %v3280_v33, %v3258_v27 }
0x12ee   :  { %v3282_v19 = vsel %vm3269_vm8, %v3281_v36, %v3275_v30 }
0x12ef   :  { %3389 = vmatprep.mubr.f32.mxu1 %v3282_v19 }
0x12f0   :  { %3390 = vmatmul.mubr.f32.vlgmr.msra.gmra.mrb[34].mxu1 %v3270_v44 }
0x12f1   :  { %3394 = vmatprep.mubr.f32.mxu1 %v3285_v40 }
0x12f4   :  { %3395 = vmatmul.mubr.f32.gmra.mrb[36].mxu1 %v3273_v34 }
0x13c3   :  { %v3833_v2 = vpop.f32.mrb[34].mxu1 }
0x13c4   :  { %v3834_v48 = vpop.f32.mrb[35].mxu1 }
0x13c5   :  { %v3835_v43 = vadd.f32 %v3834_v48, %v3833_v2 }
0x13c7   :  { %v3392_v55 = vadd.f32 %v3835_v43, %v3464_v23  ;;  %v3836_v45 = vpop.f32.mrb[36].mxu1 }
0x13c8   :  { %v3837_v31 = vpop.f32.mrb[37].mxu1 }
0x13c9   :  { %3400 = vst [vmem:[%s7323_s10] sm:$0xff] %v3392_v55  ;;  %v3838_v37 = vadd.f32 %v3837_v31, %v3836_v45 }
0x13cb   :  { %v3397_v22 = vadd.f32 %v3838_v37, %v3464_v23 }
0x13cd   :  { %3401 = vst [vmem:[%s7323_s10 + $0x8] sm:$0xff] %v3397_v22 }
0x13ce   :  { %3406 = vsyncpa [#allocation3], 1 }
0x13cf   :  { %3407 = vsyncpa [#allocation5], 1 }
0x13d0   :  { %3408 = vsyncpa [#allocation8], 1 }
0x13d1   :  { %3409 = vsyncpa [#allocation11], 1 }
0x13d2   :  { %3410 = vsyncpa [#allocation14], 1 }
0x13d3   :  { %3411 = vsyncpa [#allocation17], 1 }
0x13d4   :  { %3412 = vsyncpa [#allocation20], 1 }
0x13d5   :  { %3413 = vsyncpa [#allocation23], 1 }
0x13d6   :  { %3414 = vsyncpa [#allocation26], 1 }

</bundles_post_ra>
